<compile_context>
chip_gen: v7x
topology: tpu7x:2x2x1
jax: 0.10.0
libtpu: 0.0.40
codegen_flags: <defaults>
</compile_context>

<pallas_src>
import functools

import numpy as np
import jax
import jax.numpy as jnp
from jax.experimental import pallas as pl
from jax.experimental.pallas import tpu as pltpu


# ------------------------------ fused kernel --------------------------------


def _resnet_block_kernel(x_ref, w1p_ref, s1p_ref, b1p_ref,
                         w2_ref, s2_ref, b2_ref,
                         w3_ref, s3_ref, b3_ref,
                         o_ref, pad_ref, *, W, c2, has_proj):
    """One batch image per grid step; all intermediates stay in VMEM."""
    M = x_ref.shape[0]                       # H*W flattened spatial rows
    P = (pad_ref.shape[0] - M) // 2          # 8-aligned halo rows above/below

    x = x_ref[...]                           # (M, c1) f32
    xb = x.astype(jnp.bfloat16)

    # ---- conv1 (1x1) + projection (1x1) fused into one MXU push -------------
    # w1p = [w1 | wp] along output channels; folded-BN affines fused likewise.
    y = jnp.dot(xb, w1p_ref[...], preferred_element_type=jnp.float32)
    y = y * s1p_ref[...] + b1p_ref[...]
    if has_proj:
        y1 = y[:, :c2]
        p = y[:, c2:]                        # projection: affine only, no act
    else:
        y1 = y
        p = x                                # identity residual (c1 == c3)
    y1 = y1 * jax.nn.sigmoid(y1)             # SiLU on conv1 only

    # ---- conv2: 3x3, pad=1, stride=1 via VMEM halo buffer + im2col ----------
    # Buffer row p = P + h*W + w holds pixel (h, w); the P zero rows above and
    # below absorb the vertical padding.  Only the halo rows are memset; the
    # middle M rows are fully overwritten by y1 every step.
    pad_ref[pl.ds(0, P), :] = jnp.zeros((P, c2), pad_ref.dtype)
    pad_ref[pl.ds(P + M, P), :] = jnp.zeros((P, c2), pad_ref.dtype)
    pad_ref[pl.ds(P, M), :] = y1

    # Left/right wrap masks generated in-kernel (cheap VPU compares).
    w_pos = jax.lax.broadcasted_iota(jnp.int32, (M, 1), 0) % W
    not_left = w_pos != 0                    # pixel has a valid left neighbour
    not_right = w_pos != W - 1               # pixel has a valid right neighbour

    taps = []
    for ddy in (-1, 0, 1):
        for ddx in (-1, 0, 1):
            tap = pad_ref[pl.ds(P + ddy * W + ddx, M), :]
            if ddx == -1:
                tap = jnp.where(not_left, tap, jnp.zeros_like(tap))
            elif ddx == 1:
                tap = jnp.where(not_right, tap, jnp.zeros_like(tap))
            taps.append(tap)
    col = jnp.concatenate(taps, axis=-1)     # (M, 9*c2) im2col, f32
    y2 = jnp.dot(col.astype(jnp.bfloat16), w2_ref[...],
                 preferred_element_type=jnp.float32)
    y2 = y2 * s2_ref[...] + b2_ref[...]
    y2 = y2 * jax.nn.sigmoid(y2)             # SiLU

    # ---- conv3: 1x1 + folded BN (no activation) -----------------------------
    y3 = jnp.dot(y2.astype(jnp.bfloat16), w3_ref[...],
                 preferred_element_type=jnp.float32)
    y3 = y3 * s3_ref[...] + b3_ref[...]

    # ---- residual add + ReLU -------------------------------------------------
    o_ref[...] = jnp.maximum(y3 + p, 0.0).astype(o_ref.dtype)


# ------------------------------- wrapper -------------------------------------


def _full_spec(shape):
    return pl.BlockSpec(shape, lambda i, nd=len(shape): (0,) * nd)


def resnet_block_forward(x_nchw, params, *, stride=1):
    """ResNetBlock.forward. Input/output NCHW (PyTorch convention)."""
    if stride != 1:
        # TODO(synk): strided conv2 needs strided halo reads in-kernel; only the
        # module default (stride=1) is implemented in the fused Pallas path.
        raise NotImplementedError("fused ResNetBlock kernel supports stride=1 only")

    n, c1, h, w = x_nchw.shape
    c2 = params["conv1"]["w"].shape[-1]
    c3 = params["conv3"]["w"].shape[-1]
    has_proj = "proj" in params
    assert has_proj or c1 == c3, "identity residual requires c1 == c3"

    m = h * w
    pad_top = ((w + 1 + 7) // 8) * 8          # 8-aligned halo (>= W+1 rows)
    pad_rows = m + 2 * pad_top

    # NCHW -> NHWC -> (N, H*W, C): channel-minor rows, matmul-friendly.
    # TODO(synk): keep NHWC end-to-end in the surrounding model so these
    # relayouts (an extra HBM round trip of the activation) disappear.
    x = jnp.transpose(x_nchw, (0, 2, 3, 1)).reshape(n, m, c1).astype(jnp.float32)

    # bf16 weights (native MXU path), f32 folded-BN affines.
    w1 = params["conv1"]["w"].reshape(c1, c2)
    s1 = params["conv1"]["scale"].reshape(1, c2)
    b1 = params["conv1"]["bias"].reshape(1, c2)
    if has_proj:
        wp = params["proj"]["w"].reshape(c1, c3)
        sp = params["proj"]["scale"].reshape(1, c3)
        bp = params["proj"]["bias"].reshape(1, c3)
        # conv1 + projection fused along output channels: one MXU push on x.
        w1p = jnp.concatenate([w1, wp], axis=1)
        s1p = jnp.concatenate([s1, sp], axis=1)
        b1p = jnp.concatenate([b1, bp], axis=1)
        co = c2 + c3
    else:
        w1p, s1p, b1p, co = w1, s1, b1, c2
    w1p = w1p.astype(jnp.bfloat16)
    s1p = s1p.astype(jnp.float32)
    b1p = b1p.astype(jnp.float32)

    # 3x3 conv as a single im2col matmul: (kh, kw, cin) flattened contraction.
    w2 = params["conv2"]["w"].reshape(9 * c2, c2).astype(jnp.bfloat16)
    s2 = params["conv2"]["scale"].reshape(1, c2).astype(jnp.float32)
    b2 = params["conv2"]["bias"].reshape(1, c2).astype(jnp.float32)
    w3 = params["conv3"]["w"].reshape(c2, c3).astype(jnp.bfloat16)
    s3 = params["conv3"]["scale"].reshape(1, c3).astype(jnp.float32)
    b3 = params["conv3"]["bias"].reshape(1, c3).astype(jnp.float32)

    args = [x, w1p, s1p, b1p, w2, s2, b2, w3, s3, b3]
    in_specs = [
        pl.BlockSpec((None, m, c1), lambda i: (i, 0, 0)),
        _full_spec((c1, co)), _full_spec((1, co)), _full_spec((1, co)),
        _full_spec((9 * c2, c2)), _full_spec((1, c2)), _full_spec((1, c2)),
        _full_spec((c2, c3)), _full_spec((1, c3)), _full_spec((1, c3)),
    ]

    flops = 2 * n * m * (c1 * co + 9 * c2 * c2 + c2 * c3)
    bytes_accessed = int(sum(int(np.prod(a.shape)) * a.dtype.itemsize for a in args)
                         + n * m * c3 * 4)
    cost = pl.CostEstimate(flops=flops, transcendentals=2 * n * m * c2,
                           bytes_accessed=bytes_accessed)

    # TODO(synk): at realistic H*W, replace the one-image-per-step grid with
    # spatial tiling (>=4-8 pipeline steps) and re-derive tile sizes / the VMEM
    # limit per chip generation (64 MiB on v7x vs 128 MiB on v5e/v6e).
    out = pl.pallas_call(
        functools.partial(_resnet_block_kernel, W=w, c2=c2, has_proj=has_proj),
        out_shape=jax.ShapeDtypeStruct((n, m, c3), jnp.float32),
        grid=(n,),
        in_specs=in_specs,
        out_specs=pl.BlockSpec((None, m, c3), lambda i: (i, 0, 0)),
        scratch_shapes=[pltpu.VMEM((pad_rows, c2), jnp.float32)],
        compiler_params=pltpu.CompilerParams(
            dimension_semantics=("parallel",),        # batch across TCs
            vmem_limit_bytes=32 * 1024 * 1024),       # tiny footprint at toy shapes
        cost_estimate=cost,
    )(*args)

    return jnp.transpose(out.reshape(n, h, w, c3), (0, 3, 1, 2))  # -> NCHW


# --------------------------- parameter init ----------------------------------


def _fold_bn(gamma, beta, mean, var, eps=1e-5):
    scale = gamma / jnp.sqrt(var + eps)
    bias = beta - mean * scale
    return scale, bias


def init_conv_params(key, cin, cout, k):
    kw, kg, kb, km, kv = jax.random.split(key, 5)
    w = 0.1 * jax.random.normal(kw, (k, k, cin, cout), jnp.float32)  # HWIO
    gamma = 1.0 + 0.1 * jax.random.normal(kg, (cout,), jnp.float32)
    beta = 0.1 * jax.random.normal(kb, (cout,), jnp.float32)
    mean = 0.1 * jax.random.normal(km, (cout,), jnp.float32)
    var = 1.0 + 0.1 * jax.random.uniform(kv, (cout,), jnp.float32)
    scale, bias = _fold_bn(gamma, beta, mean, var)
    return {"w": w, "scale": scale, "bias": bias}


# ---------------------------- pure-JAX reference ------------------------------


def _ref_conv(x, w, scale, bias, *, stride, padding, act):
    y = jax.lax.conv_general_dilated(
        x, w, window_strides=(stride, stride),
        padding=((padding, padding), (padding, padding)),
        dimension_numbers=("NHWC", "HWIO", "NHWC"),
        precision=jax.lax.Precision.HIGHEST)
    y = y * scale + bias
    if act:
        y = y * jax.nn.sigmoid(y)
    return y


def ref_block(x_nchw, params, *, stride=1):
    x = jnp.transpose(x_nchw, (0, 2, 3, 1))
    c1 = x.shape[-1]
    c3 = params["conv3"]["w"].shape[-1]
    y = _ref_conv(x, params["conv1"]["w"], params["conv1"]["scale"],
                  params["conv1"]["bias"], stride=1, padding=0, act=True)
    y = _ref_conv(y, params["conv2"]["w"], params["conv2"]["scale"],
                  params["conv2"]["bias"], stride=stride, padding=1, act=True)
    y = _ref_conv(y, params["conv3"]["w"], params["conv3"]["scale"],
                  params["conv3"]["bias"], stride=1, padding=0, act=False)
    if stride != 1 or c1 != c3:
        p = _ref_conv(x, params["proj"]["w"], params["proj"]["scale"],
                      params["proj"]["bias"], stride=stride, padding=0, act=False)
    else:
        p = x
    out = jnp.maximum(y + p, 0.0)
    return jnp.transpose(out, (0, 3, 1, 2))


# ---------------------------------- main --------------------------------------


if __name__ == "__main__":
    key = jax.random.PRNGKey(0)
    kx, k1, k2, k3, kp = jax.random.split(key, 5)

    N, c1, H, W = 2, 4, 16, 16
    c2, expansion, stride = 4, 4, 1
    c3 = expansion * c2

    x = jax.random.normal(kx, (N, c1, H, W), jnp.float32)
    params = {
        "conv1": init_conv_params(k1, c1, c2, 1),
        "conv2": init_conv_params(k2, c2, c2, 3),
        "conv3": init_conv_params(k3, c2, c3, 1),
    }
    if stride != 1 or c1 != c3:
        params["proj"] = init_conv_params(kp, c1, c3, 1)

    out = resnet_block_forward(x, params, stride=stride)
    out = jax.block_until_ready(out)

    ref = ref_block(x, params, stride=stride)
    assert out.shape == (N, c3, H // stride, W // stride), out.shape
    max_err = float(jnp.max(jnp.abs(out - ref)))
    # bf16 MXU operands vs f32 HIGHEST-precision reference.
    assert max_err < 2e-2, max_err

    print("KERNEL_OK")
</pallas_src>

<mosaic_0001>
module attributes {stable_mosaic.version = 11 : i64} {
  func.func @_resnet_block_kernel(%arg0: i32, %arg1: memref<1x256x4xf32, #tpu.memory_space<vmem>>, %arg2: memref<4x20xbf16, #tpu.memory_space<vmem>>, %arg3: memref<1x20xf32, #tpu.memory_space<vmem>>, %arg4: memref<1x20xf32, #tpu.memory_space<vmem>>, %arg5: memref<36x4xbf16, #tpu.memory_space<vmem>>, %arg6: memref<1x4xf32, #tpu.memory_space<vmem>>, %arg7: memref<1x4xf32, #tpu.memory_space<vmem>>, %arg8: memref<4x16xbf16, #tpu.memory_space<vmem>>, %arg9: memref<1x16xf32, #tpu.memory_space<vmem>>, %arg10: memref<1x16xf32, #tpu.memory_space<vmem>>, %arg11: memref<1x256x16xf32, #tpu.memory_space<vmem>>, %arg12: memref<304x4xf32, #tpu.memory_space<vmem>>) attributes {dimension_semantics = [#tpu.dimension_semantics<parallel>], iteration_bounds = array<i64: 2>, scalar_prefetch = 0 : i64, scratch_operands = 1 : i64, tpu.core_type = #tpu.core_type<tc>, window_params = [{transform_indices = @transform_0, window_bounds = array<i64: 1, 256, 4>}, {pipeline_mode = #tpu.pipeline_mode<synchronous>, transform_indices = @transform_1, window_bounds = array<i64: 4, 20>}, {pipeline_mode = #tpu.pipeline_mode<synchronous>, transform_indices = @transform_2, window_bounds = array<i64: 1, 20>}, {pipeline_mode = #tpu.pipeline_mode<synchronous>, transform_indices = @transform_3, window_bounds = array<i64: 1, 20>}, {pipeline_mode = #tpu.pipeline_mode<synchronous>, transform_indices = @transform_4, window_bounds = array<i64: 36, 4>}, {pipeline_mode = #tpu.pipeline_mode<synchronous>, transform_indices = @transform_5, window_bounds = array<i64: 1, 4>}, {pipeline_mode = #tpu.pipeline_mode<synchronous>, transform_indices = @transform_6, window_bounds = array<i64: 1, 4>}, {pipeline_mode = #tpu.pipeline_mode<synchronous>, transform_indices = @transform_7, window_bounds = array<i64: 4, 16>}, {pipeline_mode = #tpu.pipeline_mode<synchronous>, transform_indices = @transform_8, window_bounds = array<i64: 1, 16>}, {pipeline_mode = #tpu.pipeline_mode<synchronous>, transform_indices = @transform_9, window_bounds = array<i64: 1, 16>}, {transform_indices = @transform_10, window_bounds = array<i64: 1, 256, 16>}]} {
    %c0 = arith.constant 0 : index
    %c0_0 = arith.constant 0 : index
    %c0_1 = arith.constant 0 : index
    %0 = vector.load %arg1[%c0, %c0_0, %c0_1] : memref<1x256x4xf32, #tpu.memory_space<vmem>>, vector<1x256x4xf32>
    %1 = vector.shape_cast %0 : vector<1x256x4xf32> to vector<256x4xf32>
    %2 = arith.truncf %1 : vector<256x4xf32> to vector<256x4xbf16>
    %c0_2 = arith.constant 0 : index
    %c0_3 = arith.constant 0 : index
    %3 = vector.load %arg2[%c0_2, %c0_3] : memref<4x20xbf16, #tpu.memory_space<vmem>>, vector<4x20xbf16>
    %cst = arith.constant dense<0.000000e+00> : vector<256x20xf32>
    %4 = tpu.matmul %2, %3, %cst {dimension_numbers = #tpu.dot_dimension_numbers<[1], [0], [0], [1], [0, 0, 1, 1], [], []>} : vector<256x4xbf16>, vector<4x20xbf16>, vector<256x20xf32> -> vector<256x20xf32>
    %c0_4 = arith.constant 0 : index
    %c0_5 = arith.constant 0 : index
    %5 = vector.load %arg3[%c0_4, %c0_5] : memref<1x20xf32, #tpu.memory_space<vmem>>, vector<1x20xf32>
    %6 = vector.broadcast %5 : vector<1x20xf32> to vector<256x20xf32>
    %7 = arith.mulf %4, %6 : vector<256x20xf32>
    %c0_6 = arith.constant 0 : index
    %c0_7 = arith.constant 0 : index
    %8 = vector.load %arg4[%c0_6, %c0_7] : memref<1x20xf32, #tpu.memory_space<vmem>>, vector<1x20xf32>
    %9 = vector.broadcast %8 : vector<1x20xf32> to vector<256x20xf32>
    %10 = arith.addf %7, %9 : vector<256x20xf32>
    %11 = vector.extract_strided_slice %10 {offsets = [0, 0], sizes = [256, 4], strides = [1, 1]} : vector<256x20xf32> to vector<256x4xf32>
    %12 = vector.extract_strided_slice %10 {offsets = [0, 4], sizes = [256, 16], strides = [1, 1]} : vector<256x20xf32> to vector<256x16xf32>
    %13 = arith.negf %11 : vector<256x4xf32>
    %14 = math.exp %13 : vector<256x4xf32>
    %cst_8 = arith.constant 1.000000e+00 : f32
    %15 = vector.broadcast %cst_8 : f32 to vector<256x4xf32>
    %16 = arith.addf %15, %14 : vector<256x4xf32>
    %17 = arith.divf %15, %16 : vector<256x4xf32>
    %18 = arith.mulf %11, %17 : vector<256x4xf32>
    %cst_9 = arith.constant 0.000000e+00 : f32
    %19 = vector.broadcast %cst_9 : f32 to vector<24x4xf32>
    %c0_10 = arith.constant 0 : index
    %c0_11 = arith.constant 0 : index
    %20 = vector.load %arg12[%c0_10, %c0_11] : memref<304x4xf32, #tpu.memory_space<vmem>>, vector<24x4xf32>
    tpu.vector_store %arg12[%c0_10, %c0_11], %19 {strides = array<i32>} : memref<304x4xf32, #tpu.memory_space<vmem>>, vector<24x4xf32>,
    %cst_12 = arith.constant 0.000000e+00 : f32
    %21 = vector.broadcast %cst_12 : f32 to vector<24x4xf32>
    %c280 = arith.constant 280 : index
    %c0_13 = arith.constant 0 : index
    %22 = vector.load %arg12[%c280, %c0_13] : memref<304x4xf32, #tpu.memory_space<vmem>>, vector<24x4xf32>
    tpu.vector_store %arg12[%c280, %c0_13], %21 {strides = array<i32>} : memref<304x4xf32, #tpu.memory_space<vmem>>, vector<24x4xf32>,
    %c24 = arith.constant 24 : index
    %c0_14 = arith.constant 0 : index
    %23 = vector.load %arg12[%c24, %c0_14] : memref<304x4xf32, #tpu.memory_space<vmem>>, vector<256x4xf32>
    tpu.vector_store %arg12[%c24, %c0_14], %18 {strides = array<i32>} : memref<304x4xf32, #tpu.memory_space<vmem>>, vector<256x4xf32>,
    %24 = tpu.iota {dimensions = array<i32: 0>} : vector<256x1xi32>
    %c16_i32 = arith.constant 16 : i32
    %c0_i32 = arith.constant 0 : i32
    %25 = arith.cmpi eq, %c16_i32, %c0_i32 : i32
    %c1_i32 = arith.constant 1 : i32
    %26 = arith.select %25, %c1_i32, %c16_i32 : i32
    %27 = vector.broadcast %26 : i32 to vector<256x1xi32>
    %28 = arith.remsi %24, %27 : vector<256x1xi32>
    %c0_i32_15 = arith.constant 0 : i32
    %29 = vector.broadcast %c0_i32_15 : i32 to vector<256x1xi32>
    %30 = arith.cmpi ne, %28, %29 : vector<256x1xi32>
    %c0_i32_16 = arith.constant 0 : i32
    %31 = vector.broadcast %c0_i32_16 : i32 to vector<256x1xi32>
    %32 = arith.cmpi slt, %28, %31 : vector<256x1xi32>
    %c0_i32_17 = arith.constant 0 : i32
    %33 = arith.cmpi slt, %26, %c0_i32_17 : i32
    %34 = vector.broadcast %33 : i1 to vector<256x1xi1>
    %35 = vector.broadcast %34 : vector<256x1xi1> to vector<256x1xi1>
    %36 = arith.xori %32, %35 : vector<256x1xi1>
    %37 = arith.andi %36, %30 : vector<256x1xi1>
    %38 = vector.broadcast %26 : i32 to vector<256x1xi32>
    %39 = arith.addi %28, %38 : vector<256x1xi32>
    %40 = arith.select %37, %39, %28 : vector<256x1xi1>, vector<256x1xi32>
    %c0_i32_18 = arith.constant 0 : i32
    %41 = vector.broadcast %c0_i32_18 : i32 to vector<256x1xi32>
    %42 = arith.cmpi ne, %40, %41 : vector<256x1xi32>
    %c15_i32 = arith.constant 15 : i32
    %43 = vector.broadcast %c15_i32 : i32 to vector<256x1xi32>
    %44 = arith.cmpi ne, %40, %43 : vector<256x1xi32>
    %c7 = arith.constant 7 : index
    %c0_19 = arith.constant 0 : index
    %45 = vector.load %arg12[%c7, %c0_19] : memref<304x4xf32, #tpu.memory_space<vmem>>, vector<256x4xf32>
    %cst_20 = arith.constant 0.000000e+00 : f32
    %46 = vector.broadcast %cst_20 : f32 to vector<256x4xf32>
    %47 = vector.shape_cast %42 : vector<256x1xi1> to vector<256x1xi1>
    %48 = vector.broadcast %47 : vector<256x1xi1> to vector<256x4xi1>
    %49 = arith.select %48, %45, %46 : vector<256x4xi1>, vector<256x4xf32>
    %c8 = arith.constant 8 : index
    %c0_21 = arith.constant 0 : index
    %50 = vector.load %arg12[%c8, %c0_21] : memref<304x4xf32, #tpu.memory_space<vmem>>, vector<256x4xf32>
    %c9 = arith.constant 9 : index
    %c0_22 = arith.constant 0 : index
    %51 = vector.load %arg12[%c9, %c0_22] : memref<304x4xf32, #tpu.memory_space<vmem>>, vector<256x4xf32>
    %cst_23 = arith.constant 0.000000e+00 : f32
    %52 = vector.broadcast %cst_23 : f32 to vector<256x4xf32>
    %53 = vector.shape_cast %44 : vector<256x1xi1> to vector<256x1xi1>
    %54 = vector.broadcast %53 : vector<256x1xi1> to vector<256x4xi1>
    %55 = arith.select %54, %51, %52 : vector<256x4xi1>, vector<256x4xf32>
    %c23 = arith.constant 23 : index
    %c0_24 = arith.constant 0 : index
    %56 = vector.load %arg12[%c23, %c0_24] : memref<304x4xf32, #tpu.memory_space<vmem>>, vector<256x4xf32>
    %cst_25 = arith.constant 0.000000e+00 : f32
    %57 = vector.broadcast %cst_25 : f32 to vector<256x4xf32>
    %58 = vector.shape_cast %42 : vector<256x1xi1> to vector<256x1xi1>
    %59 = vector.broadcast %58 : vector<256x1xi1> to vector<256x4xi1>
    %60 = arith.select %59, %56, %57 : vector<256x4xi1>, vector<256x4xf32>
    %c24_26 = arith.constant 24 : index
    %c0_27 = arith.constant 0 : index
    %61 = vector.load %arg12[%c24_26, %c0_27] : memref<304x4xf32, #tpu.memory_space<vmem>>, vector<256x4xf32>
    %c25 = arith.constant 25 : index
    %c0_28 = arith.constant 0 : index
    %62 = vector.load %arg12[%c25, %c0_28] : memref<304x4xf32, #tpu.memory_space<vmem>>, vector<256x4xf32>
    %cst_29 = arith.constant 0.000000e+00 : f32
    %63 = vector.broadcast %cst_29 : f32 to vector<256x4xf32>
    %64 = vector.shape_cast %44 : vector<256x1xi1> to vector<256x1xi1>
    %65 = vector.broadcast %64 : vector<256x1xi1> to vector<256x4xi1>
    %66 = arith.select %65, %62, %63 : vector<256x4xi1>, vector<256x4xf32>
    %c39 = arith.constant 39 : index
    %c0_30 = arith.constant 0 : index
    %67 = vector.load %arg12[%c39, %c0_30] : memref<304x4xf32, #tpu.memory_space<vmem>>, vector<256x4xf32>
    %cst_31 = arith.constant 0.000000e+00 : f32
    %68 = vector.broadcast %cst_31 : f32 to vector<256x4xf32>
    %69 = vector.shape_cast %42 : vector<256x1xi1> to vector<256x1xi1>
    %70 = vector.broadcast %69 : vector<256x1xi1> to vector<256x4xi1>
    %71 = arith.select %70, %67, %68 : vector<256x4xi1>, vector<256x4xf32>
    %c40 = arith.constant 40 : index
    %c0_32 = arith.constant 0 : index
    %72 = vector.load %arg12[%c40, %c0_32] : memref<304x4xf32, #tpu.memory_space<vmem>>, vector<256x4xf32>
    %c41 = arith.constant 41 : index
    %c0_33 = arith.constant 0 : index
    %73 = vector.load %arg12[%c41, %c0_33] : memref<304x4xf32, #tpu.memory_space<vmem>>, vector<256x4xf32>
    %cst_34 = arith.constant 0.000000e+00 : f32
    %74 = vector.broadcast %cst_34 : f32 to vector<256x4xf32>
    %75 = vector.shape_cast %44 : vector<256x1xi1> to vector<256x1xi1>
    %76 = vector.broadcast %75 : vector<256x1xi1> to vector<256x4xi1>
    %77 = arith.select %76, %73, %74 : vector<256x4xi1>, vector<256x4xf32>
    %78 = tpu.concatenate %49, %50, %55, %60, %61, %66, %71, %72, %77 in 1 : vector<256x4xf32>, vector<256x4xf32>, vector<256x4xf32>, vector<256x4xf32>, vector<256x4xf32>, vector<256x4xf32>, vector<256x4xf32>, vector<256x4xf32>, vector<256x4xf32> -> vector<256x36xf32>
    %79 = arith.truncf %78 : vector<256x36xf32> to vector<256x36xbf16>
    %c0_35 = arith.constant 0 : index
    %c0_36 = arith.constant 0 : index
    %80 = vector.load %arg5[%c0_35, %c0_36] : memref<36x4xbf16, #tpu.memory_space<vmem>>, vector<36x4xbf16>
    %cst_37 = arith.constant dense<0.000000e+00> : vector<256x4xf32>
    %81 = tpu.matmul %79, %80, %cst_37 {dimension_numbers = #tpu.dot_dimension_numbers<[1], [0], [0], [1], [0, 0, 1, 1], [], []>} : vector<256x36xbf16>, vector<36x4xbf16>, vector<256x4xf32> -> vector<256x4xf32>
    %c0_38 = arith.constant 0 : index
    %c0_39 = arith.constant 0 : index
    %82 = vector.load %arg6[%c0_38, %c0_39] : memref<1x4xf32, #tpu.memory_space<vmem>>, vector<1x4xf32>
    %83 = vector.broadcast %82 : vector<1x4xf32> to vector<256x4xf32>
    %84 = arith.mulf %81, %83 : vector<256x4xf32>
    %c0_40 = arith.constant 0 : index
    %c0_41 = arith.constant 0 : index
    %85 = vector.load %arg7[%c0_40, %c0_41] : memref<1x4xf32, #tpu.memory_space<vmem>>, vector<1x4xf32>
    %86 = vector.broadcast %85 : vector<1x4xf32> to vector<256x4xf32>
    %87 = arith.addf %84, %86 : vector<256x4xf32>
    %88 = arith.negf %87 : vector<256x4xf32>
    %89 = math.exp %88 : vector<256x4xf32>
    %cst_42 = arith.constant 1.000000e+00 : f32
    %90 = vector.broadcast %cst_42 : f32 to vector<256x4xf32>
    %91 = arith.addf %90, %89 : vector<256x4xf32>
    %92 = arith.divf %90, %91 : vector<256x4xf32>
    %93 = arith.mulf %87, %92 : vector<256x4xf32>
    %94 = arith.truncf %93 : vector<256x4xf32> to vector<256x4xbf16>
    %c0_43 = arith.constant 0 : index
    %c0_44 = arith.constant 0 : index
    %95 = vector.load %arg8[%c0_43, %c0_44] : memref<4x16xbf16, #tpu.memory_space<vmem>>, vector<4x16xbf16>
    %cst_45 = arith.constant dense<0.000000e+00> : vector<256x16xf32>
    %96 = tpu.matmul %94, %95, %cst_45 {dimension_numbers = #tpu.dot_dimension_numbers<[1], [0], [0], [1], [0, 0, 1, 1], [], []>} : vector<256x4xbf16>, vector<4x16xbf16>, vector<256x16xf32> -> vector<256x16xf32>
    %c0_46 = arith.constant 0 : index
    %c0_47 = arith.constant 0 : index
    %97 = vector.load %arg9[%c0_46, %c0_47] : memref<1x16xf32, #tpu.memory_space<vmem>>, vector<1x16xf32>
    %98 = vector.broadcast %97 : vector<1x16xf32> to vector<256x16xf32>
    %99 = arith.mulf %96, %98 : vector<256x16xf32>
    %c0_48 = arith.constant 0 : index
    %c0_49 = arith.constant 0 : index
    %100 = vector.load %arg10[%c0_48, %c0_49] : memref<1x16xf32, #tpu.memory_space<vmem>>, vector<1x16xf32>
    %101 = vector.broadcast %100 : vector<1x16xf32> to vector<256x16xf32>
    %102 = arith.addf %99, %101 : vector<256x16xf32>
    %103 = arith.addf %102, %12 : vector<256x16xf32>
    %cst_50 = arith.constant 0.000000e+00 : f32
    %104 = vector.broadcast %cst_50 : f32 to vector<256x16xf32>
    %105 = arith.maximumf %103, %104 : vector<256x16xf32>
    %c0_51 = arith.constant 0 : index
    %c0_52 = arith.constant 0 : index
    %c0_53 = arith.constant 0 : index
    %106 = vector.load %arg11[%c0_51, %c0_52, %c0_53] : memref<1x256x16xf32, #tpu.memory_space<vmem>>, vector<1x256x16xf32>
    %107 = vector.shape_cast %106 : vector<1x256x16xf32> to vector<256x16xf32>
    %108 = vector.shape_cast %105 : vector<256x16xf32> to vector<1x256x16xf32>
    tpu.vector_store %arg11[%c0_51, %c0_52, %c0_53], %108 {strides = array<i32>} : memref<1x256x16xf32, #tpu.memory_space<vmem>>, vector<1x256x16xf32>,
    return
  }
  func.func @transform_0(%arg0: i32) -> (i32, i32, i32) {
    %c0_i32 = arith.constant 0 : i32
    %c0_i32_0 = arith.constant 0 : i32
    %c0_i32_1 = arith.constant 0 : i32
    return %arg0, %c0_i32, %c0_i32_0 : i32, i32, i32
  }
  func.func @transform_1(%arg0: i32) -> (i32, i32) {
    %c0_i32 = arith.constant 0 : i32
    %c0_i32_0 = arith.constant 0 : i32
    %c0_i32_1 = arith.constant 0 : i32
    return %c0_i32, %c0_i32_0 : i32, i32
  }
  func.func @transform_2(%arg0: i32) -> (i32, i32) {
    %c0_i32 = arith.constant 0 : i32
    %c0_i32_0 = arith.constant 0 : i32
    %c0_i32_1 = arith.constant 0 : i32
    return %c0_i32, %c0_i32_0 : i32, i32
  }
  func.func @transform_3(%arg0: i32) -> (i32, i32) {
    %c0_i32 = arith.constant 0 : i32
    %c0_i32_0 = arith.constant 0 : i32
    %c0_i32_1 = arith.constant 0 : i32
    return %c0_i32, %c0_i32_0 : i32, i32
  }
  func.func @transform_4(%arg0: i32) -> (i32, i32) {
    %c0_i32 = arith.constant 0 : i32
    %c0_i32_0 = arith.constant 0 : i32
    %c0_i32_1 = arith.constant 0 : i32
    return %c0_i32, %c0_i32_0 : i32, i32
  }
  func.func @transform_5(%arg0: i32) -> (i32, i32) {
    %c0_i32 = arith.constant 0 : i32
    %c0_i32_0 = arith.constant 0 : i32
    %c0_i32_1 = arith.constant 0 : i32
    return %c0_i32, %c0_i32_0 : i32, i32
  }
  func.func @transform_6(%arg0: i32) -> (i32, i32) {
    %c0_i32 = arith.constant 0 : i32
    %c0_i32_0 = arith.constant 0 : i32
    %c0_i32_1 = arith.constant 0 : i32
    return %c0_i32, %c0_i32_0 : i32, i32
  }
  func.func @transform_7(%arg0: i32) -> (i32, i32) {
    %c0_i32 = arith.constant 0 : i32
    %c0_i32_0 = arith.constant 0 : i32
    %c0_i32_1 = arith.constant 0 : i32
    return %c0_i32, %c0_i32_0 : i32, i32
  }
  func.func @transform_8(%arg0: i32) -> (i32, i32) {
    %c0_i32 = arith.constant 0 : i32
    %c0_i32_0 = arith.constant 0 : i32
    %c0_i32_1 = arith.constant 0 : i32
    return %c0_i32, %c0_i32_0 : i32, i32
  }
  func.func @transform_9(%arg0: i32) -> (i32, i32) {
    %c0_i32 = arith.constant 0 : i32
    %c0_i32_0 = arith.constant 0 : i32
    %c0_i32_1 = arith.constant 0 : i32
    return %c0_i32, %c0_i32_0 : i32, i32
  }
  func.func @transform_10(%arg0: i32) -> (i32, i32, i32) {
    %c0_i32 = arith.constant 0 : i32
    %c0_i32_0 = arith.constant 0 : i32
    %c0_i32_1 = arith.constant 0 : i32
    return %arg0, %c0_i32, %c0_i32_0 : i32, i32, i32
  }
}

</mosaic_0001>

<bundles_post_ra>
// kernel: tpu_custom_call.1
= control target key start
LH: loop header
LB: loop body
LE: loop exit
PB: predicated region body
PF: predicated region fallthrough
CT: control target
= control target key end

     0   :  { %s5539_s13 = smov 0   ;;  %s7717_s0 = inlined_call_operand.vmem [shape: f32[2,256,4], index: 0, kind: input, shape index: {}]   ;;  %s7718_s1 = inlined_call_operand.vmem [shape: bf16[4,20], index: 1, kind: input, shape index: {}]   ;;  %s7719_s2 = inlined_call_operand.vmem [shape: f32[1,20], index: 2, kind: input, shape index: {}]   ;;  %s7720_s3 = inlined_call_operand.vmem [shape: f32[1,20], index: 3, kind: input, shape index: {}]   ;;  %s7721_s4 = inlined_call_operand.vmem [shape: bf16[36,4], index: 4, kind: input, shape index: {}]   ;;  %s7722_s5 = inlined_call_operand.vmem [shape: f32[1,4], index: 5, kind: input, shape index: {}]   ;;  %s7723_s6 = inlined_call_operand.vmem [shape: f32[1,4], index: 6, kind: input, shape index: {}]   ;;  %s7724_s7 = inlined_call_operand.vmem [shape: bf16[4,16], index: 7, kind: input, shape index: {}]   ;;  %s7725_s8 = inlined_call_operand.vmem [shape: f32[1,16], index: 8, kind: input, shape index: {}]   ;;  %s7726_s9 = inlined_call_operand.vmem [shape: f32[1,16], index: 9, kind: input, shape index: {}]   ;;  %s7727_s10 = inlined_call_operand.vmem [shape: f32[2,256,16], index: 10, kind: output, shape index: {}]  }
   0x1 LB: > { %s4237_s14 = sadd.s32 4294967295, %s5472_s13   ;;  %p4241_p0 = scmp.ge.s32.totalorder %s5472_s13, 1  ;;  %s5472_s13 = sphi %s5539_s13, %s20_s13  }
   0x2   : > { %p312_p1 = scmp.lt.s32.totalorder %s5472_s13, 3 }
   0x4   : > { %p313_p2 = pnand %p4241_p0, %p312_p1 }
   0x6   : > { %316 = sbr.rel (%p313_p2) target bundleno = 1156 (0x484), region = 60 }
   0xd   : > { %v409_v0 = vld [vmem:[%s7718_s1] sm:$0x3]  ;;  %vm7737_vm0 = vcmask 1041408   ;;  %p350_p3 = scmp.lt.s32.totalorder %s4237_s14, 1  ;;  %vm7740_vm1 = vcmask 31744   ;;  %v5474_v50 = vmov 0.0  }
   0xe   : > { %4532 = vmatprep.subr.msk.bf16.mxu0 %vm7737_vm0, %v409_v0  ;;  %4533 = vmatprep.subr.msk.bf16.mxu1 %vm7737_vm0, %v409_v0  ;;  %v461_v1 = vsel %vm7737_vm0, %v409_v0, 0  ;;  %927 = vst.msk [vmem:[#allocation2 + $0x8] sm:$0xff] %vm7740_vm1, %v5474_v50  ;;  %928 = vst.msk [vmem:[#allocation2 + $0x10] sm:$0xff] %vm7740_vm1, %v5474_v50  ;;  %s5475_s21 = smov 4   ;;  %v5621_v54 = vld [vmem:[%s7719_s2] ss:$0 sm:$0xff] }
   0xf   : > { %4425 = vmatpush3.bf16.msra.mxu0 %v461_v1  ;;  %4531 = vmatpush3.bf16.msra.mxu1 %v461_v1  ;;  %s8346_s14 = smov (!%p350_p3, %s4237_s14), 1  ;;  %926 = vst.msk [vmem:[#allocation2] sm:$0xff] %vm7740_vm1, %v5474_v50  ;;  %929 = vst.msk [vmem:[#allocation2 + $0x118] sm:$0xff] %vm7740_vm1, %v5474_v50  ;;  %v5626_v56 = vld [vmem:[%s7720_s3] ss:$0 sm:$0xff]  ;;  %s5476_s26 = smov 8  }
  0x10   : > { %s4369_s17 = sshll.u32 %s8346_s14, 8  ;;  %930 = vst.msk [vmem:[#allocation2 + $0x120] sm:$0xff] %vm7740_vm1, %v5474_v50  ;;  %931 = vst.msk [vmem:[#allocation2 + $0x128] sm:$0xff] %vm7740_vm1, %v5474_v50  ;;  %s5477_s27 = smov 28  }
  0x11   : > { %s5561_s20 = scalar_lea.vmem %s7717_s0, %s4369_s17  ;;  %s5478_s28 = smov 16  }
  0x12   : > { %v361_v2 = vld [vmem:[%s5561_s20] sm:$0xff]  ;;  %v362_v3 = vld [vmem:[%s5561_s20 + $0x8] sm:$0xff]  ;;  %v363_v7 = vld [vmem:[%s5561_s20 + $0x10] sm:$0xff]  ;;  %s5479_s29 = smov 12   ;;  %s5480_s30 = smov 20  }
  0x13   : > { %v377_v4 = vld [vmem:[%s5561_s20 + $0x80] sm:$0xff]  ;;  %v393_v5 = vpack.c.bf16 %v362_v3, %v361_v2  ;;  %v378_v6 = vld [vmem:[%s5561_s20 + $0x88] sm:$0xff]  ;;  %v364_v8 = vld [vmem:[%s5561_s20 + $0x18] sm:$0xff]  ;;  %s5481_s11 = smov 24   ;;  %s5482_s12 = smov 32  }
  0x14   : > { %v401_v9 = vpack.c.bf16 %v378_v6, %v377_v4  ;;  %v394_v10 = vpack.c.bf16 %v364_v8, %v363_v7  ;;  %v379_v11 = vld [vmem:[%s5561_s20 + $0x90] sm:$0xff]  ;;  %v380_v12 = vld [vmem:[%s5561_s20 + $0x98] sm:$0xff]  ;;  %v365_v13 = vld [vmem:[%s5561_s20 + $0x20] sm:$0xff]  ;;  %s7591_s18 = scalar_lea.vmem %s7727_s10, %s4369_s17 }
  0x15   : > { %4426 = vmatprep.mubr.msk.bf16.mxu0 %vm7740_vm1, %v393_v5  ;;  %v402_v14 = vpack.c.bf16 %v380_v12, %v379_v11  ;;  %v366_v15 = vld [vmem:[%s5561_s20 + $0x28] sm:$0xff]  ;;  %v381_v16 = vld [vmem:[%s5561_s20 + $0xa0] sm:$0xff]  ;;  %v367_v20 = vld [vmem:[%s5561_s20 + $0x30] sm:$0xff] }
  0x16   : > { %v382_v17 = vld [vmem:[%s5561_s20 + $0xa8] sm:$0xff]  ;;  %4442 = vmatprep.mubr.msk.bf16.mxu1 %vm7740_vm1, %v401_v9  ;;  %4427 = vmatmul.mubr.msk.bf16.vlgmr.msra.gmra.mrb[0].mxu0 %vm7740_vm1, %v394_v10  ;;  %v395_v18 = vpack.c.bf16 %v366_v15, %v365_v13  ;;  %v368_v21 = vld [vmem:[%s5561_s20 + $0x38] sm:$0xff]  ;;  %v383_v22 = vld [vmem:[%s5561_s20 + $0xb0] sm:$0xff] }
  0x17   : > { %v403_v19 = vpack.c.bf16 %v382_v17, %v381_v16  ;;  %4443 = vmatmul.mubr.msk.bf16.vlgmr.msra.gmra.mrb[0].mxu1 %vm7740_vm1, %v402_v14  ;;  %v384_v23 = vld [vmem:[%s5561_s20 + $0xb8] sm:$0xff]  ;;  %v369_v24 = vld [vmem:[%s5561_s20 + $0x40] sm:$0xff]  ;;  %v370_v25 = vld [vmem:[%s5561_s20 + $0x48] sm:$0xff]  ;;  %v396_v26 = vpack.c.bf16 %v368_v21, %v367_v20 }
  0x18   : > { %4430 = vmatprep.mubr.msk.bf16.mxu0 %vm7740_vm1, %v395_v18  ;;  %v385_v27 = vld [vmem:[%s5561_s20 + $0xc0] sm:$0xff]  ;;  %v386_v28 = vld [vmem:[%s5561_s20 + $0xc8] sm:$0xff]  ;;  %v404_v29 = vpack.c.bf16 %v384_v23, %v383_v22  ;;  %v397_v30 = vpack.c.bf16 %v370_v25, %v369_v24  ;;  %v371_v32 = vld [vmem:[%s5561_s20 + $0x50] sm:$0xff] }
  0x19   : > { %4446 = vmatprep.mubr.msk.bf16.mxu1 %vm7740_vm1, %v403_v19  ;;  %v405_v31 = vpack.c.bf16 %v386_v28, %v385_v27  ;;  %v372_v33 = vld [vmem:[%s5561_s20 + $0x58] sm:$0xff]  ;;  %v373_v34 = vld [vmem:[%s5561_s20 + $0x60] sm:$0xff]  ;;  %v374_v35 = vld [vmem:[%s5561_s20 + $0x68] sm:$0xff]  ;;  %v964_v27 = vlaneseq }
  0x1a   : > { %v387_v36 = vld [vmem:[%s5561_s20 + $0xd0] sm:$0xff]  ;;  %v388_v37 = vld [vmem:[%s5561_s20 + $0xd8] sm:$0xff]  ;;  %v389_v38 = vld [vmem:[%s5561_s20 + $0xe0] sm:$0xff]  ;;  %v398_v40 = vpack.c.bf16 %v372_v33, %v371_v32  ;;  %v399_v41 = vpack.c.bf16 %v374_v35, %v373_v34 }
  0x1b   : > { %v390_v39 = vld [vmem:[%s5561_s20 + $0xe8] sm:$0xff]  ;;  %v406_v42 = vpack.c.bf16 %v388_v37, %v387_v36  ;;  %v375_v44 = vld [vmem:[%s5561_s20 + $0x70] sm:$0xff]  ;;  %v376_v45 = vld [vmem:[%s5561_s20 + $0x78] sm:$0xff] }
  0x1c   : > { %v407_v43 = vpack.c.bf16 %v390_v39, %v389_v38  ;;  %v391_v46 = vld [vmem:[%s5561_s20 + $0xf0] sm:$0xff]  ;;  %v392_v47 = vld [vmem:[%s5561_s20 + $0xf8] sm:$0xff]  ;;  %v400_v48 = vpack.c.bf16 %v376_v45, %v375_v44  ;;  %v1573_v51 = vld [vmem:[#allocation2 + $0x8] sm:$0xff] }
  0x1d   : > { %v408_v49 = vpack.c.bf16 %v392_v47, %v391_v46  ;;  %v1574_v52 = vld [vmem:[#allocation2 + $0x10] sm:$0xff] }
  0x1e   : > { %4431 = vmatmul.mubr.msk.bf16.gmra.mrb[4].mxu0 %vm7740_vm1, %v396_v26  ;;  %v4554_v53 = vpack.i.bf16 %v1574_v52, %v1573_v51 }
  0x1f   : > { %4447 = vmatmul.mubr.msk.bf16.gmra.mrb[4].mxu1 %vm7740_vm1, %v404_v29  ;;  %4434 = vmatprep.mubr.msk.bf16.mxu0 %vm7740_vm1, %v397_v30 }
  0x20   : > { %4450 = vmatprep.mubr.msk.bf16.mxu1 %vm7740_vm1, %v405_v31  ;;  %4555 = vrot.lane.b32.xlu0 %v4554_v53, %s5475_s21 }
  0x26   : > { %4435 = vmatmul.mubr.msk.bf16.gmra.mrb[8].mxu0 %vm7740_vm1, %v398_v40 }
  0x27   : > { %4438 = vmatprep.mubr.msk.bf16.mxu0 %vm7740_vm1, %v399_v41  ;;  %4451 = vmatmul.mubr.msk.bf16.gmra.mrb[8].mxu1 %vm7740_vm1, %v406_v42 }
  0x28   : > { %4454 = vmatprep.mubr.msk.bf16.mxu1 %vm7740_vm1, %v407_v43 }
  0x2e   : > { %4439 = vmatmul.mubr.msk.bf16.gmra.mrb[12].mxu0 %vm7740_vm1, %v400_v48  ;;  %v5693_v48 = vshrl.u32 %v964_v27, 7 }
  0x2f   : > { %4455 = vmatmul.mubr.msk.bf16.gmra.mrb[12].mxu1 %vm7740_vm1, %v408_v49 }
  0xe9   : > { %v4428_v55 = vpop.f32.mrb[0].mxu0 }
  0xea   : > { %v633_v57 = vmul.f32 %v4428_v55, %v5621_v54  ;;  %v4444_v58 = vpop.f32.mrb[0].mxu1  ;;  %v497_v59 = vpop.f32.mrb[1].mxu0 }
  0xeb   : > { %v649_v60 = vmul.f32 %v4444_v58, %v5621_v54  ;;  %v631_v61 = vmul.f32 %v5621_v54, %v497_v59  ;;  %v561_v62 = vpop.f32.mrb[1].mxu1  ;;  %v4429_v63 = vpop.f32.mrb[2].mxu0 }
  0xec   : > { %v5632_v0 = vadd.f32 %v5626_v56, %v633_v57  ;;  %v647_v1 = vmul.f32 %v5621_v54, %v561_v62  ;;  %v634_v2 = vmul.f32 %v4429_v63, %v5621_v54  ;;  %v4445_v3 = vpop.f32.mrb[2].mxu1  ;;  %v500_v4 = vpop.f32.mrb[3].mxu0 }
  0xed   : > { %v5637_v5 = vadd.f32 %v5626_v56, %v649_v60  ;;  %v5640_v6 = vadd.f32 %v5626_v56, %v631_v61  ;;  %v650_v7 = vmul.f32 %v4445_v3, %v5621_v54  ;;  %v632_v8 = vmul.f32 %v5621_v54, %v500_v4  ;;  %v564_v9 = vpop.f32.mrb[3].mxu1 }
  0xee   : > { %7814 = vst [vmem:[#allocation3_spill] sm:$0xff] %v5632_v0  ;;  %v4266_v10 = vmul.f32 -1.442695, %v5632_v0  ;;  %v5646_v11 = vadd.f32 %v5626_v56, %v647_v1  ;;  %v5649_v12 = vadd.f32 %v5626_v56, %v634_v2  ;;  %v648_v13 = vmul.f32 %v5621_v54, %v564_v9 }
  0xef   : > { %7815 = vst [vmem:[#allocation4_spill] sm:$0xff] %v5637_v5  ;;  %7816 = vst [vmem:[#allocation5_spill] sm:$0xff] %v5640_v6  ;;  %v4282_v14 = vmul.f32 -1.442695, %v5637_v5  ;;  %v4264_v15 = vmul.f32 -1.442695, %v5640_v6  ;;  %v5655_v16 = vadd.f32 %v5626_v56, %v650_v7  ;;  %v5658_v17 = vadd.f32 %v5626_v56, %v632_v8 }
  0xf0   : > { %7817 = vst [vmem:[#allocation6_spill] sm:$0xff] %v5646_v11  ;;  %7818 = vst [vmem:[#allocation7_spill] sm:$0xff] %v5649_v12  ;;  %5197 = vpow2.f32 %v4266_v10  ;;  %v4280_v18 = vmul.f32 -1.442695, %v5646_v11  ;;  %v4267_v19 = vmul.f32 -1.442695, %v5649_v12  ;;  %v5663_v20 = vadd.f32 %v5626_v56, %v648_v13 }
  0xf1   : > { %7819 = vst [vmem:[#allocation8_spill] sm:$0xff] %v5655_v16  ;;  %7820 = vst [vmem:[#allocation9_spill] sm:$0xff] %v5658_v17  ;;  %5199 = vpow2.f32 %v4282_v14  ;;  %v4283_v21 = vmul.f32 -1.442695, %v5655_v16  ;;  %v4432_v22 = vpop.f32.mrb[4].mxu0  ;;  %v5705_v3 = vadd.s32 8, %v5693_v48 }
  0xf2   : > { %7821 = vst [vmem:[#allocation10_spill] sm:$0xff] %v5663_v20  ;;  %5201 = vpow2.f32 %v4264_v15  ;;  %v4265_v23 = vmul.f32 -1.442695, %v5658_v17  ;;  %v637_v24 = vmul.f32 %v4432_v22, %v5621_v54  ;;  %v4448_v25 = vpop.f32.mrb[4].mxu1  ;;  %v513_v26 = vpop.f32.mrb[5].mxu0  ;;  %v5711_v10 = vadd.s32 16, %v5693_v48 }
  0xf3   : > { %5203 = vpow2.f32 %v4280_v18  ;;  %v4281_v28 = vmul.f32 -1.442695, %v5663_v20  ;;  %v653_v29 = vmul.f32 %v4448_v25, %v5621_v54  ;;  %v635_v30 = vmul.f32 %v5621_v54, %v513_v26  ;;  %v577_v31 = vpop.f32.mrb[5].mxu1  ;;  %v4433_v32 = vpop.f32.mrb[6].mxu0 }
  0xf4   : > { %5205 = vpow2.f32 %v4267_v19  ;;  %v5672_v33 = vadd.f32 %v5626_v56, %v637_v24  ;;  %v651_v34 = vmul.f32 %v5621_v54, %v577_v31  ;;  %v638_v35 = vmul.f32 %v4433_v32, %v5621_v54  ;;  %v4449_v36 = vpop.f32.mrb[6].mxu1  ;;  %v516_v37 = vpop.f32.mrb[7].mxu0 }
  0xf5   : > { %5207 = vpow2.f32 %v4283_v21  ;;  %v5677_v38 = vadd.f32 %v5626_v56, %v653_v29  ;;  %v5680_v39 = vadd.f32 %v5626_v56, %v635_v30  ;;  %v580_v40 = vpop.f32.mrb[7].mxu1  ;;  %v654_v51 = vmul.f32 %v4449_v36, %v5621_v54 }
  0xf6   : > { %7822 = vst [vmem:[#allocation11_spill] sm:$0xff] %v5672_v33  ;;  %5209 = vpow2.f32 %v4265_v23  ;;  %v4270_v41 = vmul.f32 -1.442695, %v5672_v33  ;;  %v5684_v42 = vadd.f32 %v5626_v56, %v651_v34  ;;  %v5687_v43 = vadd.f32 %v5626_v56, %v638_v35 }
  0xf7   : > { %7823 = vst [vmem:[#allocation12_spill] sm:$0xff] %v5677_v38  ;;  %7824 = vst [vmem:[#allocation13_spill] sm:$0xff] %v5680_v39  ;;  %5211 = vpow2.f32 %v4281_v28  ;;  %v4286_v44 = vmul.f32 -1.442695, %v5677_v38  ;;  %v4268_v45 = vmul.f32 -1.442695, %v5680_v39  ;;  %v636_v58 = vmul.f32 %v5621_v54, %v516_v37 }
  0xf8   : > { %7825 = vst [vmem:[#allocation14_spill] sm:$0xff] %v5684_v42  ;;  %7826 = vst [vmem:[#allocation15_spill] sm:$0xff] %v5687_v43  ;;  %5213 = vpow2.f32 %v4270_v41  ;;  %v4284_v46 = vmul.f32 -1.442695, %v5684_v42  ;;  %v4271_v47 = vmul.f32 -1.442695, %v5687_v43  ;;  %v652_v63 = vmul.f32 %v5621_v54, %v580_v40 }
  0xf9   : > { %5215 = vpow2.f32 %v4286_v44  ;;  %v4436_v49 = vpop.f32.mrb[8].mxu0  ;;  %v5714_v15 = vadd.f32 %v5626_v56, %v654_v51  ;;  %v5718_v22 = vadd.f32 %v5626_v56, %v636_v58  ;;  %v1008_v26 = vand.u32 15, %v5705_v3 }
  0xfa   : > { %v5198_v50 = vpop.eup %5197  ;;  %5217 = vpow2.f32 %v4268_v45  ;;  %v529_v52 = vpop.f32.mrb[9].mxu0  ;;  %v641_v8 = vmul.f32 %v4436_v49, %v5621_v54  ;;  %v5721_v25 = vadd.f32 %v5626_v56, %v652_v63  ;;  %v1015_v31 = vand.u32 15, %v5711_v10 }
  0xfb   : > { %v5696_v53 = vpop.f32.mrb[8].mxu1  ;;  %v5200_v55 = vpop.eup %5199  ;;  %v800_v57 = vadd.f32 1.0, %v5198_v50  ;;  %5219 = vpow2.f32 %v4284_v46  ;;  %7827 = vst [vmem:[#allocation16_spill] sm:$0xff] %v5714_v15  ;;  %v639_v18 = vmul.f32 %v5621_v54, %v529_v52  ;;  %7828 = vst [vmem:[#allocation17_spill] sm:$0xff] %v5718_v22  ;;  %v4287_v35 = vmul.f32 -1.442695, %v5714_v15 }
  0xfc   : > { %v4437_v59 = vpop.f32.mrb[10].mxu0  ;;  %v5699_v60 = vpop.f32.mrb[9].mxu1  ;;  %v816_v62 = vadd.f32 1.0, %v5200_v55  ;;  %5221 = vpow2.f32 %v4271_v47  ;;  %7829 = vst [vmem:[#allocation18_spill] sm:$0xff] %v5721_v25  ;;  %v5725_v29 = vadd.f32 %v5626_v56, %v641_v8  ;;  %v4269_v45 = vmul.f32 -1.442695, %v5718_v22 }
  0xfd   : > { %v5202_v61 = vpop.eup %5201  ;;  %v532_v1 = vpop.f32.mrb[11].mxu0  ;;  %5223 = vrcp.f32 %v800_v57  ;;  %v5730_v36 = vadd.f32 %v5626_v56, %v639_v18  ;;  %v642_v46 = vmul.f32 %v4437_v59, %v5621_v54  ;;  %v4285_v52 = vmul.f32 -1.442695, %v5721_v25 }
  0xfe   : > { %v5702_v2 = vpop.f32.mrb[10].mxu1  ;;  %v5204_v4 = vpop.eup %5203  ;;  %v798_v7 = vadd.f32 1.0, %v5202_v61  ;;  %5225 = vrcp.f32 %v816_v62  ;;  %7830 = vst [vmem:[#allocation19_spill] sm:$0xff] %v5725_v29  ;;  %v640_v55 = vmul.f32 %v5621_v54, %v532_v1  ;;  %v4274_v63 = vmul.f32 -1.442695, %v5725_v29 }
  0xff   : > { %v5708_v9 = vpop.f32.mrb[11].mxu1  ;;  %v5206_v13 = vpop.eup %5205  ;;  %v814_v14 = vadd.f32 1.0, %v5204_v4  ;;  %7831 = vst [vmem:[#allocation20_spill] sm:$0xff] %v5730_v36  ;;  %vm5805_vm2 = vcmp.ne.s32.totalorder %v1008_v26, 15  ;;  %vm5814_vm3 = vcmp.ne.s32.totalorder %v1015_v31, 0  ;;  %v1001_v31 = vand.u32 15, %v5693_v48 }
 0x100   : > { %v5208_v19 = vpop.eup %5207  ;;  %5227 = vrcp.f32 %v798_v7  ;;  %v801_v21 = vadd.f32 1.0, %v5206_v13  ;;  %v4272_v13 = vmul.f32 -1.442695, %v5730_v36 }
 0x101   : > { %v5210_v23 = vpop.eup %5209  ;;  %5229 = vrcp.f32 %v814_v14  ;;  %v817_v24 = vadd.f32 1.0, %v5208_v19  ;;  %v4440_v30 = vpop.f32.mrb[12].mxu0  ;;  %v5751_v19 = vadd.f32 %v5626_v56, %v642_v46  ;;  %vm5861_vm4 = vcmp.ne.s32.totalorder %v1001_v31, 0 }
 0x102   : > { %v5212_v27 = vpop.eup %5211  ;;  %5231 = vrcp.f32 %v801_v21  ;;  %v799_v28 = vadd.f32 1.0, %v5210_v23  ;;  %v545_v37 = vpop.f32.mrb[13].mxu0  ;;  %v645_v59 = vmul.f32 %v4440_v30, %v5621_v54 }
 0x103   : > { %v5214_v32 = vpop.eup %5213  ;;  %5233 = vrcp.f32 %v817_v24  ;;  %v815_v34 = vadd.f32 1.0, %v5212_v27  ;;  %v5732_v40 = vpop.f32.mrb[12].mxu1  ;;  %v643_v1 = vmul.f32 %v5621_v54, %v545_v37  ;;  %7832 = vst [vmem:[#allocation21_spill] sm:$0xff] %v5751_v19  ;;  %v5756_v27 = vadd.f32 %v5626_v56, %v640_v55 }
 0x104   : > { %v5216_v41 = vpop.eup %5215  ;;  %5235 = vrcp.f32 %v799_v28  ;;  %v804_v44 = vadd.f32 1.0, %v5214_v32  ;;  %v4441_v47 = vpop.f32.mrb[14].mxu0  ;;  %v657_v28 = vmul.f32 %v5696_v53, %v5621_v54  ;;  %v655_v37 = vmul.f32 %v5621_v54, %v5699_v60 }
 0x105   : > { %v5736_v49 = vpop.f32.mrb[13].mxu1  ;;  %v5218_v50 = vpop.eup %5217  ;;  %5237 = vrcp.f32 %v815_v34  ;;  %v820_v51 = vadd.f32 1.0, %v5216_v41  ;;  %v646_v21 = vmul.f32 %v4441_v47, %v5621_v54  ;;  %7833 = vst [vmem:[#allocation22_spill] sm:$0xff] %v5756_v27  ;;  %v5762_v34 = vadd.f32 %v5626_v56, %v645_v59 }
 0x106   : > { %v5740_v57 = vpop.f32.mrb[15].mxu0  ;;  %v5742_v58 = vpop.f32.mrb[14].mxu1  ;;  %5239 = vrcp.f32 %v804_v44  ;;  %v802_v62 = vadd.f32 1.0, %v5218_v50  ;;  %v5769_v46 = vadd.f32 %v5626_v56, %v643_v1  ;;  %v658_v53 = vmul.f32 %v5702_v2, %v5621_v54 }
 0x107   : > { %v5220_v61 = vpop.eup %5219  ;;  %v5746_v4 = vpop.f32.mrb[15].mxu1  ;;  %5241 = vrcp.f32 %v820_v51  ;;  %7834 = vst [vmem:[#allocation23_spill] sm:$0xff] %v5762_v34  ;;  %v4275_v60 = vmul.f32 -1.442695, %v5751_v19  ;;  %v5777_v51 = vadd.f32 %v5626_v56, %v646_v21  ;;  %v5783_v2 = vadd.f32 %v5626_v56, %v657_v28 }
 0x108   : > { %v5222_v7 = vpop.eup %5221  ;;  %v818_v8 = vadd.f32 1.0, %v5220_v61  ;;  %5243 = vrcp.f32 %v802_v62  ;;  %7835 = vst [vmem:[#allocation24_spill] sm:$0xff] %v5769_v46  ;;  %v4273_v61 = vmul.f32 -1.442695, %v5756_v27  ;;  %v4278_v59 = vmul.f32 -1.442695, %v5762_v34 }
 0x109   : > { %v5224_v14 = vpop.eup %5223  ;;  %v805_v18 = vadd.f32 1.0, %v5222_v7  ;;  %7836 = vst [vmem:[#allocation25_spill] sm:$0xff] %v5777_v51  ;;  %7837 = vst [vmem:[#allocation26_spill] sm:$0xff] %v5783_v2  ;;  %v5789_v7 = vadd.f32 %v5626_v56, %v655_v37  ;;  %v4276_v1 = vmul.f32 -1.442695, %v5769_v46 }
 0x10a   : > { %v5226_v23 = vpop.eup %5225  ;;  %v896_v24 = vmul.f32 %v5224_v14, %v5632_v0  ;;  %5245 = vrcp.f32 %v818_v8  ;;  %v5795_v14 = vadd.f32 %v5626_v56, %v658_v53  ;;  %v4279_v21 = vmul.f32 -1.442695, %v5777_v51  ;;  %v1605_v53 = vld [vmem:[#allocation2 + $0x9] sm:$0xff] }
 0x10b   : > { %v5228_v30 = vpop.eup %5227  ;;  %v912_v32 = vmul.f32 %v5226_v23, %v5637_v5  ;;  %5247 = vrcp.f32 %v805_v18  ;;  %7838 = vst [vmem:[#allocation27_spill] sm:$0xff] %v5789_v7  ;;  %v4288_v37 = vmul.f32 -1.442695, %v5789_v7 }
 0x10c   : > { %v5230_v41 = vpop.eup %5229  ;;  %934 = vst.msk [vmem:[#allocation2 + $0x28] sm:$0xff] %vm7740_vm1, %v896_v24  ;;  %v894_v44 = vmul.f32 %v5228_v30, %v5640_v6  ;;  %5249 = vpow2.f32 %v4287_v35  ;;  %7839 = vst [vmem:[#allocation28_spill] sm:$0xff] %v5795_v14  ;;  %v4291_v26 = vmul.f32 -1.442695, %v5795_v14 }
 0x10d   : > { %v5232_v47 = vpop.eup %5231  ;;  %950 = vst.msk [vmem:[#allocation2 + $0xa8] sm:$0xff] %vm7740_vm1, %v912_v32  ;;  %v910_v50 = vmul.f32 %v5230_v41, %v5646_v11  ;;  %5251 = vpow2.f32 %v4269_v45  ;;  %v7842_v41 = vmov 0 }
 0x10e   : > { %v5234_v55 = vpop.eup %5233  ;;  %932 = vst.msk [vmem:[#allocation2 + $0x18] sm:$0xff] %vm7740_vm1, %v894_v44  ;;  %v897_v35 = vmul.f32 %v5232_v47, %v5649_v12  ;;  %5253 = vpow2.f32 %v4285_v52  ;;  %v7843_v41 = vsel %vm5814_vm3, 4294967295, %v7842_v41 }
 0x10f   : > { %v5236_v62 = vpop.eup %5235  ;;  %948 = vst.msk [vmem:[#allocation2 + $0x98] sm:$0xff] %vm7740_vm1, %v910_v50  ;;  %v913_v45 = vmul.f32 %v5234_v55, %v5655_v16  ;;  %5255 = vpow2.f32 %v4274_v63 }
 0x110   : > { %v5238_v8 = vpop.eup %5237  ;;  %935 = vst.msk [vmem:[#allocation2 + $0x30] sm:$0xff] %vm7740_vm1, %v897_v35  ;;  %v895_v52 = vmul.f32 %v5236_v62, %v5658_v17  ;;  %5257 = vpow2.f32 %v4272_v13  ;;  %v4290_v13 = vmul.f32 -1.442695, %v5783_v2 }
 0x111   : > { %v5240_v18 = vpop.eup %5239  ;;  %951 = vst.msk [vmem:[#allocation2 + $0xb0] sm:$0xff] %vm7740_vm1, %v913_v45  ;;  %v911_v63 = vmul.f32 %v5238_v8, %v5663_v20  ;;  %5259 = vpow2.f32 %v4275_v60  ;;  %v656_v8 = vmul.f32 %v5621_v54, %v5708_v9  ;;  %v5842_v9 = vadd.s32 120, %v5693_v48 }
 0x112   : > { %v5242_v23 = vpop.eup %5241  ;;  %933 = vst.msk [vmem:[#allocation2 + $0x20] sm:$0xff] %vm7740_vm1, %v895_v52  ;;  %v900_v24 = vmul.f32 %v5240_v18, %v5672_v33  ;;  %5261 = vpow2.f32 %v4273_v61 }
 0x113   : > { %v5244_v30 = vpop.eup %5243  ;;  %949 = vst.msk [vmem:[#allocation2 + $0xa0] sm:$0xff] %vm7740_vm1, %v911_v63  ;;  %v916_v32 = vmul.f32 %v5242_v23, %v5677_v38  ;;  %5263 = vpow2.f32 %v4278_v59 }
 0x114   : > { %v5246_v44 = vpop.eup %5245  ;;  %938 = vst.msk [vmem:[#allocation2 + $0x48] sm:$0xff] %vm7740_vm1, %v900_v24  ;;  %v898_v3 = vmul.f32 %v5244_v30, %v5680_v39  ;;  %5265 = vpow2.f32 %v4276_v1  ;;  %v1577_v1 = vld [vmem:[#allocation2 + $0x28] sm:$0xff]  ;;  %v5838_v24 = vadd.s32 24, %v5693_v48 }
 0x115   : > { %v5248_v47 = vpop.eup %5247  ;;  %954 = vst.msk [vmem:[#allocation2 + $0xc8] sm:$0xff] %vm7740_vm1, %v916_v32  ;;  %v914_v50 = vmul.f32 %v5246_v44, %v5684_v42  ;;  %5267 = vpow2.f32 %v4279_v21  ;;  %v1606_v10 = vld [vmem:[#allocation2 + $0x11] sm:$0xff]  ;;  %v1445_v39 = vld [vmem:[#allocation2 + $0x7] sm:$0xff] }
 0x116   : > { %v5824_v60 = vld [vmem:[#allocation2 + $0x17] sm:$0xff]  ;;  %v5250_v55 = vpop.eup %5249  ;;  %936 = vst.msk [vmem:[#allocation2 + $0x38] sm:$0xff] %vm7740_vm1, %v898_v3  ;;  %v901_v35 = vmul.f32 %v5248_v47, %v5687_v43  ;;  %5269 = vpow2.f32 %v4290_v13  ;;  %v1702_v61 = vsel %vm5805_vm2, %v1606_v10, 0.0  ;;  %v5854_v10 = vadd.f32 %v5626_v56, %v656_v8 }
 0x117   : > { %v5252_v45 = vpop.eup %5251  ;;  %952 = vst.msk [vmem:[#allocation2 + $0xb8] sm:$0xff] %vm7740_vm1, %v914_v50  ;;  %v821_v59 = vadd.f32 1.0, %v5250_v55  ;;  %5271 = vpow2.f32 %v4288_v37  ;;  %v4559_v52 = vpack.i.bf16 %v1702_v61, %v1605_v53  ;;  %v1578_v18 = vld [vmem:[#allocation2 + $0x30] sm:$0xff]  ;;  %v5845_v37 = vadd.s32 152, %v5693_v48  ;;  %v1593_v55 = vld [vmem:[#allocation2 + $0xa8] sm:$0xff] }
 0x118   : > { %v5254_v63 = vpop.eup %5253  ;;  %939 = vst.msk [vmem:[#allocation2 + $0x50] sm:$0xff] %vm7740_vm1, %v901_v35  ;;  %v803_v21 = vadd.f32 1.0, %v5252_v45  ;;  %5273 = vpow2.f32 %v4291_v26  ;;  %v4569_v23 = vpack.i.bf16 %v1578_v18, %v1577_v1  ;;  %v1594_v32 = vld [vmem:[#allocation2 + $0xb0] sm:$0xff]  ;;  %v5849_v26 = vadd.s32 136, %v5693_v48  ;;  %7844 = vst [vmem:[#allocation29_spill] sm:$0xff] %v5854_v10 }
 0x119   : > { %v5256_v13 = vpop.eup %5255  ;;  %5275 = vrcp.f32 %v821_v59  ;;  %v819_v30 = vadd.f32 1.0, %v5254_v63  ;;  %4560 = vrot.lane.b32.xlu1 %v4559_v52, %s5476_s26  ;;  %v644_v53 = vmul.f32 %v5621_v54, %v5740_v57  ;;  %v5856_v45 = vpack.i.bf16 %v1594_v32, %v1593_v55  ;;  %v1576_v57 = vld [vmem:[#allocation2 + $0x20] sm:$0xff] }
 0x11a   : > { %v5258_v44 = vpop.eup %5257  ;;  %5277 = vrcp.f32 %v803_v21  ;;  %v808_v3 = vadd.f32 1.0, %v5256_v13  ;;  %4570 = vrot.lane.b32.xlu0 %v4569_v23, %s5477_s27  ;;  %v661_v59 = vmul.f32 %v5732_v40, %v5621_v54  ;;  %v659_v8 = vmul.f32 %v5621_v54, %v5736_v49 }
 0x11b   : > { %v5260_v47 = vpop.eup %5259  ;;  %5279 = vrcp.f32 %v819_v30  ;;  %v806_v50 = vadd.f32 1.0, %v5258_v44  ;;  %v5870_v40 = vadd.f32 %v5626_v56, %v644_v53  ;;  %v5873_v13 = vadd.s32 32, %v5693_v48  ;;  %v1575_v44 = vld [vmem:[#allocation2 + $0x18] sm:$0xff] }
 0x11c   : > { %v5262_v35 = vpop.eup %5261  ;;  %5281 = vrcp.f32 %v808_v3  ;;  %v809_v61 = vadd.f32 1.0, %v5260_v47  ;;  %v4289_v32 = vmul.f32 -1.442695, %v5854_v10  ;;  %v4594_v47 = vpack.i.bf16 %v1576_v57, %v1575_v44 }
 0x11d   : > { %v5264_v52 = vpop.eup %5263  ;;  %5283 = vrcp.f32 %v806_v50  ;;  %v807_v1 = vadd.f32 1.0, %v5262_v35  ;;  %4565 = vrot.lane.b32.xlu1 %v4569_v23, %s5478_s28  ;;  %7847 = vst [vmem:[#allocation30_spill] sm:$0xff] %v5870_v40  ;;  %v5877_v50 = vadd.f32 %v5626_v56, %v661_v59  ;;  %v1448_v35 = vld [vmem:[#allocation2 + $0x1f] sm:$0xff]  ;;  %v662_v59 = vmul.f32 %v5742_v58, %v5621_v54 }
 0x11e   : > { %v5266_v63 = vpop.eup %5265  ;;  %5285 = vrcp.f32 %v809_v61  ;;  %v812_v21 = vadd.f32 1.0, %v5264_v52  ;;  %4585 = vrot.lane.b32.xlu0 %v5856_v45, %s5477_s27  ;;  %v1735_v61 = vsel %vm5861_vm4, %v5824_v60, 0.0  ;;  %v5884_v52 = vadd.f32 %v5626_v56, %v659_v8 }
 0x11f   : > { %v5268_v30 = vpop.eup %5267  ;;  %5287 = vrcp.f32 %v807_v1  ;;  %v810_v31 = vadd.f32 1.0, %v5266_v63  ;;  %7848 = vst [vmem:[#allocation31_spill] sm:$0xff] %v5877_v50  ;;  %v660_v57 = vmul.f32 %v5621_v54, %v5746_v4  ;;  %v4599_v44 = vpack.i.bf16 %v1448_v35, %v1735_v61 }
 0x120   : > { %v5270_v3 = vpop.eup %5269  ;;  %5289 = vrcp.f32 %v812_v21  ;;  %v813_v49 = vadd.f32 1.0, %v5268_v30  ;;  %7849 = vst [vmem:[#allocation32_spill] sm:$0xff] %v5884_v52  ;;  %v4277_v30 = vmul.f32 -1.442695, %v5870_v40  ;;  %v4292_v54 = vmul.f32 -1.442695, %v5884_v52 }
 0x121   : > { %v5272_v55 = vpop.eup %5271  ;;  %5291 = vrcp.f32 %v810_v31  ;;  %v824_v53 = vadd.f32 1.0, %v5270_v3  ;;  %4575 = vrot.lane.b32.xlu1 %v4569_v23, %s5475_s21  ;;  %v4294_v3 = vmul.f32 -1.442695, %v5877_v50  ;;  %v985_v58 = vadd.s32 160, %v5693_v48 }
 0x122   : > { %v5274_v1 = vpop.eup %5273  ;;  %5293 = vrcp.f32 %v813_v49  ;;  %v822_v63 = vadd.f32 1.0, %v5272_v55  ;;  %4595 = vrot.lane.b32.xlu0 %v4594_v47, %s5475_s21  ;;  %v5903_v35 = vadd.f32 %v5626_v56, %v662_v59  ;;  %v5906_v61 = vadd.f32 %v5626_v56, %v660_v57 }
 0x123   : > { %v5276_v23 = vpop.eup %5275  ;;  %5295 = vrcp.f32 %v824_v53  ;;  %v825_v21 = vadd.f32 1.0, %v5274_v1  ;;  %v1029_v59 = vand.u32 15, %v5873_v13  ;;  %v1141_v57 = vand.u32 15, %v985_v58  ;;  %v1591_v13 = vld [vmem:[#allocation2 + $0x98] sm:$0xff]  ;;  %v1454_v58 = vld [vmem:[#allocation2 + $0x4f] sm:$0xff] }
 0x124   : > { %v5278_v31 = vpop.eup %5277  ;;  %v917_v8 = vmul.f32 %v5276_v23, %v5714_v15  ;;  %5297 = vrcp.f32 %v822_v63  ;;  %7850 = vst [vmem:[#allocation33_spill] sm:$0xff] %v5903_v35  ;;  %7851 = vst [vmem:[#allocation34_spill] sm:$0xff] %v5906_v61  ;;  %v1022_v23 = vand.u32 15, %v5838_v24  ;;  %v5919_v24 = vadd.s32 144, %v5693_v48 }
 0x125   : > { %v5280_v49 = vpop.eup %5279  ;;  %v899_v55 = vmul.f32 %v5278_v31, %v5718_v22  ;;  %5299 = vrcp.f32 %v825_v21  ;;  %4580 = vrot.lane.b32.xlu1 %v5856_v45, %s5478_s28  ;;  %v1592_v31 = vld [vmem:[#allocation2 + $0xa0] sm:$0xff]  ;;  %vm5937_vm6 = vcmp.ne.s32.totalorder %v1029_v59, 0  ;;  %vm5953_vm7 = vcmp.ne.s32.totalorder %v1141_v57, 0 }
 0x126   : > { %v5282_v4 = vpop.eup %5281  ;;  %955 = vst.msk [vmem:[#allocation2 + $0xd0] sm:$0xff] %vm7740_vm1, %v917_v8  ;;  %v915_v53 = vmul.f32 %v5280_v49, %v5721_v25  ;;  %5301 = vpow2.f32 %v4289_v32  ;;  %4600 = vrot.lane.b32.xlu0 %v4599_v44, %s5479_s29  ;;  %v4295_v49 = vmul.f32 -1.442695, %v5903_v35  ;;  %vm5928_vm5 = vcmp.ne.s32.totalorder %v1022_v23, 15 }
 0x127   : > { %v5284_v1 = vpop.eup %5283  ;;  %937 = vst.msk [vmem:[#allocation2 + $0x40] sm:$0xff] %vm7740_vm1, %v899_v55  ;;  %v904_v63 = vmul.f32 %v5282_v4, %v5725_v29  ;;  %5303 = vpow2.f32 %v4277_v30  ;;  %v4293_v55 = vmul.f32 -1.442695, %v5906_v61  ;;  %v1127_v62 = vand.u32 15, %v5919_v24 }
 0x128   : > { %v5286_v21 = vpop.eup %5285  ;;  %953 = vst.msk [vmem:[#allocation2 + $0xc0] sm:$0xff] %vm7740_vm1, %v915_v53  ;;  %v902_v32 = vmul.f32 %v5284_v1, %v5730_v36  ;;  %5305 = vpow2.f32 %v4294_v3  ;;  %v1608_v3 = vld [vmem:[#allocation2 + $0x21] sm:$0xff]  ;;  %v1106_v53 = vand.u32 15, %v5842_v9  ;;  %v1607_v9 = vld [vmem:[#allocation2 + $0x19] sm:$0xff]  ;;  %v7858_v24 = vmov 0 }
 0x129   : > { %v5288_v8 = vpop.eup %5287  ;;  %942 = vst.msk [vmem:[#allocation2 + $0x68] sm:$0xff] %vm7740_vm1, %v904_v63  ;;  %v905_v56 = vmul.f32 %v5286_v21, %v5751_v19  ;;  %4590 = vrot.lane.b32.xlu1 %v5856_v45, %s5475_s21  ;;  %5307 = vpow2.f32 %v4292_v54  ;;  %v4609_v54 = vpack.i.bf16 %v1592_v31, %v1591_v13  ;;  %v5935_v63 = vld [vmem:[#allocation2 + $0x27] sm:$0xff]  ;;  %v7854_v21 = vmov 0 }
 0x12a   : > { %v5290_v30 = vpop.eup %5289  ;;  %940 = vst.msk [vmem:[#allocation2 + $0x58] sm:$0xff] %vm7740_vm1, %v902_v32  ;;  %v903_v44 = vmul.f32 %v5288_v8, %v5756_v27  ;;  %4605 = vrot.lane.b32.xlu0 %v4594_v47, %s5478_s28  ;;  %5309 = vpow2.f32 %v4295_v49  ;;  %v7855_v21 = vsel %vm5937_vm6, 4294967295, %v7854_v21  ;;  %v1772_v31 = vsel %vm5805_vm2, %v1608_v3, 0.0 }
 0x12b   : > { %v5292_v4 = vpop.eup %5291  ;;  %943 = vst.msk [vmem:[#allocation2 + $0x70] sm:$0xff] %vm7740_vm1, %v905_v56  ;;  %v908_v45 = vmul.f32 %v5290_v30, %v5762_v34  ;;  %5311 = vpow2.f32 %v4293_v55  ;;  %v971_v8 = vadd.s32 48, %v5693_v48  ;;  %v1134_v30 = vand.u32 15, %v5845_v37 }
 0x12c   : > { %v5294_v1 = vpop.eup %5293  ;;  %941 = vst.msk [vmem:[#allocation2 + $0x60] sm:$0xff] %vm7740_vm1, %v903_v44  ;;  %v906_v47 = vmul.f32 %v5292_v4, %v5769_v46  ;;  %v5951_v44 = vld [vmem:[#allocation2 + $0xa7] sm:$0xff]  ;;  %v7856_v13 = vmov 0  ;;  %v987_v49 = vadd.s32 176, %v5693_v48  ;;  %vm5979_vm8 = vcmp.ne.s32.totalorder %v1106_v53, 15 }
 0x12d   : > { %v5296_v32 = vpop.eup %5295  ;;  %946 = vst.msk [vmem:[#allocation2 + $0x88] sm:$0xff] %vm7740_vm1, %v908_v45  ;;  %v909_v23 = vmul.f32 %v5294_v1, %v5777_v51  ;;  %4610 = vrot.lane.b32.xlu1 %v4609_v54, %s5477_s27  ;;  %v7857_v13 = vsel %vm5953_vm7, 4294967295, %v7856_v13  ;;  %v1120_v45 = vand.u32 15, %v5849_v26  ;;  %v1805_v26 = vsel %vm5861_vm4, %v5935_v63, 0.0 }
 0x12e   : > { %v5298_v56 = vpop.eup %5297  ;;  %944 = vst.msk [vmem:[#allocation2 + $0x78] sm:$0xff] %vm7740_vm1, %v906_v47  ;;  %v920_v59 = vmul.f32 %v5296_v32, %v5783_v2  ;;  %4620 = vrot.lane.b32.xlu0 %v4609_v54, %s5478_s28  ;;  %v4634_v47 = vpack.i.bf16 %v1772_v31, %v1607_v9  ;;  %v1704_v32 = vsel %vm5928_vm5, %v1608_v3, 0.0  ;;  %v1043_v31 = vand.u32 15, %v971_v8  ;;  %v1624_v3 = vld [vmem:[#allocation2 + $0xa1] sm:$0xff]  ;;  %v1611_v46 = vld [vmem:[#allocation2 + $0x39] sm:$0xff] }
 0x12f   : > { %v5300_v55 = vpop.eup %5299  ;;  %947 = vst.msk [vmem:[#allocation2 + $0x90] sm:$0xff] %vm7740_vm1, %v909_v23  ;;  %v918_v4 = vmul.f32 %v5298_v56, %v5789_v7  ;;  %v7859_v24 = vsel %vm5979_vm8, 4294967295, %v7858_v24  ;;  %vm5984_vm9 = vcmp.ne.s32.totalorder %v1134_v30, 15  ;;  %v1737_v53 = vsel %vm5814_vm3, %v5935_v63, 0.0  ;;  %v5998_v30 = vld [vmem:[#allocation2 + $0x37] sm:$0xff]  ;;  %v6053_v5 = vld [vmem:[#allocation2 + $0x47] sm:$0xff] }
 0x130   : > { %v5302_v37 = vpop.eup %5301  ;;  %958 = vst.msk [vmem:[#allocation2 + $0xe8] sm:$0xff] %vm7740_vm1, %v920_v59  ;;  %v921_v57 = vmul.f32 %v5300_v55, %v5795_v14  ;;  %v4624_v14 = vpack.i.bf16 %v1704_v32, %v1607_v9  ;;  %v1450_v59 = vld [vmem:[#allocation2 + $0x2f] sm:$0xff]  ;;  %vm5994_vm10 = vcmp.ne.s32.totalorder %v1120_v45, 15  ;;  %v7862_v9 = vmov 0  ;;  %7864 = vst [vmem:[#allocation35_spill] sm:$0xff] %v5998_v30 }
 0x131   : > { %v5304_v23 = vpop.eup %5303  ;;  %956 = vst.msk [vmem:[#allocation2 + $0xd8] sm:$0xff] %vm7740_vm1, %v918_v4  ;;  %v823_v56 = vadd.f32 1.0, %v5302_v37  ;;  %4615 = vrot.lane.b32.xlu1 %v4609_v54, %s5475_s21  ;;  %v981_v4 = vadd.s32 128, %v5693_v48  ;;  %v1155_v37 = vand.u32 15, %v987_v49  ;;  %v4639_v2 = vpack.i.bf16 %v1450_v59, %v1805_v26  ;;  %7877 = vst [vmem:[#allocation40_spill] sm:$0xff] %v6053_v5 }
 0x132   : > { %v5306_v55 = vpop.eup %5305  ;;  %959 = vst.msk [vmem:[#allocation2 + $0xf0] sm:$0xff] %vm7740_vm1, %v921_v57  ;;  %4635 = vrot.lane.b32.xlu0 %v4634_v47, %s5480_s30  ;;  %v811_v54 = vadd.f32 1.0, %v5304_v23  ;;  %v1623_v23 = vld [vmem:[#allocation2 + $0x99] sm:$0xff]  ;;  %v1856_v49 = vsel %vm5979_vm8, %v1624_v3, 0.0  ;;  %v7863_v9 = vsel %vm5994_vm10, 4294967295, %v7862_v9  ;;  %vm6000_vm11 = vcmp.ne.s32.totalorder %v1043_v31, 0 }
 0x133   : > { %v5308_v1 = vpop.eup %5307  ;;  %5313 = vrcp.f32 %v823_v56  ;;  %v828_v57 = vadd.f32 1.0, %v5306_v55  ;;  %v7865_v32 = vmov 0  ;;  %vm6005_vm12 = vcmp.ne.s32.totalorder %v1127_v62, 0  ;;  %v1616_v33 = vld [vmem:[#allocation2 + $0x61] sm:$0xff] }
 0x134   : > { %5315 = vrcp.f32 %v811_v54  ;;  %v826_v47 = vadd.f32 1.0, %v5308_v1  ;;  %v7866_v32 = vsel %vm6000_vm11, 4294967295, %v7865_v32  ;;  %v5310_v56 = vpop.eup %5309  ;;  %v1113_v45 = vand.u32 15, %v981_v4  ;;  %v6021_v4 = vld [vmem:[#allocation2 + $0xb7] sm:$0xff] }
 0x135   : > { %4625 = vrot.lane.b32.xlu1 %v4624_v14, %s5476_s26  ;;  %5317 = vrcp.f32 %v828_v57  ;;  %7867 = vst [vmem:[#allocation36_spill] sm:$0xff] %v7866_v32  ;;  %v7868_v14 = vmov 0  ;;  %vm6011_vm13 = vcmp.ne.s32.totalorder %v1155_v37, 0  ;;  %v7871_v26 = vmov 0  ;;  %v5312_v31 = vpop.eup %5311  ;;  %7873 = vst [vmem:[#allocation38_spill] sm:$0xff] %v6021_v4  ;;  %v1466_v37 = vld [vmem:[#allocation2 + $0xaf] sm:$0xff] }
 0x136   : > { %4640 = vrot.lane.b32.xlu0 %v4639_v2, %s5481_s11  ;;  %v7869_v14 = vsel %vm6005_vm12, 4294967295, %v7868_v14  ;;  %v6009_v1 = vld [vmem:[#allocation2 + $0x97] sm:$0xff]  ;;  %5319 = vrcp.f32 %v826_v47  ;;  %v7872_v26 = vsel %vm6011_vm13, 4294967295, %v7871_v26  ;;  %v4629_v55 = vpack.i.bf16 %v1450_v59, %v1737_v53 }
 0x137   : > { %7870 = vst [vmem:[#allocation37_spill] sm:$0xff] %v7869_v14  ;;  %v829_v57 = vadd.f32 1.0, %v5310_v56  ;;  %v973_v2 = vadd.s32 64, %v5693_v48  ;;  %v4644_v62 = vpack.i.bf16 %v1856_v49, %v1623_v23  ;;  %v1720_v7 = vsel %vm5984_vm9, %v1624_v3, 0.0 }
 0x138   : > { %v827_v15 = vadd.f32 1.0, %v5312_v31  ;;  %v1788_v59 = vsel %vm5994_vm10, %v1624_v3, 0.0  ;;  %vm6030_vm14 = vcmp.ne.s32.totalorder %v1113_v45, 0  ;;  %v7874_v53 = vmov 0 }
 0x139   : > { %4630 = vrot.lane.b32.xlu1 %v4629_v55, %s5479_s29  ;;  %5321 = vrcp.f32 %v829_v57  ;;  %v7875_v53 = vsel %vm6030_vm14, 4294967295, %v7874_v53  ;;  %v970_v47 = vadd.s32 40, %v5693_v48  ;;  %v4649_v49 = vpack.i.bf16 %v1720_v7, %v1623_v23  ;;  %v1610_v7 = vld [vmem:[#allocation2 + $0x31] sm:$0xff] }
 0x13a   : > { %4645 = vrot.lane.b32.xlu0 %v4644_v62, %s5482_s12  ;;  %7876 = vst [vmem:[#allocation39_spill] sm:$0xff] %v7875_v53  ;;  %5323 = vrcp.f32 %v827_v15  ;;  %v989_v31 = vadd.s32 192, %v5693_v48  ;;  %v4659_v55 = vpack.i.bf16 %v1788_v59, %v1623_v23  ;;  %v1753_v3 = vsel %vm6005_vm12, %v5951_v44, 0.0 }
 0x13b   : > { %v1057_v57 = vand.u32 15, %v973_v2  ;;  %v1821_v15 = vsel %vm6030_vm14, %v5951_v44, 0.0  ;;  %v1036_v23 = vand.u32 15, %v970_v47  ;;  %v4654_v38 = vpack.i.bf16 %v1466_v37, %v1753_v3 }
 0x13c   : > { %v1169_v2 = vand.u32 15, %v989_v31  ;;  %v1774_v42 = vsel %vm5928_vm5, %v1610_v7, 0.0  ;;  %v1842_v47 = vsel %vm5805_vm2, %v1610_v7, 0.0  ;;  %v1823_v11 = vsel %vm6005_vm12, %v6021_v4, 0.0 }
 0x13d   : > { %v5314_v45 = vpop.eup %5313  ;;  %4650 = vrot.lane.b32.xlu1 %v4649_v49, %s5476_s26  ;;  %v4664_v49 = vpack.i.bf16 %v1466_v37, %v1821_v15  ;;  %vm6055_vm15 = vcmp.ne.s32.totalorder %v1057_v57, 0  ;;  %v1609_v37 = vld [vmem:[#allocation2 + $0x29] sm:$0xff]  ;;  %vm6066_vm0 = vcmp.ne.s32.totalorder %v1036_v23, 15  ;;  %v972_v51 = vadd.s32 56, %v5693_v48 }
 0x13e   : > { %v5316_v62 = vpop.eup %5315  ;;  %v919_v54 = vmul.f32 %v5314_v45, %v5854_v10  ;;  %4660 = vrot.lane.b32.xlu0 %v4659_v55, %s5480_s30  ;;  %v7878_v55 = vmov 0  ;;  %v4669_v57 = vpack.i.bf16 %v1774_v42, %v1609_v37  ;;  %vm6076_vm2 = vcmp.ne.s32.totalorder %v1169_v2, 0  ;;  %v1581_v45 = vld [vmem:[#allocation2 + $0x48] sm:$0xff]  ;;  %v1582_v15 = vld [vmem:[#allocation2 + $0x50] sm:$0xff]  ;;  %v1452_v2 = vld [vmem:[#allocation2 + $0x3f] sm:$0xff] }
 0x13f   : > { %v5318_v59 = vpop.eup %5317  ;;  %v907_v56 = vmul.f32 %v5316_v62, %v5870_v40  ;;  %v7879_v55 = vsel %vm6055_vm15, 4294967295, %v7878_v55  ;;  %v1706_v42 = vsel %vm6066_vm0, %v1610_v7, 0.0  ;;  %vm7905_vm12 = vcmask 1041408  }
 0x140   : > { %v5320_v25 = vpop.eup %5319  ;;  %957 = vst.msk [vmem:[#allocation2 + $0xe0] sm:$0xff] %vm7740_vm1, %v919_v54  ;;  %v924_v16 = vmul.f32 %v5318_v59, %v5877_v50  ;;  %7880 = vst [vmem:[#allocation41_spill] sm:$0xff] %v7879_v55  ;;  %v986_v59 = vadd.s32 168, %v5693_v48  ;;  %v1050_v19 = vand.u32 15, %v972_v51  ;;  %v974_v8 = vadd.s32 72, %v5693_v48 }
 0x141   : > { %945 = vst.msk [vmem:[#allocation2 + $0x80] sm:$0xff] %vm7740_vm1, %v907_v56  ;;  %4655 = vrot.lane.b32.xlu1 %v4654_v38, %s5479_s29  ;;  %v922_v54 = vmul.f32 %v5320_v25, %v5884_v52  ;;  %v6071_v56 = vld [vmem:[#allocation2 + $0xc7] sm:$0xff]  ;;  %v990_v31 = vadd.s32 200, %v5693_v48 }
 0x142   : > { %4665 = vrot.lane.b32.xlu0 %v4664_v49, %s5481_s11  ;;  %962 = vst.msk [vmem:[#allocation2 + $0x108] sm:$0xff] %vm7740_vm1, %v924_v16  ;;  %v4674_v16 = vpack.i.bf16 %v1842_v47, %v1609_v37  ;;  %v4684_v49 = vpack.i.bf16 %v1582_v15, %v1581_v45  ;;  %v4679_v47 = vpack.i.bf16 %v1706_v42, %v1609_v37  ;;  %v1148_v7 = vand.u32 15, %v986_v59  ;;  %v1597_v15 = vld [vmem:[#allocation2 + $0xc8] sm:$0xff] }
 0x143   : > { %v5322_v3 = vpop.eup %5321  ;;  %960 = vst.msk [vmem:[#allocation2 + $0xf8] sm:$0xff] %vm7740_vm1, %v922_v54  ;;  %v1626_v54 = vld [vmem:[#allocation2 + $0xb1] sm:$0xff]  ;;  %v975_v59 = vadd.s32 80, %v5693_v48 }
 0x144   : > { %v5324_v28 = vpop.eup %5323  ;;  %v925_v62 = vmul.f32 %v5322_v3, %v5903_v35  ;;  %v1790_v3 = vsel %vm5984_vm9, %v1626_v54, 0.0  ;;  %vm6100_vm8 = vcmp.ne.s32.totalorder %v1148_v7, 15  ;;  %v6111_v7 = vld [vmem:[#allocation2 + $0x67] sm:$0xff]  ;;  %v979_v35 = vadd.s32 112, %v5693_v48 }
 0x145   : > { %4670 = vrot.lane.b32.xlu1 %v4669_v57, %s5480_s30  ;;  %v923_v23 = vmul.f32 %v5324_v28, %v5906_v61  ;;  %v1858_v57 = vsel %vm5994_vm10, %v1626_v54, 0.0  ;;  %v1625_v28 = vld [vmem:[#allocation2 + $0xa9] sm:$0xff]  ;;  %v1722_v42 = vsel %vm6100_vm8, %v1626_v54, 0.0  ;;  %7887 = vst [vmem:[#allocation42_spill] sm:$0xff] %v6111_v7  ;;  %v1071_v54 = vand.u32 15, %v975_v59  ;;  %v1580_v61 = vld [vmem:[#allocation2 + $0x40] sm:$0xff] }
 0x146   : > { %4675 = vrot.lane.b32.xlu0 %v4674_v16, %s5482_s12  ;;  %963 = vst.msk [vmem:[#allocation2 + $0x110] sm:$0xff] %vm7740_vm1, %v925_v62  ;;  %v4699_v37 = vpack.i.bf16 %v1790_v3, %v1625_v28  ;;  %v4704_v45 = vpack.i.bf16 %v1858_v57, %v1625_v28  ;;  %v1598_v62 = vld [vmem:[#allocation2 + $0xd0] sm:$0xff]  ;;  %v4709_v57 = vpack.i.bf16 %v1722_v42, %v1625_v28  ;;  %v1601_v28 = vld [vmem:[#allocation2 + $0xe8] sm:$0xff]  ;;  %v1739_v42 = vsel %vm5937_vm6, %v5998_v30, 0.0 }
 0x147   : > { %961 = vst.msk [vmem:[#allocation2 + $0x100] sm:$0xff] %vm7740_vm1, %v923_v23  ;;  %v977_v23 = vadd.s32 96, %v5693_v48  ;;  %vm6130_vm10 = vcmp.ne.s32.totalorder %v1071_v54, 0  ;;  %v7893_v59 = vmov 0  ;;  %v993_v54 = vadd.s32 224, %v5693_v48  ;;  %v1472_v27 = vld [vmem:[#allocation2 + $0xdf] sm:$0xff] }
 0x148   : > { %v4744_v50 = vpack.i.bf16 %v1452_v2, %v1739_v42  ;;  %v1099_v42 = vand.u32 15, %v979_v35  ;;  %v6167_v10 = vld [vmem:[#allocation2 + $0x87] sm:$0xff]  ;;  %v7899_v35 = vmov 0 }
 0x149   : > { %4685 = vrot.lane.b32.xlu1 %v4684_v49, %s5478_s28  ;;  %v1085_v3 = vand.u32 15, %v977_v23  ;;  %v7890_v23 = vmov 0  ;;  %v1197_v52 = vand.u32 15, %v993_v54  ;;  %v6165_v54 = vld [vmem:[#allocation2 + $0x77] sm:$0xff]  ;;  %v1600_v36 = vld [vmem:[#allocation2 + $0xe0] sm:$0xff] }
 0x14a   : > { %4680 = vrot.lane.b32.xlu0 %v4679_v47, %s5476_s26  ;;  %v4714_v47 = vpack.i.bf16 %v1598_v62, %v1597_v15  ;;  %v1807_v15 = vsel %vm5814_vm3, %v5998_v30, 0.0  ;;  %v1602_v62 = vld [vmem:[#allocation2 + $0xf0] sm:$0xff]  ;;  %v7891_v23 = vsel %vm6130_vm10, 4294967295, %v7890_v23  ;;  %7897 = vst [vmem:[#allocation46_spill] sm:$0xff] %v6165_v54  ;;  %vm6182_vm10 = vcmp.ne.s32.totalorder %v1099_v42, 0 }
 0x14b   : > { %vm6114_vm1 = vcmp.ne.s32.totalorder %v1085_v3, 0  ;;  %7892 = vst [vmem:[#allocation43_spill] sm:$0xff] %v7891_v23  ;;  %v6138_v3 = vld [vmem:[#allocation2 + $0x57] sm:$0xff]  ;;  %vm6174_vm3 = vcmp.ne.s32.totalorder %v1197_v52, 0 }
 0x14c   : > { %7895 = vst [vmem:[#allocation44_spill] sm:$0xff] %v6138_v3  ;;  %v7900_v35 = vsel %vm6174_vm3, 4294967295, %v7899_v35  ;;  %v5196_v52 = vld [vmem:[%s7721_s4 + $0x10] ss:$0 sps:$4 sm:$0x33]  }
 0x14d   : > { %4695 = vrot.lane.b32.xlu1 %v4684_v49, %s5475_s21 }
 0x14e   : > { %4690 = vrot.lane.b32.xlu0 %v4684_v49, %s5477_s27  ;;  %v991_v49 = vadd.s32 208, %v5693_v48  ;;  %v6562_v53 = vld [vmem:[#allocation2 + $0xff] sm:$0xff] }
 0x150   : > { %v1183_v38 = vand.u32 15, %v991_v49  ;;  %v4729_v49 = vpack.i.bf16 %v1452_v2, %v1807_v15  ;;  %v995_v15 = vadd.s32 240, %v5693_v48 }
 0x151   : > { %4700 = vrot.lane.b32.xlu1 %v4699_v37, %s5480_s30  ;;  %v7888_v37 = vmov 0 }
 0x152   : > { %4705 = vrot.lane.b32.xlu0 %v4704_v45, %s5482_s12  ;;  %v7889_v37 = vsel %vm6114_vm1, 4294967295, %v7888_v37  ;;  %vm6134_vm1 = vcmp.ne.s32.totalorder %v1183_v38, 0  ;;  %v5194_v45 = vld [vmem:[%s7721_s4] sm:$0xff]   ;;  %v1579_v38 = vld [vmem:[#allocation2 + $0x38] sm:$0xff] }
 0x153   : > { %v7894_v59 = vsel %vm6134_vm1, 4294967295, %v7893_v59  ;;  %4458 = vmatprep.subr.bf16.mxu1 %v5194_v45  ;;  %v4734_v2 = vpack.i.bf16 %v1580_v61, %v1579_v38  ;;  %v6170_v61 = vld [vmem:[#allocation2 + $0xe7] sm:$0xff]  ;;  %v6172_v38 = vld [vmem:[#allocation2 + $0xf7] sm:$0xff] }
 0x154   : > { %4459 = vmatpush3.bf16.msra.mxu1 %v5194_v45  ;;  %v1755_v45 = vsel %vm5953_vm7, %v6021_v4, 0.0  ;;  %7898 = vst [vmem:[#allocation47_spill] sm:$0xff] %v6170_v61  ;;  %v1631_v4 = vld [vmem:[#allocation2 + $0xd9] sm:$0xff] }
 0x155   : > { %4715 = vrot.lane.b32.xlu1 %v4714_v47, %s5478_s28 }
 0x156   : > { %4710 = vrot.lane.b32.xlu0 %v4709_v57, %s5476_s26  ;;  %v6140_v57 = vld [vmem:[#allocation2 + $0xd7] sm:$0xff] }
 0x157   : > { %7896 = vst [vmem:[#allocation45_spill] sm:$0xff] %v6140_v57 }
 0x159   : > { %4725 = vrot.lane.b32.xlu1 %v4714_v47, %s5475_s21 }
 0x15a   : > { %4720 = vrot.lane.b32.xlu0 %v4714_v47, %s5477_s27  ;;  %v6146_v47 = vpack.i.bf16 %v1602_v62, %v1601_v28  ;;  %v5195_v62 = vld [vmem:[%s7721_s4 + $0x8] sm:$0xff]   ;;  %v7903_v28 = vmov 0 }
 0x15b   : > { %4460 = vmatprep.subr.bf16.mxu1 %v5195_v62  ;;  %v7904_v28 = vsel %vm6182_vm10, 4294967295, %v7903_v28  ;;  %vm7906_vm10 = vmmov %vm7905_vm12 }
 0x15c   : > { %4461 = vmatpush3.bf16.msra.mxu1 %v5195_v62  ;;  %v1612_v62 = vld [vmem:[#allocation2 + $0x41] sm:$0xff]  ;;  %v3186_v42 = vsel %vm7906_vm10, %v5196_v52, 0  ;;  %vm7926_vm10 = vnez %v7891_v23 }
 0x15d   : > { %4730 = vrot.lane.b32.xlu1 %v4729_v49, %s5481_s11  ;;  %v1211_v49 = vand.u32 15, %v995_v15  ;;  %v7901_v15 = vmov 0  ;;  %4534 = vmatprep.subr.msk.bf16.mxu1 %vm7905_vm12, %v5196_v52  ;;  %v1844_v14 = vsel %vm5928_vm5, %v1612_v62, 0.0  ;;  %vm6216_vm12 = vcmp.ne.s32.totalorder %v1050_v19, 15  ;;  %v1628_v19 = vld [vmem:[#allocation2 + $0xc1] sm:$0xff] }
 0x15e   : > { %4745 = vrot.lane.b32.xlu0 %v4744_v50, %s5479_s29  ;;  %v1468_v50 = vld [vmem:[#allocation2 + $0xbf] sm:$0xff]  ;;  %v4779_v34 = vpack.i.bf16 %v1844_v14, %v1611_v46  ;;  %v1708_v51 = vsel %vm6216_vm12, %v1612_v62, 0.0  ;;  %v1809_v14 = vsel %vm5937_vm6, %v6053_v5, 0.0  ;;  %vm7808_vm6 = vcmask 261120  }
 0x15f   : > { %vm6178_vm1 = vcmp.ne.s32.totalorder %v1211_v49, 0  ;;  %v4769_v20 = vpack.i.bf16 %v1468_v50, %v1755_v45  ;;  %v1595_v49 = vld [vmem:[#allocation2 + $0xb8] sm:$0xff]  ;;  %v1596_v45 = vld [vmem:[#allocation2 + $0xc0] sm:$0xff] }
 0x160   : > { %v7902_v15 = vsel %vm6178_vm1, 4294967295, %v7901_v15  ;;  %4463 = vmatpush3.bf16.msra.mxu1 %v3186_v42  ;;  %v4774_v40 = vpack.i.bf16 %v1596_v45, %v1595_v49  ;;  %v4784_v49 = vpack.i.bf16 %v1708_v51, %v1611_v46  ;;  %v4799_v45 = vpack.i.bf16 %v1454_v58, %v1809_v14 }
 0x161   : > { %4735 = vrot.lane.b32.xlu1 %v4734_v2, %s5477_s27 }
 0x162   : > { %4750 = vrot.lane.b32.xlu0 %v4734_v2, %s5478_s28 }
 0x165   : > { %4740 = vrot.lane.b32.xlu1 %v4734_v2, %s5475_s21  ;;  %v4754_v2 = vpack.i.bf16 %v1468_v50, %v1823_v11  ;;  %v988_v11 = vadd.s32 184, %v5693_v48 }
 0x166   : > { %4770 = vrot.lane.b32.xlu0 %v4769_v20, %s5479_s29  ;;  %v1776_v20 = vsel %vm6066_vm0, %v1612_v62, 0.0  ;;  %v1627_v62 = vld [vmem:[#allocation2 + $0xb9] sm:$0xff] }
 0x167   : > { %v4794_v50 = vpack.i.bf16 %v1776_v20, %v1611_v46  ;;  %v1162_v42 = vand.u32 15, %v988_v11 }
 0x169   : > { %4755 = vrot.lane.b32.xlu1 %v4754_v2, %s5481_s11  ;;  %vm6235_vm5 = vcmp.ne.s32.totalorder %v1162_v42, 15  ;;  %v1470_v42 = vld [vmem:[#allocation2 + $0xcf] sm:$0xff] }
 0x16a   : > { %4775 = vrot.lane.b32.xlu0 %v4774_v40, %s5478_s28  ;;  %v1724_v46 = vsel %vm6235_vm5, %v1628_v19, 0.0 }
 0x16b   : > { %v4809_v51 = vpack.i.bf16 %v1724_v46, %v1627_v62 }
 0x16d   : > { %4760 = vrot.lane.b32.xlu1 %v4774_v40, %s5477_s27 }
 0x16e   : > { %4780 = vrot.lane.b32.xlu0 %v4779_v34, %s5482_s12  ;;  %v1741_v34 = vsel %vm6000_vm11, %v6053_v5, 0.0  ;;  %v1456_v5 = vld [vmem:[#allocation2 + $0x5f] sm:$0xff] }
 0x16f   : > { %v4789_v20 = vpack.i.bf16 %v1454_v58, %v1741_v34  ;;  %v1757_v58 = vsel %vm6011_vm13, %v6071_v56, 0.0 }
 0x170   : > { %v4814_v34 = vpack.i.bf16 %v1470_v42, %v1757_v58  ;;  %v6269_v58 = vpop.permute.xlu0 %4555 }
 0x171   : > { %4765 = vrot.lane.b32.xlu1 %v4774_v40, %s5475_s21  ;;  %v1860_v40 = vsel %vm5984_vm9, %v1628_v19, 0.0 }
 0x172   : > { %4795 = vrot.lane.b32.xlu0 %v4794_v50, %s5480_s30  ;;  %v4804_v11 = vpack.i.bf16 %v1860_v40, %v1627_v62  ;;  %v1792_v50 = vsel %vm6100_vm8, %v1628_v19, 0.0  ;;  %v1064_v19 = vand.u32 15, %v974_v8  ;;  %v1585_v8 = vld [vmem:[#allocation2 + $0x68] sm:$0xff] }
 0x173   : > { %v4819_v14 = vpack.i.bf16 %v1792_v50, %v1627_v62 }
 0x174   : > { %vm6261_vm9 = vcmp.ne.s32.totalorder %v1064_v19, 15 }
 0x175   : > { %4785 = vrot.lane.b32.xlu1 %v4784_v49, %s5476_s26  ;;  %v1825_v49 = vsel %vm5953_vm7, %v6071_v56, 0.0  ;;  %vm7940_vm7 = vcmask 195584  }
 0x176   : > { %4800 = vrot.lane.b32.xlu0 %v4799_v45, %s5481_s11  ;;  %v1614_v45 = vld [vmem:[#allocation2 + $0x51] sm:$0xff]  ;;  %v4824_v40 = vpack.i.bf16 %v1470_v42, %v1825_v49  ;;  %vm7941_vm3 = vmmov %vm7940_vm7 }
 0x177   : > { %v1778_v62 = vsel %vm6216_vm12, %v1614_v45, 0.0  ;;  %v1710_v42 = vsel %vm6261_vm9, %v1614_v45, 0.0 }
 0x179   : > { %4790 = vrot.lane.b32.xlu1 %v4789_v20, %s5479_s29  ;;  %v1613_v20 = vld [vmem:[#allocation2 + $0x49] sm:$0xff] }
 0x17a   : > { %4805 = vrot.lane.b32.xlu0 %v4804_v11, %s5482_s12  ;;  %v1846_v11 = vsel %vm6066_vm0, %v1614_v45, 0.0  ;;  %v4829_v50 = vpack.i.bf16 %v1778_v62, %v1613_v20  ;;  %v4839_v19 = vpack.i.bf16 %v1710_v42, %v1613_v20 }
 0x17d   : > { %4810 = vrot.lane.b32.xlu1 %v4809_v51, %s5476_s26  ;;  %v4834_v51 = vpack.i.bf16 %v1846_v11, %v1613_v20 }
 0x17e   : > { %4820 = vrot.lane.b32.xlu0 %v4819_v14, %s5480_s30  ;;  %v1586_v14 = vld [vmem:[#allocation2 + $0x70] sm:$0xff] }
 0x17f   : > { %v4844_v49 = vpack.i.bf16 %v1586_v14, %v1585_v8 }
 0x181   : > { %4815 = vrot.lane.b32.xlu1 %v4814_v34, %s5479_s29  ;;  %v1630_v34 = vld [vmem:[#allocation2 + $0xd1] sm:$0xff] }
 0x182   : > { %4825 = vrot.lane.b32.xlu0 %v4824_v40, %s5481_s11  ;;  %v1176_v40 = vand.u32 15, %v990_v31  ;;  %v1794_v45 = vsel %vm6235_vm5, %v1630_v34, 0.0 }
 0x184   : > { %vm6284_vm0 = vcmp.ne.s32.totalorder %v1176_v40, 15 }
 0x185   : > { %4830 = vrot.lane.b32.xlu1 %v4829_v50, %s5480_s30  ;;  %v1629_v50 = vld [vmem:[#allocation2 + $0xc9] sm:$0xff] }
 0x186   : > { %4835 = vrot.lane.b32.xlu0 %v4834_v51, %s5482_s12  ;;  %v1862_v51 = vsel %vm6100_vm8, %v1630_v34, 0.0  ;;  %v4859_v14 = vpack.i.bf16 %v1794_v45, %v1629_v50  ;;  %v1811_v45 = vsel %vm6000_vm11, %v6138_v3, 0.0 }
 0x187   : > { %v4864_v31 = vpack.i.bf16 %v1862_v51, %v1629_v50 }
 0x189   : > { %4845 = vrot.lane.b32.xlu1 %v4844_v49, %s5478_s28 }
 0x18a   : > { %4840 = vrot.lane.b32.xlu0 %v4839_v19, %s5476_s26  ;;  %v1726_v19 = vsel %vm6284_vm0, %v1630_v34, 0.0  ;;  %v4884_v34 = vpack.i.bf16 %v1456_v5, %v1811_v45 }
 0x18b   : > { %v6274_v62 = vpop.permute.xlu1 %4560  ;;  %v4869_v40 = vpack.i.bf16 %v1726_v19, %v1629_v50  ;;  %v1743_v50 = vsel %vm6055_vm15, %v6138_v3, 0.0  ;;  %v1827_v3 = vsel %vm6011_vm13, %v6140_v57, 0.0  ;;  %vm7930_vm13 = vcmask 64512  }
 0x18c   : > { %v6276_v11 = vpop.permute.xlu0 %4570  ;;  %v4563_v18 = vunpack.i.h.bf16 %v6274_v62 }
 0x18d   : > { %4855 = vrot.lane.b32.xlu1 %v4844_v49, %s5475_s21  ;;  %v4572_v2 = vunpack.i.l.bf16 %v6276_v11 }
 0x18e   : > { %4850 = vrot.lane.b32.xlu0 %v4844_v49, %s5477_s27 }
 0x18f   : > { %v6288_v8 = vpop.permute.xlu1 %4565 }
 0x190   : > { %v6290_v42 = vpop.permute.xlu0 %4585 }
 0x191   : > { %7915 = vst [vmem:[#allocation48_spill] sm:$0xff] %v6290_v42  ;;  %4860 = vrot.lane.b32.xlu1 %v4859_v14, %s5480_s30  ;;  %v1584_v42 = vld [vmem:[#allocation2 + $0x60] sm:$0xff] }
 0x192   : > { %4865 = vrot.lane.b32.xlu0 %v4864_v31, %s5482_s12  ;;  %v1583_v31 = vld [vmem:[#allocation2 + $0x58] sm:$0xff] }
 0x193   : > { %v6296_v16 = vpop.permute.xlu1 %4575  ;;  %v4889_v29 = vpack.i.bf16 %v1584_v42, %v1583_v31  ;;  %v1759_v42 = vsel %vm6076_vm2, %v6140_v57, 0.0  ;;  %v4909_v31 = vpack.i.bf16 %v1472_v27, %v1827_v3 }
 0x194   : > { %v6298_v49 = vpop.permute.xlu0 %4595 }
 0x195   : > { %4875 = vrot.lane.b32.xlu1 %v6146_v47, %s5478_s28 }
 0x196   : > { %4870 = vrot.lane.b32.xlu0 %v4869_v40, %s5476_s26 }
 0x197   : > { %v6306_v51 = vpop.permute.xlu1 %4580 }
 0x198   : > { %7916 = vst [vmem:[#allocation49_spill] sm:$0xff] %v6306_v51  ;;  %v6308_v14 = vpop.permute.xlu0 %4600  ;;  %v4899_v51 = vpack.i.bf16 %v1456_v5, %v1743_v50  ;;  %v976_v5 = vadd.s32 88, %v5693_v48 }
 0x199   : > { %4885 = vrot.lane.b32.xlu1 %v4884_v34, %s5481_s11 }
 0x19a   : > { %4880 = vrot.lane.b32.xlu0 %v6146_v47, %s5477_s27  ;;  %v1078_v43 = vand.u32 15, %v976_v5  ;;  %v4557_v5 = vunpack.i.l.bf16 %v6269_v58 }
 0x19b   : > { %v6316_v19 = vpop.permute.xlu1 %4590 }
 0x19c   : > { %v6318_v40 = vpop.permute.xlu0 %4605  ;;  %vm6348_vm8 = vcmp.ne.s32.totalorder %v1078_v43, 15 }
 0x19d   : > { %4890 = vrot.lane.b32.xlu1 %v4889_v29, %s5477_s27 }
 0x19e   : > { %4900 = vrot.lane.b32.xlu0 %v4899_v51, %s5479_s29 }
 0x19f   : > { %v6322_v45 = vpop.permute.xlu1 %4610 }
 0x1a0   : > { %7917 = vst [vmem:[#allocation50_spill] sm:$0xff] %v6322_v45  ;;  %v6324_v34 = vpop.permute.xlu0 %4620  ;;  %v1599_v45 = vld [vmem:[#allocation2 + $0xd8] sm:$0xff] }
 0x1a1   : > { %7918 = vst [vmem:[#allocation51_spill] sm:$0xff] %v6324_v34  ;;  %4895 = vrot.lane.b32.xlu1 %v4889_v29, %s5475_s21  ;;  %v4924_v34 = vpack.i.bf16 %v1472_v27, %v1759_v42  ;;  %v4914_v57 = vpack.i.bf16 %v1600_v36, %v1599_v45  ;;  %v1848_v27 = vsel %vm6216_vm12, %v1616_v33, 0.0  ;;  %v992_v42 = vadd.s32 216, %v5693_v48  ;;  %v1446_v45 = vld [vmem:[#allocation2 + $0xf] sm:$0xff] }
 0x1a2   : > { %4905 = vrot.lane.b32.xlu0 %v4889_v29, %s5478_s28  ;;  %v1615_v29 = vld [vmem:[#allocation2 + $0x59] sm:$0xff]  ;;  %v1541_v36 = vsel %vm5861_vm4, %v1445_v39, 0.0  ;;  %vm7923_vm12 = vcmask 31744   ;;  %vm7931_vm4 = vmmov %vm7930_vm13 }
 0x1a3   : > { %v6335_v51 = vpop.permute.xlu1 %4615  ;;  %v4934_v43 = vpack.i.bf16 %v1848_v27, %v1615_v29  ;;  %v1190_v0 = vand.u32 15, %v992_v42  ;;  %v2837_v17 = vsel %vm7923_vm12, %v1541_v36, %v4557_v5  ;;  %vm7924_vm11 = vmmov %vm7923_vm12  ;;  %v4562_v27 = vunpack.i.l.bf16 %v6274_v62 }
 0x1a4   : > { %7919 = vst [vmem:[#allocation52_spill] sm:$0xff] %v6335_v51  ;;  %v6337_v50 = vpop.permute.xlu0 %4635  ;;  %v1712_v51 = vsel %vm6348_vm8, %v1616_v33, 0.0  ;;  %v4603_v42 = vunpack.i.h.bf16 %v6308_v14  ;;  %v4607_v62 = vunpack.i.l.bf16 %v6318_v40 }
 0x1a5   : > { %4910 = vrot.lane.b32.xlu1 %v4909_v31, %s5481_s11  ;;  %v4939_v6 = vpack.i.bf16 %v1712_v51, %v1615_v29  ;;  %v1813_v51 = vsel %vm6055_vm15, %v6111_v7, 0.0  ;;  %vm6387_vm12 = vcmp.ne.s32.totalorder %v1190_v0, 15  ;;  %vm7933_vm15 = vcmask 97280  }
 0x1a6   : > { %4925 = vrot.lane.b32.xlu0 %v4924_v34, %s5479_s29  ;;  %v4558_v34 = vunpack.i.h.bf16 %v6269_v58  ;;  %v1780_v58 = vsel %vm6261_vm9, %v1616_v33, 0.0  ;;  %v1745_v33 = vsel %vm7926_vm10, %v6111_v7, 0.0  ;;  %vm7934_vm1 = vmmov %vm7933_vm15 }
 0x1a7   : > { %v6341_v22 = vpop.permute.xlu1 %4625  ;;  %v4949_v36 = vpack.i.bf16 %v1780_v58, %v1615_v29 }
 0x1a8   : > { %v6343_v12 = vpop.permute.xlu0 %4640  ;;  %v2838_v39 = vsel %vm7924_vm11, %v1446_v45, %v4558_v34  ;;  %v4602_v34 = vunpack.i.l.bf16 %v6308_v14  ;;  %v4608_v45 = vunpack.i.h.bf16 %v6318_v40  ;;  %v4638_v14 = vunpack.i.h.bf16 %v6337_v50 }
 0x1a9   : > { %4915 = vrot.lane.b32.xlu1 %v4914_v57, %s5477_s27  ;;  %v2871_v40 = vsel %vm7930_vm13, %v2838_v39, %v4563_v18  ;;  %v4643_v58 = vunpack.i.h.bf16 %v6343_v12  ;;  %v4642_v7 = vunpack.i.l.bf16 %v6343_v12  ;;  %vm7936_vm13 = vcmask 130048  }
 0x1aa   : > { %4930 = vrot.lane.b32.xlu0 %v4914_v57, %s5478_s28  ;;  %v2904_v55 = vsel %vm7933_vm15, %v2871_v40, %v4603_v42  ;;  %vm7938_vm11 = vcmask 162816  }
 0x1ab   : > { %v6358_v31 = vpop.permute.xlu1 %4630  ;;  %vm7939_vm15 = vmmov %vm7938_vm11 }
 0x1ac   : > { %v6360_v52 = vpop.permute.xlu0 %4645 }
 0x1ad   : > { %7922 = vst [vmem:[#allocation53_spill] sm:$0xff] %v6360_v52  ;;  %4920 = vrot.lane.b32.xlu1 %v4914_v57, %s5475_s21  ;;  %v1458_v57 = vld [vmem:[#allocation2 + $0x6f] sm:$0xff] }
 0x1ae   : > { %4935 = vrot.lane.b32.xlu0 %v4934_v43, %s5482_s12  ;;  %v1632_v43 = vld [vmem:[#allocation2 + $0xe1] sm:$0xff]  ;;  %v4944_v29 = vpack.i.bf16 %v1458_v57, %v1745_v33 }
 0x1af   : > { %v6372_v52 = vpop.permute.xlu1 %4650  ;;  %v1728_v33 = vsel %vm6387_vm12, %v1632_v43, 0.0  ;;  %v1864_v12 = vsel %vm6235_vm5, %v1632_v43, 0.0  ;;  %vm7942_vm5 = vnez %v7894_v59  ;;  %v8064_v59 = vld [vmem:[#allocation20_spill] sm:$0xff] }
 0x1b0   : > { %7925 = vst [vmem:[#allocation54_spill] sm:$0xff] %v6372_v52  ;;  %v6379_v5 = vpop.permute.xlu0 %4660 }
 0x1b1   : > { %7927 = vst [vmem:[#allocation55_spill] sm:$0xff] %v6379_v5  ;;  %4940 = vrot.lane.b32.xlu1 %v4939_v6, %s5476_s26  ;;  %v4637_v5 = vunpack.i.l.bf16 %v6337_v50  ;;  %v2870_v6 = vsel %vm7931_vm4, %v2837_v17, %v4562_v27  ;;  %v4954_v50 = vpack.i.bf16 %v1458_v57, %v1813_v51  ;;  %vm7937_vm4 = vmmov %vm7936_vm13 }
 0x1b2   : > { %4950 = vrot.lane.b32.xlu0 %v4949_v36, %s5480_s30  ;;  %v2903_v30 = vsel %vm7934_vm1, %v2870_v6, %v4602_v34  ;;  %v2937_v17 = vsel %vm7937_vm4, %v2904_v55, %v4608_v45  ;;  %vm7812_vm1 = vcmask 228352   ;;  %v4964_v55 = vpack.i.bf16 %v1728_v33, %v1631_v4 }
 0x1b3   : > { %v6398_v0 = vpop.permute.xlu1 %4655  ;;  %v2936_v39 = vsel %vm7936_vm13, %v2903_v30, %v4607_v62  ;;  %v2970_v27 = vsel %vm7939_vm15, %v2937_v17, %v4638_v14  ;;  %v4573_v34 = vunpack.i.h.bf16 %v6276_v11  ;;  %v4959_v45 = vpack.i.bf16 %v1864_v12, %v1631_v4 }
 0x1b4   : > { %7932 = vst [vmem:[#allocation56_spill] sm:$0xff] %v6398_v0  ;;  %v6402_v32 = vpop.permute.xlu0 %4665  ;;  %v2969_v18 = vsel %vm7938_vm11, %v2936_v39, %v4637_v5  ;;  %v3003_v42 = vsel %vm7941_vm3, %v2970_v27, %v4643_v58  ;;  %v1474_v5 = vld [vmem:[#allocation2 + $0xef] sm:$0xff]  ;;  %v1761_v62 = vsel %vm7942_vm5, %v6170_v61, 0.0  ;;  %vm7807_vm3 = vcmask 293888  }
 0x1b5   : > { %7935 = vst [vmem:[#allocation57_spill] sm:$0xff] %v6402_v32  ;;  %4945 = vrot.lane.b32.xlu1 %v4944_v29, %s5479_s29  ;;  %v3002_v57 = vsel %vm7940_vm7, %v2969_v18, %v4642_v7  ;;  %v1796_v7 = vsel %vm6284_vm0, %v1632_v43, 0.0  ;;  %v1618_v29 = vld [vmem:[#allocation2 + $0x71] sm:$0xff]  ;;  %v3036_v6 = vsel %vm7812_vm1, %v3003_v42, %v4573_v34  ;;  %v4969_v33 = vpack.i.bf16 %v1474_v5, %v1761_v62  ;;  %v1617_v43 = vld [vmem:[#allocation2 + $0x69] sm:$0xff] }
 0x1b6   : > { %4955 = vrot.lane.b32.xlu0 %v4954_v50, %s5481_s11  ;;  %v3035_v40 = vsel %vm7812_vm1, %v3002_v57, %v4572_v2  ;;  %v4974_v12 = vpack.i.bf16 %v1796_v7, %v1631_v4  ;;  %v1782_v18 = vsel %vm6348_vm8, %v1618_v29, 0.0  ;;  %v978_v27 = vadd.s32 104, %v5693_v48  ;;  %v1589_v2 = vld [vmem:[#allocation2 + $0x88] sm:$0xff] }
 0x1b7   : > { %v6416_v30 = vpop.permute.xlu1 %4670  ;;  %v1829_v57 = vsel %vm6076_vm2, %v6170_v61, 0.0  ;;  %v1850_v62 = vsel %vm6261_vm9, %v1618_v29, 0.0  ;;  %vm7947_vm9 = vnez %v7889_v37  ;;  %vm7948_vm11 = vnez %v7863_v9  ;;  %v5453_v9 = vld [vmem:[#allocation2 + $0x1f] sm:$0xff] }
 0x1b8   : > { %v4676_v36 = vpop.permute.xlu0 %4675  ;;  %v4979_v34 = vpack.i.bf16 %v1474_v5, %v1829_v57  ;;  %v1460_v57 = vld [vmem:[#allocation2 + $0x7f] sm:$0xff]  ;;  %vm7949_vm13 = vnez %v7859_v24  ;;  %vm7950_vm4 = vnez %v7843_v41  ;;  %vm7952_vm15 = vcmask 31744  }
 0x1b9   : > { %v4678_v51 = vunpack.i.h.bf16 %v4676_v36  ;;  %v4677_v14 = vunpack.i.l.bf16 %v4676_v36  ;;  %4965 = vrot.lane.b32.xlu1 %v4964_v55, %s5476_s26  ;;  %v4984_v55 = vpack.i.bf16 %v1782_v18, %v1617_v43  ;;  %v1590_v36 = vld [vmem:[#allocation2 + $0x90] sm:$0xff] }
 0x1ba   : > { %4960 = vrot.lane.b32.xlu0 %v4959_v45, %s5482_s12  ;;  %v1092_v45 = vand.u32 15, %v978_v27 }
 0x1bb   : > { %v3069_v11 = vsel %vm7808_vm6, %v3036_v6, %v4678_v51  ;;  %v3068_v58 = vsel %vm7808_vm6, %v3035_v40, %v4677_v14  ;;  %v6431_v50 = vpop.permute.xlu1 %4685  ;;  %v4999_v14 = vpack.i.bf16 %v1590_v36, %v1589_v2  ;;  %v4989_v40 = vpack.i.bf16 %v1850_v62, %v1617_v43  ;;  %v1587_v62 = vld [vmem:[#allocation2 + $0x78] sm:$0xff] }
 0x1bc   : > { %v6433_v39 = vpop.permute.xlu0 %4680  ;;  %v3100_v17 = vpack.c.bf16 %v3069_v11, %v3068_v58  ;;  %vm6456_vm7 = vcmp.ne.s32.totalorder %v1092_v45, 15  ;;  %v6463_v11 = vld [vmem:[#allocation2 + $0xf1] sm:$0xff]  ;;  %v1817_v6 = vsel %vm7947_vm9, %v6167_v10, 0.0 }
 0x1bd   : > { %4970 = vrot.lane.b32.xlu1 %v4969_v33, %s5479_s29  ;;  %v1714_v5 = vsel %vm6456_vm7, %v1618_v29, 0.0 }
 0x1be   : > { %4464 = vmatprep.mubr.msk.bf16.mxu1 %vm7807_vm3, %v3100_v17  ;;  %4975 = vrot.lane.b32.xlu0 %v4974_v12, %s5480_s30  ;;  %v4994_v33 = vpack.i.bf16 %v1714_v5, %v1617_v43  ;;  %v6470_v17 = vld [vmem:[#allocation2 + $0xe9] sm:$0xff]  ;;  %v1798_v12 = vsel %vm6387_vm12, %v6463_v11, 0.0  ;;  %v1815_v43 = vsel %vm7926_vm10, %v6165_v54, 0.0  ;;  %v1622_v5 = vld [vmem:[#allocation2 + $0x91] sm:$0xff]  ;;  %vm7954_vm3 = vcmask 64512  }
 0x1bf   : > { %v6444_v42 = vpop.permute.xlu1 %4695  ;;  %v5014_v18 = vpack.i.bf16 %v1798_v12, %v6470_v17  ;;  %v5019_v2 = vpack.i.bf16 %v1460_v57, %v1815_v43  ;;  %v1854_v43 = vsel %vm6456_vm7, %v1622_v5, 0.0  ;;  %vm7955_vm6 = vmmov %vm7954_vm3 }
 0x1c0   : > { %v6446_v4 = vpop.permute.xlu0 %4690 }
 0x1c1   : > { %4985 = vrot.lane.b32.xlu1 %v4984_v55, %s5480_s30  ;;  %v1747_v55 = vsel %vm7947_vm9, %v6165_v54, 0.0 }
 0x1c2   : > { %4980 = vrot.lane.b32.xlu0 %v4979_v34, %s5481_s11  ;;  %v5034_v45 = vpack.i.bf16 %v1460_v57, %v1747_v55  ;;  %v4598_v57 = vunpack.i.h.bf16 %v6298_v49  ;;  %v4597_v55 = vunpack.i.l.bf16 %v6298_v49  ;;  %v1786_v49 = vsel %vm7949_vm13, %v1622_v5, 0.0 }
 0x1c3   : > { %v6452_v51 = vpop.permute.xlu1 %4700 }
 0x1c4   : > { %7943 = vst [vmem:[#allocation58_spill] sm:$0xff] %v6452_v51  ;;  %v6454_v7 = vpop.permute.xlu0 %4705  ;;  %v4632_v51 = vunpack.i.l.bf16 %v6358_v31 }
 0x1c5   : > { %7944 = vst [vmem:[#allocation59_spill] sm:$0xff] %v6454_v7  ;;  %5000 = vrot.lane.b32.xlu1 %v4999_v14, %s5478_s28 }
 0x1c6   : > { %4990 = vrot.lane.b32.xlu0 %v4989_v40, %s5482_s12  ;;  %v1588_v40 = vld [vmem:[#allocation2 + $0x80] sm:$0xff] }
 0x1c7   : > { %v6466_v46 = vpop.permute.xlu1 %4715  ;;  %v5024_v12 = vpack.i.bf16 %v1588_v40, %v1587_v62  ;;  %v1718_v62 = vsel %vm7948_vm11, %v1622_v5, 0.0  ;;  %v4633_v40 = vunpack.i.h.bf16 %v6358_v31  ;;  %vm7953_vm11 = vmmov %vm7952_vm15 }
 0x1c8   : > { %v6468_v58 = vpop.permute.xlu0 %4710  ;;  %v2840_v23 = vsel %vm7953_vm11, %v5453_v9, %v4598_v57 }
 0x1c9   : > { %5010 = vrot.lane.b32.xlu1 %v4999_v14, %s5475_s21 }
 0x1ca   : > { %4995 = vrot.lane.b32.xlu0 %v4994_v33, %s5476_s26 }
 0x1cb   : > { %v6477_v29 = vpop.permute.xlu1 %4725 }
 0x1cc   : > { %v6480_v27 = vpop.permute.xlu0 %4720 }
 0x1cd   : > { %5015 = vrot.lane.b32.xlu1 %v5014_v18, %s5480_s30 }
 0x1ce   : > { %5005 = vrot.lane.b32.xlu0 %v4999_v14, %s5477_s27  ;;  %v1621_v14 = vld [vmem:[#allocation2 + $0x89] sm:$0xff] }
 0x1cf   : > { %v6490_v34 = vpop.permute.xlu1 %4730  ;;  %v5054_v54 = vpack.i.bf16 %v1854_v43, %v1621_v14  ;;  %v5059_v31 = vpack.i.bf16 %v1718_v62, %v1621_v14  ;;  %v1751_v43 = vsel %vm6030_vm14, %v6009_v1, 0.0  ;;  %v5044_v41 = vpack.i.bf16 %v1786_v49, %v1621_v14 }
 0x1d0   : > { %v6492_v36 = vpop.permute.xlu0 %4745  ;;  %v4672_v62 = vunpack.i.l.bf16 %v6416_v30  ;;  %v4733_v14 = vunpack.i.h.bf16 %v6490_v34 }
 0x1d1   : > { %5020 = vrot.lane.b32.xlu1 %v5019_v2, %s5481_s11  ;;  %v4628_v2 = vunpack.i.h.bf16 %v6341_v22 }
 0x1d2   : > { %5035 = vrot.lane.b32.xlu0 %v5034_v45, %s5479_s29  ;;  %v4627_v45 = vunpack.i.l.bf16 %v6341_v22  ;;  %v7951_v22 = vsel %vm7950_vm4, %v5824_v60, 0.0  ;;  %vm7957_vm4 = vnez %v7904_v28 }
 0x1d3   : > { %v6496_v33 = vpop.permute.xlu1 %4735  ;;  %v2839_v32 = vsel %vm7952_vm15, %v7951_v22, %v4597_v55  ;;  %v1819_v60 = vsel %vm7957_vm4, %v6009_v1, 0.0  ;;  %vm7958_vm15 = vcmask 97280   ;;  %v4673_v55 = vunpack.i.h.bf16 %v6416_v30 }
 0x1d4   : > { %v6498_v18 = vpop.permute.xlu0 %4750  ;;  %v2872_v5 = vsel %vm7954_vm3, %v2839_v32, %v4627_v45  ;;  %vm7959_vm11 = vmmov %vm7958_vm15  ;;  %v4568_v32 = vunpack.i.h.bf16 %v6288_v8  ;;  %v1620_v45 = vld [vmem:[#allocation2 + $0x81] sm:$0xff]  ;;  %v4737_v49 = vunpack.i.l.bf16 %v6496_v33  ;;  %v1749_v24 = vsel %vm7957_vm4, %v6167_v10, 0.0 }
 0x1d5   : > { %5025 = vrot.lane.b32.xlu1 %v5024_v12, %s5477_s27  ;;  %v2905_v57 = vsel %vm7958_vm15, %v2872_v5, %v4632_v51  ;;  %v6547_v51 = vld [vmem:[#allocation2 + $0x9f] sm:$0xff]  ;;  %vm7962_vm15 = vcmask 162816  }
 0x1d6   : > { %5040 = vrot.lane.b32.xlu0 %v5024_v12, %s5478_s28  ;;  %v5064_v5 = vpack.i.bf16 %v6547_v51, %v1751_v43 }
 0x1d7   : > { %v6508_v61 = vpop.permute.xlu1 %4740 }
 0x1d8   : > { %v6514_v7 = vpop.permute.xlu0 %4770 }
 0x1d9   : > { %5030 = vrot.lane.b32.xlu1 %v5024_v12, %s5475_s21  ;;  %v2873_v12 = vsel %vm7955_vm6, %v2840_v23, %v4628_v2  ;;  %v4567_v23 = vunpack.i.l.bf16 %v6288_v8  ;;  %v4732_v2 = vunpack.i.l.bf16 %v6490_v34  ;;  %vm7960_vm6 = vcmask 130048  }
 0x1da   : > { %5055 = vrot.lane.b32.xlu0 %v5054_v54, %s5482_s12  ;;  %v2906_v54 = vsel %vm7959_vm11, %v2873_v12, %v4633_v40  ;;  %v4738_v40 = vunpack.i.h.bf16 %v6496_v33  ;;  %vm7961_vm3 = vmmov %vm7960_vm6  ;;  %v5049_v34 = vpack.i.bf16 %v6547_v51, %v1819_v60  ;;  %v1852_v33 = vsel %vm6348_vm8, %v1620_v45, 0.0 }
 0x1db   : > { %v6531_v0 = vpop.permute.xlu1 %4755  ;;  %v2938_v30 = vsel %vm7960_vm6, %v2905_v57, %v4567_v23  ;;  %v2939_v9 = vsel %vm7961_vm3, %v2906_v54, %v4568_v32  ;;  %vm7963_vm11 = vmmov %vm7962_vm15  ;;  %vm7964_vm6 = vcmask 195584   ;;  %vm7966_vm8 = vcmask 261120  }
 0x1dc   : > { %7956 = vst [vmem:[#allocation60_spill] sm:$0xff] %v6531_v0  ;;  %v6540_v22 = vpop.permute.xlu0 %4775  ;;  %v2972_v12 = vsel %vm7962_vm15, %v2939_v9, %v4673_v55  ;;  %vm7965_vm3 = vmmov %vm7964_vm6  ;;  %v1619_v55 = vld [vmem:[#allocation2 + $0x79] sm:$0xff] }
 0x1dd   : > { %5045 = vrot.lane.b32.xlu1 %v5044_v41, %s5480_s30  ;;  %v2971_v41 = vsel %vm7963_vm11, %v2938_v30, %v4672_v62  ;;  %v3005_v57 = vsel %vm7964_vm6, %v2972_v12, %v4733_v14  ;;  %vm7967_vm15 = vmmov %vm7966_vm8  ;;  %vm7968_vm11 = vcmask 293888  }
 0x1de   : > { %5060 = vrot.lane.b32.xlu0 %v5059_v31, %s5476_s26  ;;  %v1831_v31 = vsel %vm7942_vm5, %v6172_v38, 0.0  ;;  %v3004_v43 = vsel %vm7965_vm3, %v2971_v41, %v4732_v2  ;;  %v3038_v3 = vsel %vm7812_vm1, %v3005_v57, %v4738_v40  ;;  %v1784_v40 = vsel %vm6456_vm7, %v1620_v45, 0.0 }
 0x1df   : > { %v6554_v8 = vpop.permute.xlu1 %4760  ;;  %v3037_v62 = vsel %vm7812_vm1, %v3004_v43, %v4737_v49  ;;  %v5069_v14 = vpack.i.bf16 %v6562_v53, %v1831_v31  ;;  %v994_v49 = vadd.s32 232, %v5693_v48  ;;  %v6592_v31 = vld [vmem:[#allocation2 + $0x8f] sm:$0xff]  ;;  %vm7975_vm3 = vcmask 64512  }
 0x1e0   : > { %v4781_v0 = vpop.permute.xlu0 %4780  ;;  %v5084_v43 = vpack.i.bf16 %v6592_v31, %v1749_v24  ;;  %v4752_v24 = vunpack.i.l.bf16 %v6498_v18 }
 0x1e1   : > { %v4783_v54 = vunpack.i.h.bf16 %v4781_v0  ;;  %v4782_v60 = vunpack.i.l.bf16 %v4781_v0  ;;  %5050 = vrot.lane.b32.xlu1 %v5049_v34, %s5481_s11  ;;  %v5074_v0 = vpack.i.bf16 %v1852_v33, %v1619_v55  ;;  %v1716_v34 = vsel %vm7949_vm13, %v1620_v45, 0.0 }
 0x1e2   : > { %5065 = vrot.lane.b32.xlu0 %v5064_v5, %s5479_s29  ;;  %v5079_v12 = vpack.i.bf16 %v1716_v34, %v1619_v55  ;;  %v5094_v33 = vpack.i.bf16 %v1784_v40, %v1619_v55  ;;  %v1204_v45 = vand.u32 15, %v994_v49  ;;  %v1603_v55 = vld [vmem:[#allocation2 + $0xf8] sm:$0xff]  ;;  %v4682_v34 = vunpack.i.l.bf16 %v6433_v39 }
 0x1e3   : > { %v3070_v32 = vsel %vm7966_vm8, %v3037_v62, %v4782_v60  ;;  %v3071_v23 = vsel %vm7967_vm15, %v3038_v3, %v4783_v54  ;;  %v6575_v30 = vpop.permute.xlu1 %4765  ;;  %v5099_v60 = vpack.i.bf16 %v6592_v31, %v1817_v6  ;;  %v1604_v62 = vld [vmem:[#allocation2 + $0x100] sm:$0xff]  ;;  %v1866_v3 = vsel %vm6284_vm0, %v6463_v11, 0.0  ;;  %vm7976_vm8 = vmmov %vm7975_vm3 }
 0x1e4   : > { %v3101_v2 = vpack.c.bf16 %v3071_v23, %v3070_v32  ;;  %v6578_v9 = vpop.permute.xlu0 %4795  ;;  %v996_v32 = vadd.s32 248, %v5693_v48  ;;  %v4578_v23 = vunpack.i.h.bf16 %v6296_v16  ;;  %vm6616_vm7 = vcmp.ne.s32.totalorder %v1204_v45, 15 }
 0x1e5   : > { %5070 = vrot.lane.b32.xlu1 %v5069_v14, %s5481_s11  ;;  %v4577_v14 = vunpack.i.l.bf16 %v6296_v16  ;;  %v6624_v20 = vpack.i.bf16 %v1604_v62, %v1603_v55  ;;  %v4748_v48 = vunpack.i.h.bf16 %v6492_v36  ;;  %v4747_v49 = vunpack.i.l.bf16 %v6492_v36 }
 0x1e6   : > { %4465 = vmatmul.mubr.msk.bf16.vlgmr.msra.gmra.mrb[16].mxu1 %vm7968_vm11, %v3101_v2  ;;  %5075 = vrot.lane.b32.xlu0 %v5074_v0, %s5482_s12  ;;  %v4683_v0 = vunpack.i.h.bf16 %v6433_v39  ;;  %v5104_v16 = vpack.i.bf16 %v1866_v3, %v6470_v17  ;;  %v1730_v39 = vsel %vm6616_vm7, %v6463_v11, 0.0  ;;  %v1218_v6 = vand.u32 15, %v996_v32 }
 0x1e7   : > { %v6588_v5 = vpop.permute.xlu1 %4785  ;;  %vm7971_vm0 = vnez %v7855_v21  ;;  %vm7973_vm13 = vcmask 31744   ;;  %v4798_v55 = vunpack.i.h.bf16 %v6578_v9  ;;  %vm7977_vm15 = vcmask 97280  }
 0x1e8   : > { %v6590_v41 = vpop.permute.xlu0 %4800  ;;  %v7972_v36 = vsel %vm7971_vm0, %v5935_v63, 0.0  ;;  %vm7974_vm6 = vmmov %vm7973_vm13  ;;  %vm7979_vm0 = vcmask 130048   ;;  %v4688_v2 = vunpack.i.h.bf16 %v6431_v50 }
 0x1e9   : > { %5080 = vrot.lane.b32.xlu1 %v5079_v12, %s5476_s26  ;;  %v2841_v45 = vsel %vm7973_vm13, %v7972_v36, %v4577_v14  ;;  %v4803_v3 = vunpack.i.h.bf16 %v6590_v41  ;;  %v4802_v21 = vunpack.i.l.bf16 %v6590_v41  ;;  %vm7978_vm11 = vmmov %vm7977_vm15  ;;  %v1768_v36 = vld [vmem:[#allocation2 + $0x110] sm:$0xff] }
 0x1ea   : > { %5095 = vrot.lane.b32.xlu0 %v5094_v33, %s5480_s30  ;;  %v4753_v33 = vunpack.i.h.bf16 %v6498_v18  ;;  %v4797_v18 = vunpack.i.l.bf16 %v6578_v9  ;;  %v2874_v11 = vsel %vm7976_vm8, %v2841_v45, %v4682_v34  ;;  %v5119_v9 = vpack.i.bf16 %v1730_v39, %v6470_v17  ;;  %vm7980_vm13 = vmmov %vm7979_vm0 }
 0x1eb   : > { %v6602_v57 = vpop.permute.xlu1 %4790  ;;  %v4693_v45 = vunpack.i.h.bf16 %v6446_v4  ;;  %v4768_v17 = vunpack.i.h.bf16 %v6575_v30 }
 0x1ec   : > { %v6605_v54 = vpop.permute.xlu0 %4805 }
 0x1ed   : > { %5085 = vrot.lane.b32.xlu1 %v5084_v43, %s5479_s29  ;;  %v5454_v43 = vld [vmem:[#allocation2 + $0x2f] sm:$0xff] }
 0x1ee   : > { %5100 = vrot.lane.b32.xlu0 %v5099_v60, %s5481_s11  ;;  %v2842_v60 = vsel %vm7974_vm6, %v5454_v43, %v4578_v23  ;;  %v2907_v23 = vsel %vm7978_vm11, %v2874_v11, %v4747_v49  ;;  %vm7981_vm6 = vnez %v7900_v35  ;;  %v1767_v49 = vld [vmem:[#allocation2 + $0x108] sm:$0xff]  ;;  %vm7986_vm11 = vcmask 195584  }
 0x1ef   : > { %v6622_v40 = vpop.permute.xlu1 %4810  ;;  %v2875_v62 = vsel %vm7975_vm3, %v2842_v60, %v4683_v0  ;;  %v1763_v41 = vsel %vm7981_vm6, %v6172_v38, 0.0  ;;  %vm7982_vm3 = vcmask 162816   ;;  %v4692_v43 = vunpack.i.l.bf16 %v6446_v4 }
 0x1f0   : > { %v6628_v12 = vpop.permute.xlu0 %4820  ;;  %v2908_v32 = vsel %vm7977_vm15, %v2875_v62, %v4748_v48  ;;  %vm7983_vm8 = vmmov %vm7982_vm3  ;;  %vm6668_vm15 = vcmp.ne.s32.totalorder %v1218_v6, 15  ;;  %v5134_v62 = vpack.i.bf16 %v1768_v36, %v1767_v49  ;;  %v4778_v36 = vunpack.i.h.bf16 %v6540_v22 }
 0x1f1   : > { %5090 = vrot.lane.b32.xlu1 %v6624_v20, %s5477_s27  ;;  %v2941_v0 = vsel %vm7980_vm13, %v2908_v32, %v4753_v33  ;;  %v6672_v33 = vld [vmem:[#allocation2 + $0x111] sm:$0xff]  ;;  %vm7988_vm13 = vcmask 261120  }
 0x1f2   : > { %5105 = vrot.lane.b32.xlu0 %v5104_v16, %s5482_s12  ;;  %v2940_v16 = vsel %vm7979_vm0, %v2907_v23, %v4752_v24  ;;  %v2974_v48 = vsel %vm7983_vm8, %v2941_v0, %v4798_v55  ;;  %vm7987_vm0 = vmmov %vm7986_vm11  ;;  %v5124_v55 = vpack.i.bf16 %v6562_v53, %v1763_v41  ;;  %v1802_v11 = vsel %vm6668_vm15, %v6672_v33, 0.0  ;;  %v6691_v53 = vld [vmem:[#allocation2 + $0x109] sm:$0xff] }
 0x1f3   : > { %v6651_v63 = vpop.permute.xlu1 %4815  ;;  %v2973_v34 = vsel %vm7982_vm3, %v2940_v16, %v4797_v18  ;;  %v3007_v24 = vsel %vm7987_vm0, %v2974_v48, %v4803_v3  ;;  %v4593_v3 = vunpack.i.h.bf16 %v6316_v19  ;;  %v4713_v23 = vunpack.i.h.bf16 %v6468_v58  ;;  %vm7989_vm3 = vmmov %vm7988_vm13 }
 0x1f4   : > { %v6655_v14 = vpop.permute.xlu0 %4825  ;;  %v3040_v4 = vsel %vm7812_vm1, %v3007_v24, %v4693_v45  ;;  %v1803_v24 = vld [vmem:[#allocation2 + $0x117] sm:$0xff]  ;;  %v5455_v45 = vld [vmem:[#allocation2 + $0xaf] sm:$0xff]  ;;  %vm7990_vm8 = vcmask 31744  }
 0x1f5   : > { %5110 = vrot.lane.b32.xlu1 %v6146_v47, %s5475_s21  ;;  %v3006_v47 = vsel %vm7986_vm11, %v2973_v34, %v4802_v21  ;;  %v4592_v21 = vunpack.i.l.bf16 %v6316_v19  ;;  %v4773_v19 = vunpack.i.h.bf16 %v6514_v7  ;;  %v4772_v34 = vunpack.i.l.bf16 %v6514_v7  ;;  %vm7993_vm0 = vmmov %vm7990_vm8 }
 0x1f6   : > { %5120 = vrot.lane.b32.xlu0 %v5119_v9, %s5476_s26  ;;  %v3039_v32 = vsel %vm7812_vm1, %v3006_v47, %v4692_v43  ;;  %v4712_v9 = vunpack.i.l.bf16 %v6468_v58  ;;  %v4777_v47 = vunpack.i.l.bf16 %v6540_v22  ;;  %v5139_v58 = vpack.i.bf16 %v1802_v11, %v6691_v53  ;;  %v1636_v22 = vld [vmem:[#allocation2 + $0x101] sm:$0xff] }
 0x1f7   : > { %v6676_v39 = vpop.permute.xlu1 %4830  ;;  %v2858_v43 = vsel %vm7990_vm8, %v5455_v45, %v4593_v3  ;;  %vm7991_vm11 = vnez %v7857_v13  ;;  %v4828_v13 = vunpack.i.h.bf16 %v6655_v14  ;;  %vm7997_vm8 = vcmask 97280  }
 0x1f8   : > { %v4836_v60 = vpop.permute.xlu0 %4835 }
 0x1f9   : > { %v4838_v18 = vunpack.i.h.bf16 %v4836_v60  ;;  %v4837_v6 = vunpack.i.l.bf16 %v4836_v60  ;;  %5115 = vrot.lane.b32.xlu1 %v6624_v20, %s5475_s21  ;;  %v7992_v60 = vsel %vm7991_vm11, %v5951_v44, 0.0  ;;  %v4827_v44 = vunpack.i.l.bf16 %v6655_v14  ;;  %vm7998_vm11 = vmmov %vm7997_vm8  ;;  %s5483_s21 = smov 124  }
 0x1fa   : > { %5125 = vrot.lane.b32.xlu0 %v5124_v55, %s5479_s29  ;;  %v2857_v7 = vsel %vm7993_vm0, %v7992_v60, %v4592_v21  ;;  %v4823_v55 = vunpack.i.h.bf16 %v6628_v12  ;;  %vm7999_vm0 = vnez %v7902_v15  ;;  %v1868_v14 = vsel %vm6387_vm12, %v1636_v22, 0.0 }
 0x1fb   : > { %v3073_v16 = vsel %vm7988_vm13, %v3040_v4, %v4838_v18  ;;  %v3072_v0 = vsel %vm7989_vm3, %v3039_v32, %v4837_v6  ;;  %v6697_v41 = vpop.permute.xlu1 %4845  ;;  %v4822_v18 = vunpack.i.l.bf16 %v6628_v12  ;;  %vm7994_vm13 = vcmask 293888   ;;  %v1804_v4 = vld [vmem:[#allocation2 + $0x11f] sm:$0xff] }
 0x1fc   : > { %v6701_v48 = vpop.permute.xlu0 %4840  ;;  %v3102_v49 = vpack.c.bf16 %v3073_v16, %v3072_v0  ;;  %vm7995_vm3 = vcmask 64512   ;;  %v1635_v16 = vld [vmem:[#allocation2 + $0xf9] sm:$0xff]  ;;  %vm8006_vm12 = vcmask 228352  }
 0x1fd   : > { %5135 = vrot.lane.b32.xlu1 %v5134_v62, %s5478_s28  ;;  %v2891_v6 = vsel %vm7995_vm3, %v2858_v43, %v4713_v23  ;;  %vm7996_vm1 = vmmov %vm7995_vm3  ;;  %v5154_v52 = vpack.i.bf16 %v1868_v14, %v1635_v16  ;;  %v1732_v43 = vsel %vm6668_vm15, %v1636_v22, 0.0 }
 0x1fe   : > { %4468 = vmatprep.mubr.msk.bf16.mxu1 %vm7994_vm13, %v3102_v49  ;;  %5130 = vrot.lane.b32.xlu0 %v6624_v20, %s5478_s28  ;;  %v2890_v11 = vsel %vm7996_vm1, %v2857_v7, %v4712_v9  ;;  %v2924_v21 = vsel %vm7997_vm8, %v2891_v6, %v4773_v19  ;;  %v1835_v20 = vsel %vm7999_vm0, %v1803_v24, 0.0  ;;  %vm8000_vm13 = vcmask 130048  }
 0x1ff   : > { %v6722_v3 = vpop.permute.xlu1 %4855  ;;  %v2923_v12 = vsel %vm7998_vm11, %v2890_v11, %v4772_v34  ;;  %vm8001_vm3 = vmmov %vm8000_vm13  ;;  %vm8002_vm1 = vcmask 162816   ;;  %vm8004_vm11 = vcmask 195584  }
 0x200   : > { %v6726_v32 = vpop.permute.xlu0 %4850  ;;  %v2956_v23 = vsel %vm8000_vm13, %v2923_v12, %v4777_v47  ;;  %v2957_v9 = vsel %vm8001_vm3, %v2924_v21, %v4778_v36  ;;  %vm8003_vm8 = vmmov %vm8002_vm1  ;;  %v5144_v47 = vpack.i.bf16 %v1804_v4, %v1835_v20  ;;  %v4723_v36 = vunpack.i.h.bf16 %v6480_v27  ;;  %v1734_v20 = vld [vmem:[#allocation2 + $0x10f] sm:$0xff] }
 0x201   : > { %5140 = vrot.lane.b32.xlu1 %v5139_v58, %s5480_s30  ;;  %v2989_v0 = vsel %vm8002_vm1, %v2956_v23, %v4822_v18  ;;  %v2990_v19 = vsel %vm8003_vm8, %v2957_v9, %v4823_v55  ;;  %vm8005_vm4 = vmmov %vm8004_vm11  ;;  %v4722_v58 = vunpack.i.l.bf16 %v6480_v27  ;;  %v1733_v55 = vld [vmem:[#allocation2 + $0x107] sm:$0xff]  ;;  %v4727_v18 = vunpack.i.l.bf16 %v6477_v29 }
 0x202   : > { %5150 = vrot.lane.b32.xlu0 %v5134_v62, %s5477_s27  ;;  %v3022_v34 = vsel %vm8004_vm11, %v2989_v0, %v4827_v44  ;;  %v3023_v49 = vsel %vm8005_vm4, %v2990_v19, %v4828_v13  ;;  %v1800_v62 = vsel %vm6616_vm7, %v1636_v22, 0.0  ;;  %vm8007_vm4 = vmmov %vm8006_vm12  ;;  %vm8008_vm13 = vcmask 261120  }
 0x203   : > { %v6740_v24 = vpop.permute.xlu1 %4860  ;;  %v3055_v6 = vsel %vm8006_vm12, %v3022_v34, %v4722_v58  ;;  %v3056_v11 = vsel %vm8007_vm4, %v3023_v49, %v4723_v36  ;;  %vm8009_vm3 = vmmov %vm8008_vm13  ;;  %v5159_v21 = vpack.i.bf16 %v1732_v43, %v1635_v16  ;;  %v5174_v4 = vpack.i.bf16 %v1800_v62, %v1635_v16  ;;  %v1837_v16 = vld [vmem:[#allocation2 + $0x118] sm:$0xff]  ;;  %v1838_v34 = vld [vmem:[#allocation2 + $0x120] sm:$0xff] }
 0x204   : > { %v4866_v45 = vpop.permute.xlu0 %4865  ;;  %v1765_v23 = vsel %vm7999_vm0, %v1733_v55, 0.0  ;;  %v1833_v14 = vsel %vm7981_vm6, %v1733_v55, 0.0  ;;  %v8010_v0 = vsel %vm6076_vm2, %v6071_v56, 0.0  ;;  %vm8011_vm1 = vcmask 31744   ;;  %v1840_v49 = vld [vmem:[#allocation2 + $0x121] sm:$0xff]  ;;  %v1839_v43 = vld [vmem:[#allocation2 + $0x119] sm:$0xff] }
 0x205   : > { %v4868_v60 = vunpack.i.h.bf16 %v4866_v45  ;;  %v4867_v7 = vunpack.i.l.bf16 %v4866_v45  ;;  %5145 = vrot.lane.b32.xlu1 %v5144_v47, %s5481_s11  ;;  %v2861_v19 = vsel %vm8011_vm1, %v8010_v0, %v4727_v18  ;;  %vm8012_vm8 = vcmask 64512   ;;  %vm8018_vm11 = vmmov %vm8011_vm1 }
 0x206   : > { %5155 = vrot.lane.b32.xlu0 %v5154_v52, %s5482_s12  ;;  %v5164_v58 = vpack.i.bf16 %v1734_v20, %v1765_v23  ;;  %v5179_v52 = vpack.i.bf16 %v1734_v20, %v1833_v14  ;;  %v1870_v56 = vsel %vm6616_vm7, %v6672_v33, 0.0  ;;  %v5169_v25 = vpack.i.bf16 %v1838_v34, %v1837_v16  ;;  %vm8016_vm7 = vmmov %vm8011_vm1 }
 0x207   : > { %v6754_v27 = vsel %vm8008_vm13, %v3056_v11, %v4868_v60  ;;  %v6757_v13 = vsel %vm8009_vm3, %v3055_v6, %v4867_v7  ;;  %v6759_v44 = vpop.permute.xlu1 %4875  ;;  %v1872_v60 = vsel %vm6668_vm15, %v1840_v49, 0.0  ;;  %v4767_v7 = vunpack.i.l.bf16 %v6575_v30  ;;  %vm8017_vm15 = vmmov %vm8012_vm8 }
 0x208   : > { %v6763_v12 = vpop.permute.xlu0 %4870  ;;  %v4812_v55 = vunpack.i.l.bf16 %v6622_v40  ;;  %v5184_v6 = vpack.i.bf16 %v1870_v56, %v6691_v53  ;;  %v5189_v11 = vpack.i.bf16 %v1872_v60, %v1839_v43  ;;  %v4743_v33 = vunpack.i.h.bf16 %v6508_v61  ;;  %v8014_v53 = vld [vmem:[#allocation38_spill] sm:$0xff]  ;;  %v5457_v56 = vld [vmem:[#allocation2 + $0xbf] sm:$0xff]  ;;  %vm8019_vm12 = vmmov %vm8011_vm1 }
 0x209   : > { %v4872_v9 = vunpack.i.l.bf16 %v6763_v12  ;;  %5160 = vrot.lane.b32.xlu1 %v5159_v21, %s5476_s26  ;;  %v4817_v21 = vunpack.i.l.bf16 %v6651_v63  ;;  %v4728_v20 = vunpack.i.h.bf16 %v6477_v29  ;;  %v4742_v23 = vunpack.i.l.bf16 %v6508_v61  ;;  %v8021_v43 = vld [vmem:[#allocation36_spill] sm:$0xff]  ;;  %vm8025_vm3 = vmmov %vm8011_vm1 }
 0x20a   : > { %5175 = vrot.lane.b32.xlu0 %v5174_v4, %s5480_s30  ;;  %v4687_v4 = vunpack.i.l.bf16 %v6431_v50  ;;  %vm8013_vm2 = vnez %v7872_v26  ;;  %v4788_v0 = vunpack.i.h.bf16 %v6588_v5  ;;  %v4818_v16 = vunpack.i.h.bf16 %v6651_v63  ;;  %vm8026_vm1 = vmmov %vm8012_vm8 }
 0x20b   : > { %v6778_v47 = vsel %vm8012_vm8, %v2861_v19, %v4872_v9  ;;  %v6780_v36 = vpop.permute.xlu1 %4885  ;;  %v4813_v9 = vunpack.i.h.bf16 %v6622_v40  ;;  %v8015_v14 = vsel %vm8013_vm2, %v8014_v53, 0.0  ;;  %v4787_v19 = vunpack.i.l.bf16 %v6588_v5  ;;  %vm8028_vm8 = vmmov %vm8025_vm3 }
 0x20c   : > { %v6782_v45 = vpop.permute.xlu0 %4880  ;;  %v2859_v30 = vsel %vm8016_vm7, %v8015_v14, %v4767_v7  ;;  %v4718_v61 = vunpack.i.h.bf16 %v6466_v46  ;;  %v4717_v29 = vunpack.i.l.bf16 %v6466_v46  ;;  %v4792_v40 = vunpack.i.l.bf16 %v6602_v57  ;;  %v8023_v46 = vld [vmem:[#allocation35_spill] sm:$0xff]  ;;  %vm8029_vm2 = vmmov %vm8026_vm1 }
 0x20d   : > { %5165 = vrot.lane.b32.xlu1 %v5164_v58, %s5479_s29  ;;  %v2892_v26 = vsel %vm8017_vm15, %v2859_v30, %v4812_v55  ;;  %v5456_v58 = vld [vmem:[#allocation2 + $0x3f] sm:$0xff]  ;;  %v2860_v5 = vsel %vm8019_vm12, %v5457_v56, %v4768_v17  ;;  %vm8020_vm4 = vcmask 97280   ;;  %vm8022_vm13 = vnez %v8021_v43  ;;  %vm8030_vm7 = vmmov %vm8026_vm1 }
 0x20e   : > { %5180 = vrot.lane.b32.xlu0 %v5179_v52, %s5481_s11  ;;  %v2844_v52 = vsel %vm8018_vm11, %v5456_v58, %v4743_v33  ;;  %v2925_v63 = vsel %vm8020_vm4, %v2892_v26, %v4817_v21  ;;  %v8024_v60 = vsel %vm8022_vm13, %v8023_v46, 0.0  ;;  %v4793_v55 = vunpack.i.h.bf16 %v6602_v57  ;;  %v8027_v17 = vld [vmem:[#allocation5_spill] sm:$0xff]  ;;  %v5458_v21 = vld [vmem:[#allocation2 + $0xcf] sm:$0xff]  ;;  %vm8031_vm15 = vmmov %vm8020_vm4 }
 0x20f   : > { %v6792_v62 = vpop.permute.xlu1 %4890  ;;  %v2843_v7 = vsel %vm8025_vm3, %v8024_v60, %v4742_v23  ;;  %v4873_v33 = vunpack.i.h.bf16 %v6763_v12  ;;  %v2862_v53 = vsel %vm8028_vm8, %v5458_v21, %v4728_v20  ;;  %v2877_v14 = vsel %vm8030_vm7, %v2844_v52, %v4788_v0  ;;  %vm8032_vm11 = vmmov %vm8020_vm4 }
 0x210   : > { %v6795_v18 = vpop.permute.xlu0 %4900  ;;  %vm8033_vm12 = vcmask 130048   ;;  %v4863_v12 = vunpack.i.h.bf16 %v6740_v24  ;;  %vm8034_vm4 = vcmask 162816   ;;  %vm8036_vm13 = vmmov %vm8032_vm11  ;;  %vm8038_vm8 = vcmask 195584  }
 0x211   : > { %5170 = vrot.lane.b32.xlu1 %v5169_v25, %s5477_s27  ;;  %v4862_v25 = vunpack.i.l.bf16 %v6740_v24  ;;  %v2910_v0 = vsel %vm8036_vm13, %v2877_v14, %v4793_v55  ;;  %vm8037_vm3 = vmmov %vm8033_vm12  ;;  %v8039_v24 = vld [vmem:[#allocation3_spill] sm:$0xff]  ;;  %v4833_v52 = vunpack.i.h.bf16 %v6676_v39  ;;  %v4893_v14 = vunpack.i.h.bf16 %v6792_v62 }
 0x212   : > { %5185 = vrot.lane.b32.xlu0 %v5184_v6, %s5482_s12  ;;  %v2893_v6 = vsel %vm8026_vm1, %v2860_v5, %v4813_v9  ;;  %v2958_v9 = vsel %vm8033_vm12, %v2925_v63, %v4717_v29  ;;  %v4832_v63 = vunpack.i.l.bf16 %v6676_v39  ;;  %v8044_v39 = vld [vmem:[#allocation7_spill] sm:$0xff]  ;;  %vm8045_vm12 = vcmask 228352   ;;  %vm8048_vm13 = vmmov %vm8037_vm3 }
 0x213   : > { %v6816_v34 = vpop.permute.xlu1 %4895  ;;  %v2926_v30 = vsel %vm8031_vm15, %v2893_v6, %v4818_v16  ;;  %v2991_v56 = vsel %vm8034_vm4, %v2958_v9, %v4862_v25  ;;  %vm8042_vm15 = vmmov %vm8034_vm4  ;;  %v8047_v9 = vld [vmem:[#allocation13_spill] sm:$0xff] }
 0x214   : > { %v6822_v49 = vpop.permute.xlu0 %4905  ;;  %v2959_v16 = vsel %vm8037_vm3, %v2926_v30, %v4718_v61  ;;  %v4888_v61 = vunpack.i.h.bf16 %v6780_v36  ;;  %vm8046_vm4 = vmmov %vm8045_vm12 }
 0x215   : > { %5190 = vrot.lane.b32.xlu1 %v5189_v11, %s5482_s12  ;;  %v2876_v11 = vsel %vm8029_vm2, %v2843_v7, %v4787_v19  ;;  %v8035_v19 = vld [vmem:[#allocation9_spill] sm:$0xff]  ;;  %vm8040_vm2 = vmmov %vm8032_vm11  ;;  %v2992_v7 = vsel %vm8042_vm15, %v2959_v16, %v4863_v12  ;;  %v2943_v12 = vsel %vm8037_vm3, %v2910_v0, %v4688_v2 }
 0x216   : > { %3990 = vrot.lane.b32.xlu0 %v8027_v17, %s5483_s21  ;;  %v2909_v57 = vsel %vm8032_vm11, %v2876_v11, %v4792_v40  ;;  %v2895_v40 = vsel %vm8026_vm1, %v2862_v53, %v4873_v33  ;;  %vm8041_vm7 = vmmov %vm8040_vm2  ;;  %v4887_v17 = vunpack.i.l.bf16 %v6780_v36  ;;  %v8054_v2 = vld [vmem:[#allocation17_spill] sm:$0xff] }
 0x217   : > { %v4911_v23 = vpop.permute.xlu1 %4910  ;;  %vm8043_vm11 = vmmov %vm8038_vm8  ;;  %v2942_v36 = vsel %vm8048_vm13, %v2909_v57, %v4687_v4  ;;  %vm8058_vm13 = vcmask 31744  }
 0x218   : > { %v4926_v26 = vpop.permute.xlu0 %4925  ;;  %v4912_v58 = vunpack.i.l.bf16 %v4911_v23  ;;  %v4913_v20 = vunpack.i.h.bf16 %v4911_v23  ;;  %vm8049_vm1 = vmmov %vm8037_vm3  ;;  %vm8060_vm3 = vcmask 261120  }
 0x219   : > { %v4928_v5 = vunpack.i.h.bf16 %v4926_v26  ;;  %v4927_v43 = vunpack.i.l.bf16 %v4926_v26  ;;  %3992 = vrot.lane.b32.xlu1 %v8035_v19, %s5483_s21 }
 0x21a   : > { %v3024_v29 = vsel %vm8038_vm8, %v2991_v56, %v4912_v58  ;;  %3994 = vrot.lane.b32.xlu0 %v8039_v24, %s5483_s21  ;;  %v3025_v21 = vsel %vm8043_vm11, %v2992_v7, %v4913_v20  ;;  %vm8050_vm8 = vmmov %vm8049_vm1 }
 0x21b   : > { %v2928_v25 = vsel %vm8040_vm2, %v2895_v40, %v4928_v5  ;;  %v2927_v46 = vsel %vm8041_vm7, %v6778_v47, %v4927_v43  ;;  %v4916_v60 = vpop.permute.xlu1 %4915  ;;  %v4892_v47 = vunpack.i.l.bf16 %v6792_v62  ;;  %vm8051_vm2 = vmmov %vm8042_vm15  ;;  %v8056_v40 = vld [vmem:[#allocation45_spill] sm:$0xff] }
 0x21c   : > { %v4931_v55 = vpop.permute.xlu0 %4930  ;;  %v4918_v6 = vunpack.i.h.bf16 %v4916_v60  ;;  %v4917_v33 = vunpack.i.l.bf16 %v4916_v60  ;;  %v2976_v56 = vsel %vm8051_vm2, %v2943_v12, %v4833_v52  ;;  %vm8052_vm7 = vmmov %vm8051_vm2  ;;  %v8059_v52 = vld [vmem:[#allocation11_spill] sm:$0xff] }
 0x21d   : > { %v4933_v53 = vunpack.i.h.bf16 %v4931_v55  ;;  %v4932_v11 = vunpack.i.l.bf16 %v4931_v55  ;;  %3996 = vrot.lane.b32.xlu1 %v8044_v39, %s5483_s21  ;;  %v2975_v5 = vsel %vm8052_vm7, %v2942_v36, %v4832_v63  ;;  %vm8053_vm15 = vmmov %vm8043_vm11  ;;  %v4698_v55 = vunpack.i.h.bf16 %v6444_v42  ;;  %v8065_v39 = vld [vmem:[#allocation22_spill] sm:$0xff] }
 0x21e   : > { %v3057_v30 = vsel %vm8045_vm12, %v3024_v29, %v4917_v33  ;;  %v3058_v23 = vsel %vm8046_vm4, %v3025_v21, %v4918_v6  ;;  %3998 = vrot.lane.b32.xlu0 %v8047_v9, %s5483_s21  ;;  %v3009_v19 = vsel %vm8053_vm15, %v2976_v56, %v4888_v61  ;;  %v3008_v4 = vsel %vm8043_vm11, %v2975_v5, %v4887_v17  ;;  %vm8055_vm12 = vmmov %vm8046_vm4  ;;  %v8062_v61 = vld [vmem:[#allocation15_spill] sm:$0xff]  ;;  %v8069_v9 = vld [vmem:[#allocation40_spill] sm:$0xff] }
 0x21f   : > { %v6879_v26 = vsel %vm8049_vm1, %v2927_v46, %v4932_v11  ;;  %v6882_v62 = vsel %vm8050_vm8, %v2928_v25, %v4933_v53  ;;  %v4921_v58 = vpop.permute.xlu1 %4920  ;;  %v3041_v0 = vsel %vm8055_vm12, %v3008_v4, %v4892_v47  ;;  %v3042_v16 = vsel %vm8046_vm4, %v3009_v19, %v4893_v14  ;;  %vm8061_vm1 = vmmov %vm8060_vm3  ;;  %v8066_v14 = vld [vmem:[#allocation19_spill] sm:$0xff]  ;;  %v8067_v47 = vld [vmem:[#allocation41_spill] sm:$0xff] }
 0x220   : > { %v4936_v43 = vpop.permute.xlu0 %4935  ;;  %v4922_v20 = vunpack.i.l.bf16 %v4921_v58  ;;  %v8057_v29 = vsel %vm7942_vm5, %v8056_v40, 0.0  ;;  %vm8063_vm8 = vcmask 293888   ;;  %v4697_v6 = vunpack.i.l.bf16 %v6444_v42  ;;  %vm8071_vm2 = vmmov %vm8058_vm13  ;;  %v5459_v12 = vld [vmem:[#allocation2 + $0x4f] sm:$0xff] }
 0x221   : > { %v4938_v50 = vunpack.i.h.bf16 %v4936_v43  ;;  %v4937_v57 = vunpack.i.l.bf16 %v4936_v43  ;;  %4000 = vrot.lane.b32.xlu1 %v8054_v2, %s5483_s21  ;;  %v4843_v17 = vunpack.i.h.bf16 %v6701_v48  ;;  %v4842_v21 = vunpack.i.l.bf16 %v6701_v48  ;;  %vm8072_vm7 = vmmov %vm8071_vm2 }
 0x222   : > { %v2863_v24 = vsel %vm8058_vm13, %v8057_v29, %v4922_v20  ;;  %4002 = vrot.lane.b32.xlu0 %v8059_v52, %s5483_s21  ;;  %v4923_v11 = vunpack.i.h.bf16 %v4921_v58  ;;  %vm8068_vm5 = vnez %v8067_v47  ;;  %v2846_v56 = vsel %vm8072_vm7, %v5459_v12, %v4698_v55  ;;  %vm8075_vm12 = vmmov %vm8071_vm2 }
 0x223   : > { %v3074_v63 = vsel %vm8060_vm3, %v3041_v0, %v4937_v57  ;;  %v3075_v25 = vsel %vm8061_vm1, %v3042_v16, %v4938_v50  ;;  %v6901_v46 = vpop.permute.xlu1 %4940  ;;  %v8070_v36 = vsel %vm8068_vm5, %v8069_v9, 0.0  ;;  %vm8073_vm15 = vcmask 64512   ;;  %v5460_v50 = vld [vmem:[#allocation2 + $0xdf] sm:$0xff]  ;;  %vm8080_vm3 = vmmov %vm8061_vm1 }
 0x224   : > { %v3103_v60 = vpack.c.bf16 %v3075_v25, %v3074_v63  ;;  %v6903_v7 = vpop.permute.xlu0 %4950  ;;  %v2845_v42 = vsel %vm8071_vm2, %v8070_v36, %v4697_v6  ;;  %v2879_v48 = vsel %vm8073_vm15, %v2846_v56, %v4843_v17  ;;  %vm8074_vm11 = vmmov %vm8073_vm15  ;;  %v4878_v4 = vunpack.i.h.bf16 %v6759_v44  ;;  %v8076_v16 = vld [vmem:[#allocation21_spill] sm:$0xff]  ;;  %v8079_v25 = vld [vmem:[#allocation24_spill] sm:$0xff] }
 0x225   : > { %4004 = vrot.lane.b32.xlu1 %v8062_v61, %s5483_s21  ;;  %v2878_v58 = vsel %vm8074_vm11, %v2845_v42, %v4842_v21  ;;  %v2864_v57 = vsel %vm8075_vm12, %v5460_v50, %v4923_v11  ;;  %v4877_v40 = vunpack.i.l.bf16 %v6759_v44  ;;  %v4903_v29 = vunpack.i.h.bf16 %v6795_v18  ;;  %vm8077_vm4 = vmmov %vm8074_vm11  ;;  %v8084_v42 = vld [vmem:[#allocation23_spill] sm:$0xff] }
 0x226   : > { %4469 = vmatmul.mubr.msk.bf16.gmra.mrb[20].mxu1 %vm8063_vm8, %v3103_v60  ;;  %4006 = vrot.lane.b32.xlu0 %v8064_v59, %s5483_s21  ;;  %vm8078_vm13 = vmmov %vm8077_vm4  ;;  %v4902_v60 = vunpack.i.l.bf16 %v6795_v18  ;;  %v4908_v61 = vunpack.i.h.bf16 %v6822_v49  ;;  %v4907_v6 = vunpack.i.l.bf16 %v6822_v49  ;;  %v4952_v18 = vunpack.i.l.bf16 %v6903_v7 }
 0x227   : > { %v6912_v33 = vpop.permute.xlu1 %4945  ;;  %vm8082_vm8 = vcmask 97280   ;;  %vm8085_vm2 = vcmask 162816   ;;  %vm8087_vm15 = vcmask 130048  }
 0x228   : > { %v6916_v53 = vpop.permute.xlu0 %4955  ;;  %vm8083_vm5 = vmmov %vm8082_vm8 }
 0x229   : > { %4008 = vrot.lane.b32.xlu1 %v8065_v39, %s5483_s21  ;;  %v4953_v39 = vunpack.i.h.bf16 %v6903_v7  ;;  %v4957_v9 = vunpack.i.l.bf16 %v6916_v53  ;;  %vm8086_vm7 = vmmov %vm8085_vm2 }
 0x22a   : > { %4010 = vrot.lane.b32.xlu0 %v8066_v14, %s5483_s21  ;;  %vm8088_vm11 = vmmov %vm8087_vm15 }
 0x22b   : > { %v4966_v5 = vpop.permute.xlu1 %4965  ;;  %vm8089_vm12 = vmmov %vm8083_vm5 }
 0x22c   : > { %v4961_v43 = vpop.permute.xlu0 %4960  ;;  %v4968_v20 = vunpack.i.h.bf16 %v4966_v5  ;;  %v4967_v19 = vunpack.i.l.bf16 %v4966_v5 }
 0x22d   : > { %v4963_v2 = vunpack.i.h.bf16 %v4961_v43  ;;  %v4962_v0 = vunpack.i.l.bf16 %v4961_v43  ;;  %4012 = vrot.lane.b32.xlu1 %v8076_v16, %s5483_s21  ;;  %v2912_v43 = vsel %vm8089_vm12, %v2879_v48, %v4903_v29  ;;  %v4882_v16 = vunpack.i.l.bf16 %v6782_v45 }
 0x22e   : > { %v2896_v52 = vsel %vm8077_vm4, %v2863_v24, %v4967_v19  ;;  %v2897_v63 = vsel %vm8078_vm13, %v2864_v57, %v4968_v20  ;;  %4014 = vrot.lane.b32.xlu0 %v8079_v25, %s5483_s21  ;;  %vm8090_vm4 = vmmov %vm8083_vm5  ;;  %v8133_v24 = vld [vmem:[#allocation56_spill] sm:$0xff] }
 0x22f   : > { %v6943_v59 = vsel %vm8080_vm3, %v3057_v30, %v4962_v0  ;;  %v6946_v55 = vsel %vm8061_vm1, %v3058_v23, %v4963_v2  ;;  %v4971_v44 = vpop.permute.xlu1 %4970  ;;  %v8081_v30 = vld [vmem:[#allocation30_spill] sm:$0xff]  ;;  %v4958_v23 = vunpack.i.h.bf16 %v6916_v53  ;;  %v2911_v20 = vsel %vm8090_vm4, %v2878_v58, %v4902_v60  ;;  %vm8091_vm13 = vmmov %vm8088_vm11 }
 0x230   : > { %v4976_v17 = vpop.permute.xlu0 %4975  ;;  %v4973_v21 = vunpack.i.h.bf16 %v4971_v44  ;;  %v4972_v11 = vunpack.i.l.bf16 %v4971_v44  ;;  %v2944_v50 = vsel %vm8091_vm13, %v2911_v20, %v4907_v6  ;;  %vm8092_vm3 = vmmov %vm8088_vm11  ;;  %v4883_v0 = vunpack.i.h.bf16 %v6782_v45  ;;  %v8096_v58 = vld [vmem:[#allocation6_spill] sm:$0xff] }
 0x231   : > { %v4978_v14 = vunpack.i.h.bf16 %v4976_v17  ;;  %v4977_v47 = vunpack.i.l.bf16 %v4976_v17  ;;  %4016 = vrot.lane.b32.xlu1 %v8081_v30, %s5483_s21  ;;  %vm8094_vm1 = vmmov %vm8085_vm2  ;;  %v4853_v60 = vunpack.i.h.bf16 %v6726_v32  ;;  %v4852_v45 = vunpack.i.l.bf16 %v6726_v32 }
 0x232   : > { %v2929_v49 = vsel %vm8082_vm8, %v2896_v52, %v4972_v11  ;;  %v2930_v36 = vsel %vm8083_vm5, %v2897_v63, %v4973_v21  ;;  %4018 = vrot.lane.b32.xlu0 %v8084_v42, %s5483_s21  ;;  %vm8095_vm8 = vmmov %vm8094_vm1  ;;  %vm8097_vm5 = vcmask 195584   ;;  %v8103_v11 = vld [vmem:[#allocation10_spill] sm:$0xff]  ;;  %v4658_v22 = vunpack.i.h.bf16 %v8133_v24 }
 0x233   : > { %v2993_v12 = vsel %vm8085_vm2, %v6879_v26, %v4977_v47  ;;  %v2994_v7 = vsel %vm8086_vm7, %v6882_v62, %v4978_v14  ;;  %v6965_v56 = vpop.permute.xlu1 %4985  ;;  %v6968_v5 = vsel %vm8087_vm15, %v2929_v49, %v4877_v40  ;;  %v6971_v53 = vsel %vm8088_vm11, %v2930_v36, %v4878_v4  ;;  %v8093_v62 = vld [vmem:[#allocation25_spill] sm:$0xff]  ;;  %vm8098_vm2 = vmmov %vm8097_vm5  ;;  %v8106_v14 = vld [vmem:[#allocation4_spill] sm:$0xff] }
 0x234   : > { %v4981_v19 = vpop.permute.xlu0 %4980  ;;  %v2945_v26 = vsel %vm8092_vm3, %v2912_v43, %v4908_v61  ;;  %v2977_v4 = vsel %vm8094_vm1, %v2944_v50, %v4952_v18  ;;  %vm8099_vm7 = vmmov %vm8098_vm2  ;;  %vm8101_vm11 = vcmask 228352   ;;  %vm8107_vm3 = vcmask 261120   ;;  %v8109_v49 = vld [vmem:[#allocation8_spill] sm:$0xff]  ;;  %v8111_v36 = vld [vmem:[#allocation14_spill] sm:$0xff] }
 0x235   : > { %v4983_v57 = vunpack.i.h.bf16 %v4981_v19  ;;  %v4982_v2 = vunpack.i.l.bf16 %v4981_v19  ;;  %4020 = vrot.lane.b32.xlu1 %v8093_v62, %s5483_s21  ;;  %v2978_v48 = vsel %vm8095_vm8, %v2945_v26, %v4953_v39  ;;  %v3010_v40 = vsel %vm8097_vm5, %v2977_v4, %v4957_v9  ;;  %vm8100_vm15 = vmmov %vm8098_vm2  ;;  %v8113_v43 = vld [vmem:[#allocation12_spill] sm:$0xff] }
 0x236   : > { %4022 = vrot.lane.b32.xlu0 %v8096_v58, %s5483_s21  ;;  %v3011_v29 = vsel %vm8098_vm2, %v2978_v48, %v4958_v23  ;;  %vm8102_vm12 = vmmov %vm8101_vm11  ;;  %vm8110_vm8 = vcmask 293888   ;;  %v8114_v19 = vld [vmem:[#allocation52_spill] sm:$0xff]  ;;  %vm8122_vm5 = vcmask 31744   ;;  %v4657_v48 = vunpack.i.l.bf16 %v8133_v24 }
 0x237   : > { %v3026_v52 = vsel %vm8099_vm7, %v2993_v12, %v4982_v2  ;;  %v3027_v63 = vsel %vm8100_vm15, %v2994_v7, %v4983_v57  ;;  %v6989_v25 = vpop.permute.xlu1 %5000  ;;  %vm8104_vm4 = vmmov %vm8101_vm11  ;;  %v8112_v7 = vld [vmem:[#allocation18_spill] sm:$0xff]  ;;  %v4618_v50 = vunpack.i.h.bf16 %v8114_v19  ;;  %v4617_v26 = vunpack.i.l.bf16 %v8114_v19  ;;  %v8115_v2 = vld [vmem:[#allocation48_spill] sm:$0xff] }
 0x238   : > { %v4991_v61 = vpop.permute.xlu0 %4990  ;;  %v6994_v44 = vsel %vm8101_vm11, %v3026_v52, %v4882_v16  ;;  %v6997_v6 = vsel %vm8102_vm12, %v3027_v63, %v4883_v0  ;;  %v3043_v39 = vsel %vm8104_vm4, %v3010_v40, %v4852_v45  ;;  %vm8105_vm13 = vmmov %vm8104_vm4  ;;  %v8116_v16 = vld [vmem:[#allocation49_spill] sm:$0xff]  ;;  %v8117_v58 = vld [vmem:[#allocation16_spill] sm:$0xff]  ;;  %vm8129_vm15 = vcmask 64512  }
 0x239   : > { %v4993_v17 = vunpack.i.h.bf16 %v4991_v61  ;;  %v4992_v21 = vunpack.i.l.bf16 %v4991_v61  ;;  %4024 = vrot.lane.b32.xlu1 %v8103_v11, %s5483_s21  ;;  %v3044_v18 = vsel %vm8105_vm13, %v3011_v29, %v4853_v60  ;;  %vm8108_vm1 = vmmov %vm8107_vm3  ;;  %v8118_v40 = vld [vmem:[#allocation50_spill] sm:$0xff]  ;;  %v8120_v61 = vld [vmem:[#allocation27_spill] sm:$0xff] }
 0x23a   : > { %4026 = vrot.lane.b32.xlu0 %v8106_v14, %s5483_s21  ;;  %v8119_v63 = vld [vmem:[#allocation54_spill] sm:$0xff]  ;;  %vm8126_vm7 = vmmov %vm8122_vm5  ;;  %v8127_v19 = vld [vmem:[#allocation53_spill] sm:$0xff] }
 0x23b   : > { %v3077_v32 = vsel %vm8107_vm3, %v3044_v18, %v4993_v17  ;;  %v3076_v47 = vsel %vm8108_vm1, %v3043_v39, %v4992_v21  ;;  %v7007_v30 = vpop.permute.xlu1 %5010  ;;  %v4653_v60 = vunpack.i.h.bf16 %v8119_v63  ;;  %v4652_v45 = vunpack.i.l.bf16 %v8119_v63  ;;  %v8121_v17 = vld [vmem:[#allocation51_spill] sm:$0xff]  ;;  %vm8130_vm11 = vmmov %vm8129_vm15  ;;  %v5461_v4 = vld [vmem:[#allocation2 + $0x5f] sm:$0xff] }
 0x23c   : > { %v3104_v23 = vpack.c.bf16 %v3077_v32, %v3076_v47  ;;  %v7009_v9 = vpop.permute.xlu0 %4995  ;;  %v4623_v21 = vunpack.i.h.bf16 %v8121_v17  ;;  %v4622_v11 = vunpack.i.l.bf16 %v8121_v17  ;;  %v4898_v39 = vunpack.i.h.bf16 %v6816_v34  ;;  %v8123_v47 = vld [vmem:[#allocation37_spill] sm:$0xff]  ;;  %vm8134_vm12 = vmmov %vm8122_vm5 }
 0x23d   : > { %4028 = vrot.lane.b32.xlu1 %v8109_v49, %s5483_s21  ;;  %v4897_v18 = vunpack.i.l.bf16 %v6816_v34  ;;  %v2856_v32 = vsel %vm8122_vm5, %v6547_v51, %v4618_v50  ;;  %vm8124_vm2 = vnez %v8123_v47  ;;  %v4948_v63 = vunpack.i.h.bf16 %v6912_v33  ;;  %v8128_v50 = vld [vmem:[#allocation29_spill] sm:$0xff]  ;;  %vm8138_vm4 = vmmov %vm8122_vm5 }
 0x23e   : > { %4472 = vmatprep.mubr.msk.bf16.mxu1 %vm8110_vm8, %v3104_v23  ;;  %4030 = vrot.lane.b32.xlu0 %v8111_v36, %s5483_s21  ;;  %v8125_v23 = vsel %vm8124_vm2, %v6009_v1, 0.0  ;;  %v4943_v36 = vunpack.i.h.bf16 %v6901_v46  ;;  %v4947_v51 = vunpack.i.l.bf16 %v6912_v33  ;;  %v2889_v1 = vsel %vm8129_vm15, %v2856_v32, %v4653_v60  ;;  %vm8139_vm13 = vmmov %vm8130_vm11 }
 0x23f   : > { %v7016_v42 = vpop.permute.xlu1 %5015  ;;  %v2855_v49 = vsel %vm8126_vm7, %v8125_v23, %v4617_v26  ;;  %v8132_v23 = vld [vmem:[#allocation26_spill] sm:$0xff]  ;;  %v2848_v33 = vsel %vm8134_vm12, %v5461_v4, %v4898_v39  ;;  %v4857_v34 = vunpack.i.l.bf16 %v6722_v3  ;;  %vm8140_vm3 = vmmov %vm8130_vm11  ;;  %vm8141_vm1 = vcmask 97280  }
 0x240   : > { %v7018_v12 = vpop.permute.xlu0 %5005  ;;  %v2888_v26 = vsel %vm8130_vm11, %v2855_v49, %v4652_v45  ;;  %v4858_v49 = vunpack.i.h.bf16 %v6722_v3  ;;  %v2881_v29 = vsel %vm8140_vm3, %v2848_v33, %v4943_v36  ;;  %vm8142_vm8 = vmmov %vm8141_vm1  ;;  %v4847_v36 = vunpack.i.l.bf16 %v6697_v41  ;;  %v8145_v33 = vld [vmem:[#allocation32_spill] sm:$0xff] }
 0x241   : > { %4032 = vrot.lane.b32.xlu1 %v8112_v7, %s5483_s21  ;;  %v4942_v7 = vunpack.i.l.bf16 %v6901_v46  ;;  %v2914_v39 = vsel %vm8142_vm8, %v2881_v29, %v4948_v63  ;;  %v4998_v29 = vunpack.i.h.bf16 %v7009_v9  ;;  %v4997_v63 = vunpack.i.l.bf16 %v7009_v9  ;;  %vm8147_vm5 = vmmov %vm8141_vm1  ;;  %v8150_v9 = vld [vmem:[#allocation42_spill] sm:$0xff] }
 0x242   : > { %4034 = vrot.lane.b32.xlu0 %v8113_v43, %s5483_s21  ;;  %vm8148_vm2 = vcmask 130048   ;;  %v8151_v0 = vsel %vm7947_vm9, %v8150_v9, 0.0  ;;  %vm8152_vm15 = vmmov %vm8138_vm4  ;;  %vm8154_vm12 = vcmask 162816  }
 0x243   : > { %v7024_v20 = vpop.permute.xlu1 %5020  ;;  %vm8149_vm7 = vmmov %vm8148_vm2  ;;  %v2849_v52 = vsel %vm8152_vm15, %v8151_v0, %v4857_v34 }
 0x244   : > { %v7028_v57 = vpop.permute.xlu0 %5035  ;;  %vm8153_vm11 = vmmov %vm8138_vm4  ;;  %v5023_v9 = vunpack.i.h.bf16 %v7024_v20 }
 0x245   : > { %4036 = vrot.lane.b32.xlu1 %v8117_v58, %s5483_s21  ;;  %v4988_v58 = vunpack.i.h.bf16 %v6965_v56  ;;  %vm8158_vm9 = vmmov %vm8140_vm3 }
 0x246   : > { %4038 = vrot.lane.b32.xlu0 %v8120_v61, %s5483_s21  ;;  %v8131_v61 = vld [vmem:[#allocation55_spill] sm:$0xff]  ;;  %vm8166_vm8 = vmmov %vm8158_vm9 }
 0x247   : > { %v7046_v14 = vpop.permute.xlu1 %5025  ;;  %v4663_v47 = vunpack.i.h.bf16 %v8131_v61  ;;  %v4662_v46 = vunpack.i.l.bf16 %v8131_v61 }
 0x248   : > { %v7057_v43 = vpop.permute.xlu0 %5040 }
 0x249   : > { %4040 = vrot.lane.b32.xlu1 %v8128_v50, %s5483_s21  ;;  %v8136_v50 = vld [vmem:[#allocation44_spill] sm:$0xff] }
 0x24a   : > { %4042 = vrot.lane.b32.xlu0 %v8132_v23, %s5483_s21  ;;  %v8137_v60 = vsel %vm7926_vm10, %v8136_v50, 0.0  ;;  %v8143_v50 = vld [vmem:[#allocation28_spill] sm:$0xff]  ;;  %vm8146_vm10 = vmmov %vm8141_vm1 }
 0x24b   : > { %v2847_v45 = vsel %vm8138_vm4, %v8137_v60, %v4897_v18  ;;  %v7079_v32 = vpop.permute.xlu1 %5030  ;;  %v4987_v18 = vunpack.i.l.bf16 %v6965_v56  ;;  %v8144_v60 = vld [vmem:[#allocation57_spill] sm:$0xff]  ;;  %v5013_v56 = vunpack.i.h.bf16 %v7007_v30  ;;  %vm8155_vm4 = vmmov %vm8154_vm12 }
 0x24c   : > { %v2880_v23 = vsel %vm8139_vm13, %v2847_v45, %v4942_v7  ;;  %v7085_v24 = vpop.permute.xlu0 %5055  ;;  %v4848_v7 = vunpack.i.h.bf16 %v6697_v41  ;;  %vm8159_vm13 = vmmov %vm8140_vm3 }
 0x24d   : > { %v2913_v4 = vsel %vm8141_vm1, %v2880_v23, %v4947_v51  ;;  %4044 = vrot.lane.b32.xlu1 %v8143_v50, %s5483_s21  ;;  %v5012_v51 = vunpack.i.l.bf16 %v7007_v30  ;;  %v7106_v23 = vsel %vm8146_vm10, %v2888_v26, %v4657_v48  ;;  %v7109_v50 = vsel %vm8147_vm5, %v2889_v1, %v4658_v22  ;;  %v5462_v30 = vld [vmem:[#allocation2 + $0x6f] sm:$0xff]  ;;  %vm8162_vm3 = vmmov %vm8153_vm11 }
 0x24e   : > { %4046 = vrot.lane.b32.xlu0 %v8145_v33, %s5483_s21  ;;  %v2946_v41 = vsel %vm8148_vm2, %v2913_v4, %v4847_v36  ;;  %v2947_v33 = vsel %vm8149_vm7, %v2914_v39, %v4848_v7  ;;  %v2850_v3 = vsel %vm8153_vm11, %v5462_v30, %v4858_v49  ;;  %v8156_v22 = vld [vmem:[#allocation34_spill] sm:$0xff]  ;;  %v5003_v1 = vunpack.i.h.bf16 %v6989_v25  ;;  %v8157_v7 = vld [vmem:[#allocation31_spill] sm:$0xff]  ;;  %vm8163_vm1 = vmmov %vm8162_vm3 }
 0x24f   : > { %v7103_v45 = vpop.permute.xlu1 %5045  ;;  %v2980_v48 = vsel %vm8154_vm12, %v2947_v33, %v4988_v58  ;;  %v2979_v26 = vsel %vm8155_vm4, %v2946_v41, %v4987_v18  ;;  %v5002_v4 = vunpack.i.l.bf16 %v6989_v25  ;;  %v2883_v0 = vsel %vm8158_vm9, %v2850_v3, %v4998_v29  ;;  %v8164_v30 = vld [vmem:[#allocation33_spill] sm:$0xff]  ;;  %vm8167_vm10 = vmmov %vm8147_vm5 }
 0x250   : > { %v5061_v62 = vpop.permute.xlu0 %5060  ;;  %v2882_v34 = vsel %vm8159_vm13, %v2849_v52, %v4997_v63  ;;  %v8161_v58 = vsel %vm6030_vm14, %v6167_v10, 0.0  ;;  %v2854_v36 = vsel %vm8163_vm1, %v6592_v31, %v5013_v56  ;;  %v5038_v33 = vunpack.i.h.bf16 %v7028_v57  ;;  %vm8165_vm14 = vmmov %vm8158_vm9 }
 0x251   : > { %4048 = vrot.lane.b32.xlu1 %v8156_v22, %s5483_s21  ;;  %v5063_v39 = vunpack.i.h.bf16 %v5061_v62  ;;  %v5062_v37 = vunpack.i.l.bf16 %v5061_v62  ;;  %v2853_v18 = vsel %vm8162_vm3, %v8161_v58, %v5012_v51  ;;  %v5022_v3 = vunpack.i.l.bf16 %v7024_v20  ;;  %vm8168_vm2 = vmmov %vm8147_vm5 }
 0x252   : > { %4050 = vrot.lane.b32.xlu0 %v8157_v7, %s5483_s21  ;;  %v5037_v29 = vunpack.i.l.bf16 %v7028_v57  ;;  %v5027_v10 = vunpack.i.l.bf16 %v7046_v14  ;;  %v5028_v56 = vunpack.i.h.bf16 %v7046_v14  ;;  %v5043_v20 = vunpack.i.h.bf16 %v7057_v43  ;;  %vm8171_vm11 = vmmov %vm8168_vm2 }
 0x253   : > { %v7136_v41 = vpop.permute.xlu1 %5050  ;;  %v2887_v22 = vsel %vm8165_vm14, %v2854_v36, %v5063_v39  ;;  %v2886_v7 = vsel %vm8166_vm8, %v2853_v18, %v5062_v37  ;;  %v5042_v49 = vunpack.i.l.bf16 %v7057_v43  ;;  %vm8169_vm7 = vcmask 195584  }
 0x254   : > { %v5066_v52 = vpop.permute.xlu0 %5065  ;;  %v3013_v62 = vsel %vm8169_vm7, %v2980_v48, %v5023_v9  ;;  %vm8170_vm15 = vmmov %vm8169_vm7  ;;  %v5033_v39 = vunpack.i.h.bf16 %v7079_v32  ;;  %v2915_v37 = vsel %vm8171_vm11, %v2882_v34, %v5037_v29  ;;  %vm8172_vm12 = vcmask 228352   ;;  %v5463_v29 = vld [vmem:[#allocation2 + $0x7f] sm:$0xff] }
 0x255   : > { %v5068_v63 = vunpack.i.h.bf16 %v5066_v52  ;;  %v5067_v51 = vunpack.i.l.bf16 %v5066_v52  ;;  %4052 = vrot.lane.b32.xlu1 %v8164_v30, %s5483_s21  ;;  %v2916_v30 = vsel %vm8168_vm2, %v2883_v0, %v5038_v33  ;;  %v3012_v14 = vsel %vm8170_vm15, %v2979_v26, %v5022_v3  ;;  %vm8173_vm4 = vmmov %vm8172_vm12 }
 0x256   : > { %v3045_v18 = vsel %vm8172_vm12, %v3012_v14, %v5027_v10  ;;  %vm8174_vm9 = vcmask 130048   ;;  %vm8178_vm14 = vcmask 261120   ;;  %vm8183_vm7 = vnez %v7904_v28 }
 0x257   : > { %v2919_v57 = vsel %vm8167_vm10, %v2886_v7, %v5067_v51  ;;  %v2920_v58 = vsel %vm8147_vm5, %v2887_v22, %v5068_v63  ;;  %v7154_v52 = vpop.permute.xlu1 %5070  ;;  %v3046_v51 = vsel %vm8173_vm4, %v3013_v62, %v5028_v56  ;;  %v5032_v63 = vunpack.i.l.bf16 %v7079_v32  ;;  %vm8175_vm13 = vmmov %vm8174_vm9  ;;  %v3667_v7 = vld [vmem:[%s7724_s7] sm:$0x3] }
 0x258   : > { %v5076_v36 = vpop.permute.xlu0 %5075  ;;  %v2952_v0 = vsel %vm8174_vm9, %v2919_v57, %v4622_v11  ;;  %v2953_v48 = vsel %vm8175_vm13, %v2920_v58, %v4623_v21  ;;  %vm8176_vm3 = vmmov %vm8174_vm9  ;;  %v5058_v62 = vunpack.i.h.bf16 %v7085_v24  ;;  %v5057_v32 = vunpack.i.l.bf16 %v7085_v24  ;;  %v8184_v24 = vld [vmem:[#allocation46_spill] sm:$0xff] }
 0x259   : > { %v5078_v43 = vunpack.i.h.bf16 %v5076_v36  ;;  %v5077_v31 = vunpack.i.l.bf16 %v5076_v36  ;;  %v2948_v26 = vsel %vm8176_vm3, %v2915_v37, %v5042_v49  ;;  %vm8177_vm1 = vmmov %vm8176_vm3  ;;  %vm8180_vm10 = vcmask 31744  }
 0x25a   : > { %v2949_v34 = vsel %vm8177_vm1, %v2916_v30, %v5043_v20  ;;  %vm8179_vm8 = vmmov %vm8178_vm14  ;;  %v2852_v11 = vsel %vm8180_vm10, %v5463_v29, %v5033_v39  ;;  %vm8181_vm5 = vcmask 162816   ;;  %v8185_v20 = vsel %vm8183_vm7, %v8184_v24, 0.0 }
 0x25b   : > { %v3078_v33 = vsel %vm8178_vm14, %v3045_v18, %v5077_v31  ;;  %v3079_v9 = vsel %vm8179_vm8, %v3046_v51, %v5078_v43  ;;  %v5081_v3 = vpop.permute.xlu1 %5080  ;;  %v2985_v21 = vsel %vm8181_vm5, %v2952_v0, %v4662_v46  ;;  %vm8182_vm2 = vmmov %vm8181_vm5  ;;  %vm8187_vm11 = vcmask 293888  }
 0x25c   : > { %v3105_v10 = vpack.c.bf16 %v3079_v9, %v3078_v33  ;;  %v5096_v17 = vpop.permute.xlu0 %5095  ;;  %v2986_v31 = vsel %vm8182_vm2, %v2953_v48, %v4663_v47  ;;  %v5083_v56 = vunpack.i.h.bf16 %v5081_v3  ;;  %v5082_v22 = vunpack.i.l.bf16 %v5081_v3  ;;  %vm8186_vm15 = vmmov %vm8180_vm10 }
 0x25d   : > { %v2851_v49 = vsel %vm8186_vm15, %v8185_v20, %v5032_v63  ;;  %v5098_v57 = vunpack.i.h.bf16 %v5096_v17  ;;  %v5097_v58 = vunpack.i.l.bf16 %v5096_v17  ;;  %vm8188_vm12 = vcmask 1041408   ;;  %vm8196_vm14 = vmmov %vm8182_vm2 }
 0x25e   : > { %4473 = vmatmul.mubr.msk.bf16.gmra.mrb[24].mxu1 %vm8187_vm11, %v3105_v10  ;;  %4535 = vmatprep.subr.msk.bf16.mxu0 %vm8188_vm12, %v3667_v7  ;;  %vm8189_vm4 = vmmov %vm8188_vm12  ;;  %v5048_v47 = vunpack.i.h.bf16 %v7103_v45  ;;  %v5047_v46 = vunpack.i.l.bf16 %v7103_v45  ;;  %v5053_v30 = vunpack.i.h.bf16 %v7136_v41  ;;  %v5052_v28 = vunpack.i.l.bf16 %v7136_v41 }
 0x25f   : > { %v3717_v61 = vsel %vm8189_vm4, %v3667_v7, 0  ;;  %v5086_v14 = vpop.permute.xlu1 %5085  ;;  %v8190_v18 = vunpack.i.l.bf16 %v8144_v60  ;;  %vm8191_vm9 = vcmask 195584   ;;  %v8192_v51 = vunpack.i.h.bf16 %v8144_v60  ;;  %vm8197_vm8 = vmmov %vm8182_vm2 }
 0x260   : > { %4497 = vmatpush3.bf16.msra.mxu0 %v3717_v61  ;;  %v5101_v39 = vpop.permute.xlu0 %5100  ;;  %v5088_v36 = vunpack.i.h.bf16 %v5086_v14  ;;  %v5087_v37 = vunpack.i.l.bf16 %v5086_v14  ;;  %vm8193_vm13 = vmmov %vm8191_vm9  ;;  %vm8194_vm3 = vcmask 64512   ;;  %v2981_v41 = vsel %vm8196_vm14, %v2948_v26, %v5097_v58 }
 0x261   : > { %v3018_v43 = vsel %vm8191_vm9, %v2985_v21, %v8190_v18  ;;  %v3019_v63 = vsel %vm8193_vm13, %v2986_v31, %v8192_v51  ;;  %v2884_v0 = vsel %vm8194_vm3, %v2851_v49, %v5082_v22  ;;  %vm8195_vm1 = vmmov %vm8194_vm3  ;;  %v5103_v48 = vunpack.i.h.bf16 %v5101_v39 }
 0x262   : > { %v2885_v45 = vsel %vm8195_vm1, %v2852_v11, %v5083_v56  ;;  %v5102_v33 = vunpack.i.l.bf16 %v5101_v39  ;;  %v2982_v9 = vsel %vm8197_vm8, %v2949_v34, %v5098_v57  ;;  %vm8198_vm10 = vcmask 97280   ;;  %vm8200_vm2 = vmmov %vm8191_vm9 }
 0x263   : > { %v2917_v3 = vsel %vm8198_vm10, %v2884_v0, %v5087_v37  ;;  %vm8199_vm5 = vmmov %vm8198_vm10  ;;  %vm8202_vm15 = vcmask 130048   ;;  %v7218_v21 = vpop.permute.xlu1 %5090  ;;  %v8204_v26 = vunpack.i.l.bf16 %v7018_v12  ;;  %vm8205_vm12 = vcmask 228352  }
 0x264   : > { %v2918_v29 = vsel %vm8199_vm5, %v2885_v45, %v5088_v36  ;;  %v3014_v10 = vsel %vm8200_vm2, %v2981_v41, %v5102_v33  ;;  %vm8201_vm7 = vmmov %vm8200_vm2  ;;  %v2950_v17 = vsel %vm8202_vm15, %v2917_v3, %v5002_v4  ;;  %v8206_v31 = vunpack.i.h.bf16 %v7018_v12  ;;  %v5106_v24 = vpop.permute.xlu0 %5105 }
 0x265   : > { %v3015_v60 = vsel %vm8201_vm7, %v2982_v9, %v5103_v48  ;;  %vm8203_vm11 = vmmov %vm8202_vm15  ;;  %v3047_v34 = vsel %vm8205_vm12, %v3014_v10, %v8204_v26  ;;  %v5108_v4 = vunpack.i.h.bf16 %v5106_v24  ;;  %v5107_v20 = vunpack.i.l.bf16 %v5106_v24  ;;  %v8228_v48 = vld [vmem:[#allocation60_spill] sm:$0xff] }
 0x266   : > { %v2951_v11 = vsel %vm8203_vm11, %v2918_v29, %v5003_v1  ;;  %vm8207_vm4 = vmmov %vm8205_vm12  ;;  %v8210_v25 = vunpack.i.l.bf16 %v8115_v2  ;;  %v8212_v49 = vunpack.i.h.bf16 %v8115_v2  ;;  %vm8214_vm14 = vcmask 261120  }
 0x267   : > { %v3048_v56 = vsel %vm8207_vm4, %v3015_v60, %v8206_v31  ;;  %vm8208_vm9 = vmmov %vm8197_vm8  ;;  %v3080_v58 = vsel %vm8214_vm14, %v3047_v34, %v5057_v32  ;;  %v5111_v37 = vpop.permute.xlu1 %5110  ;;  %v8221_v32 = vld [vmem:[#allocation58_spill] sm:$0xff]  ;;  %v8222_v51 = vunpack.i.l.bf16 %v8118_v40  ;;  %v4758_v33 = vunpack.i.h.bf16 %v8228_v48 }
 0x268   : > { %v2983_v22 = vsel %vm8208_vm9, %v2950_v17, %v5047_v46  ;;  %vm8209_vm13 = vmmov %vm8197_vm8  ;;  %v4703_v18 = vunpack.i.h.bf16 %v8221_v32  ;;  %v4757_v41 = vunpack.i.l.bf16 %v8228_v48  ;;  %vm8229_vm9 = vcmask 293888  }
 0x269   : > { %v2984_v7 = vsel %vm8209_vm13, %v2951_v11, %v5048_v47  ;;  %vm8211_vm3 = vmmov %vm8207_vm4  ;;  %v8218_v47 = vld [vmem:[#allocation59_spill] sm:$0xff]  ;;  %v8230_v9 = vunpack.i.l.bf16 %v8127_v19  ;;  %v8232_v29 = vunpack.i.h.bf16 %v8127_v19  ;;  %v8234_v10 = vunpack.i.h.bf16 %v8116_v16 }
 0x26a   : > { %v3051_v1 = vsel %vm8211_vm3, %v3018_v43, %v8210_v25  ;;  %vm8213_vm1 = vmmov %vm8211_vm3  ;;  %v4708_v14 = vunpack.i.h.bf16 %v8218_v47  ;;  %v4707_v39 = vunpack.i.l.bf16 %v8218_v47  ;;  %v4763_v17 = vunpack.i.h.bf16 %v6554_v8 }
 0x26b   : > { %v3052_v57 = vsel %vm8213_vm1, %v3019_v63, %v8212_v49  ;;  %vm8215_vm8 = vmmov %vm8214_vm14  ;;  %v8224_v63 = vunpack.i.h.bf16 %v8118_v40  ;;  %v4762_v11 = vunpack.i.l.bf16 %v6554_v8  ;;  %v5116_v34 = vpop.permute.xlu1 %5115  ;;  %v8236_v31 = vunpack.i.l.bf16 %v8116_v16 }
 0x26c   : > { %v3081_v12 = vsel %vm8215_vm8, %v3048_v56, %v5058_v62  ;;  %vm8216_vm10 = vmmov %vm8200_vm2  ;;  %v4702_v62 = vunpack.i.l.bf16 %v8221_v32  ;;  %v4808_v19 = vunpack.i.h.bf16 %v6605_v54 }
 0x26d   : > { %v3016_v61 = vsel %vm8216_vm10, %v2983_v22, %v5052_v28  ;;  %vm8217_vm5 = vmmov %vm8200_vm2  ;;  %v7252_v28 = vpop.permute.xlu0 %5120  ;;  %v3106_v43 = vpack.c.bf16 %v3081_v12, %v3080_v58  ;;  %v4807_v22 = vunpack.i.l.bf16 %v6605_v54  ;;  %v5017_v58 = vunpack.i.l.bf16 %v7016_v42 }
 0x26e   : > { %v3017_v46 = vsel %vm8217_vm5, %v2984_v7, %v5053_v30  ;;  %vm8219_vm2 = vmmov %vm8215_vm8  ;;  %vm8238_vm8 = vcmask 162816   ;;  %v5073_v12 = vunpack.i.h.bf16 %v7154_v52 }
 0x26f   : > { %v7242_v36 = vsel %vm8219_vm2, %v6997_v6, %v5108_v4  ;;  %vm8220_vm7 = vmmov %vm8219_vm2  ;;  %4476 = vmatprep.mubr.msk.bf16.mxu1 %vm8229_vm9, %v3106_v43  ;;  %v7291_v25 = vpop.permute.xlu1 %5135  ;;  %v5092_v43 = vunpack.i.l.bf16 %v7218_v21 }
 0x270   : > { %v7246_v2 = vsel %vm8220_vm7, %v6994_v44, %v5107_v20  ;;  %vm8223_vm15 = vmmov %vm8213_vm1  ;;  %v5137_v15 = vunpack.i.l.bf16 %v7291_v25 }
 0x271   : > { %v3112_v30 = vpack.c.bf16 %v7242_v36, %v7246_v2  ;;  %v3049_v6 = vsel %vm8223_vm15, %v3016_v61, %v8222_v51  ;;  %vm8225_vm11 = vmmov %vm8213_vm1  ;;  %vm8235_vm1 = vcmask 130048   ;;  %v5126_v7 = vpop.permute.xlu0 %5125  ;;  %v5072_v61 = vunpack.i.l.bf16 %v7154_v52 }
 0x272   : > { %v3050_v44 = vsel %vm8225_vm11, %v3017_v46, %v8224_v63  ;;  %vm8226_vm12 = vmmov %vm8219_vm2  ;;  %v2955_v60 = vsel %vm8235_vm1, %v7109_v50, %v8234_v10  ;;  %v5112_v46 = vunpack.i.l.bf16 %v5111_v37  ;;  %v5122_v52 = vunpack.i.l.bf16 %v7252_v28 }
 0x273   : > { %v3084_v0 = vsel %vm8226_vm12, %v3051_v1, %v4707_v39  ;;  %vm8227_vm4 = vmmov %vm8219_vm2  ;;  %v2988_v4 = vsel %vm8238_vm8, %v2955_v60, %v4703_v18  ;;  %v5113_v39 = vunpack.i.h.bf16 %v5111_v37  ;;  %v8250_v51 = vpack.c.bf16 %v6754_v27, %v6757_v13 }
 0x274   : > { %v3085_v45 = vsel %vm8227_vm4, %v3052_v57, %v4708_v14  ;;  %vm8231_vm13 = vmmov %vm8219_vm2  ;;  %v5018_v57 = vunpack.i.h.bf16 %v7016_v42  ;;  %v7299_v14 = vpop.permute.xlu1 %5140  ;;  %v5093_v42 = vunpack.i.h.bf16 %v7218_v21  ;;  %v5123_v21 = vunpack.i.h.bf16 %v7252_v28 }
 0x275   : > { %v3082_v3 = vsel %vm8231_vm13, %v3049_v6, %v8230_v9  ;;  %vm8233_vm3 = vmmov %vm8219_vm2  ;;  %v3108_v24 = vpack.c.bf16 %v3085_v45, %v3084_v0  ;;  %vm8241_vm2 = vcmask 195584   ;;  %v5131_v49 = vpop.permute.xlu0 %5130  ;;  %v8254_v6 = vld [vmem:[#allocation47_spill] sm:$0xff]  ;;  %v5118_v27 = vunpack.i.h.bf16 %v5116_v34 }
 0x276   : > { %v3083_v40 = vsel %vm8233_vm3, %v3050_v44, %v8232_v29  ;;  %vm8237_vm14 = vmmov %vm8235_vm1  ;;  %v3021_v8 = vsel %vm8241_vm2, %v2988_v4, %v4758_v33  ;;  %v8255_v63 = vsel %vm7981_vm6, %v8254_v6, 0.0  ;;  %v5464_v0 = vld [vmem:[#allocation2 + $0xef] sm:$0xff]  ;;  %v5117_v13 = vunpack.i.l.bf16 %v5116_v34  ;;  %v5465_v34 = vld [vmem:[#allocation2 + $0xff] sm:$0xff] }
 0x277   : > { %v3107_v26 = vpack.c.bf16 %v3083_v40, %v3082_v3  ;;  %v2954_v56 = vsel %vm8237_vm14, %v7106_v23, %v8236_v31  ;;  %vm8239_vm10 = vmmov %vm8238_vm8  ;;  %v5128_v33 = vunpack.i.h.bf16 %v5126_v7  ;;  %vm8260_vm6 = vcmask 64512  }
 0x278   : > { %v2987_v50 = vsel %vm8239_vm10, %v2954_v56, %v4702_v62  ;;  %vm8240_vm5 = vmmov %vm8229_vm9  ;;  %v7322_v44 = vpop.permute.xlu1 %5145  ;;  %v5133_v10 = vunpack.i.h.bf16 %v5131_v49  ;;  %v5132_v60 = vunpack.i.l.bf16 %v5131_v49  ;;  %v8265_v56 = vsel %vm7999_vm0, %v6172_v38, 0.0 }
 0x279   : > { %4477 = vmatmul.mubr.msk.bf16.gmra.mrb[28].mxu1 %vm8240_vm5, %v3107_v26  ;;  %vm8242_vm7 = vmmov %vm8241_vm2  ;;  %v7301_v32 = vpop.permute.xlu0 %5150 }
 0x27a   : > { %v3020_v20 = vsel %vm8242_vm7, %v2987_v50, %v4757_v41  ;;  %vm8243_vm15 = vmmov %vm8240_vm5  ;;  %v5127_v41 = vunpack.i.l.bf16 %v5126_v7  ;;  %v8269_v50 = vpack.c.bf16 %v6946_v55, %v6943_v59  ;;  %v5143_v59 = vunpack.i.h.bf16 %v7299_v14 }
 0x27b   : > { %4480 = vmatprep.mubr.msk.bf16.mxu1 %vm8243_vm15, %v3108_v24  ;;  %v3053_v16 = vsel %vm8225_vm11, %v3020_v20, %v4762_v11  ;;  %vm8244_vm12 = vmmov %vm8225_vm11  ;;  %v5142_v55 = vunpack.i.l.bf16 %v7299_v14 }
 0x27c   : > { %v3054_v23 = vsel %vm8244_vm12, %v3021_v8, %v4763_v17  ;;  %vm8245_vm4 = vmmov %vm8233_vm3  ;;  %v5161_v11 = vpop.permute.xlu1 %5160 }
 0x27d   : > { %v3086_v54 = vsel %vm8245_vm4, %v3053_v16, %v4807_v22  ;;  %vm8246_vm9 = vmmov %vm8233_vm3  ;;  %v5156_v48 = vpop.permute.xlu0 %5155  ;;  %v5163_v8 = vunpack.i.h.bf16 %v5161_v11  ;;  %v5162_v20 = vunpack.i.l.bf16 %v5161_v11  ;;  %v5138_v16 = vunpack.i.h.bf16 %v7291_v25  ;;  %v7386_v11 = vld [vmem:[%s7722_s5] ss:$0 sm:$0xff] }
 0x27e   : > { %v3087_v1 = vsel %vm8246_vm9, %v3054_v23, %v4808_v19  ;;  %vm8247_vm13 = vmmov %vm8238_vm8  ;;  %v5158_v9 = vunpack.i.h.bf16 %v5156_v48  ;;  %v5157_v3 = vunpack.i.l.bf16 %v5156_v48  ;;  %v5152_v25 = vunpack.i.l.bf16 %v7301_v32 }
 0x27f   : > { %v3109_v47 = vpack.c.bf16 %v3087_v1, %v3086_v54  ;;  %v2996_v18 = vsel %vm8247_vm13, %v6971_v53, %v5018_v57  ;;  %vm8248_vm3 = vmmov %vm8240_vm5  ;;  %vm8256_vm5 = vcmask 31744   ;;  %v5153_v57 = vunpack.i.h.bf16 %v7301_v32 }
 0x280   : > { %vm8249_vm1 = vmmov %vm8238_vm8  ;;  %v5166_v49 = vpop.permute.xlu1 %5165 }
 0x281   : > { %4481 = vmatmul.mubr.msk.bf16.gmra.mrb[32].mxu1 %vm8248_vm3, %v3109_v47  ;;  %v2995_v62 = vsel %vm8249_vm1, %v6968_v5, %v5017_v58  ;;  %vm8251_vm14 = vmmov %vm8248_vm3  ;;  %v2865_v5 = vsel %vm8256_vm5, %v8255_v63, %v5112_v46  ;;  %v5176_v7 = vpop.permute.xlu0 %5175  ;;  %vm8267_vm3 = vcmask 97280  }
 0x282   : > { %4484 = vmatprep.mubr.msk.bf16.mxu1 %vm8251_vm14, %v8250_v51  ;;  %vm8252_vm8 = vmmov %vm8241_vm2  ;;  %v2898_v40 = vsel %vm8260_vm6, %v2865_v5, %v5122_v52  ;;  %v5178_v38 = vunpack.i.h.bf16 %v5176_v7  ;;  %v5177_v23 = vunpack.i.l.bf16 %v5176_v7  ;;  %v5148_v51 = vunpack.i.h.bf16 %v7322_v44 }
 0x283   : > { %v3029_v37 = vsel %vm8252_vm8, %v2996_v18, %v5073_v12  ;;  %vm8253_vm10 = vmmov %vm8241_vm2  ;;  %v2931_v24 = vsel %vm8267_vm3, %v2898_v40, %v5127_v41  ;;  %vm8271_vm8 = vcmask 130048   ;;  %v5168_v12 = vunpack.i.h.bf16 %v5166_v49 }
 0x284   : > { %v3028_v53 = vsel %vm8253_vm10, %v2995_v62, %v5072_v61  ;;  %vm8257_vm2 = vmmov %vm8256_vm5  ;;  %v2964_v54 = vsel %vm8271_vm8, %v2931_v24, %v5132_v60  ;;  %v5167_v61 = vunpack.i.l.bf16 %v5166_v49  ;;  %v5171_v52 = vpop.permute.xlu1 %5170 }
 0x285   : > { %v2866_v45 = vsel %vm8257_vm2, %v5464_v0, %v5113_v39  ;;  %vm8258_vm7 = vmmov %vm8225_vm11  ;;  %v5181_v58 = vpop.permute.xlu0 %5180  ;;  %v5173_v6 = vunpack.i.h.bf16 %v5171_v52  ;;  %v5172_v63 = vunpack.i.l.bf16 %v5171_v52 }
 0x286   : > { %v3061_v35 = vsel %vm8258_vm7, %v3028_v53, %v5092_v43  ;;  %vm8259_vm15 = vmmov %vm8258_vm7  ;;  %v5182_v46 = vunpack.i.l.bf16 %v5181_v58  ;;  %vm8275_vm7 = vcmask 162816  }
 0x287   : > { %v3062_v29 = vsel %vm8259_vm15, %v3029_v37, %v5093_v42  ;;  %vm8261_vm11 = vmmov %vm8245_vm4  ;;  %v2997_v47 = vsel %vm8275_vm7, %v2964_v54, %v5177_v23  ;;  %v5147_v37 = vunpack.i.l.bf16 %v7322_v44 }
 0x288   : > { %v3094_v28 = vsel %vm8261_vm11, %v3061_v35, %v5157_v3  ;;  %vm8262_vm12 = vmmov %vm8245_vm4 }
 0x289   : > { %v3095_v17 = vsel %vm8262_vm12, %v3062_v29, %v5158_v9  ;;  %vm8263_vm4 = vmmov %vm8260_vm6  ;;  %4485 = vmatmul.mubr.msk.bf16.gmra.mrb[36].mxu1 %vm8251_vm14, %v8269_v50  ;;  %vm8279_vm12 = vcmask 195584   ;;  %v5186_v53 = vpop.permute.xlu0 %5185  ;;  %v5191_v9 = vpop.permute.xlu1 %5190 }
 0x28a   : > { %v2899_v26 = vsel %vm8263_vm4, %v2866_v45, %v5123_v21  ;;  %vm8264_vm9 = vmmov %vm8257_vm2  ;;  %v3113_v22 = vpack.c.bf16 %v3095_v17, %v3094_v28  ;;  %v3030_v62 = vsel %vm8279_vm12, %v2997_v47, %v5182_v46  ;;  %v5188_v5 = vunpack.i.h.bf16 %v5186_v53 }
 0x28b   : > { %v2868_v31 = vsel %vm8264_vm9, %v5465_v34, %v5118_v27  ;;  %vm8266_vm13 = vmmov %vm8257_vm2  ;;  %v5187_v21 = vunpack.i.l.bf16 %v5186_v53  ;;  %v5193_v35 = vunpack.i.h.bf16 %v5191_v9  ;;  %v5192_v29 = vunpack.i.l.bf16 %v5191_v9  ;;  %v7391_v34 = vld [vmem:[%s7723_s6] ss:$0 sm:$0xff] }
 0x28c   : > { %v2867_v19 = vsel %vm8266_vm13, %v8265_v56, %v5117_v13  ;;  %vm8268_vm1 = vmmov %vm8267_vm3 }
 0x28d   : > { %v2932_v4 = vsel %vm8268_vm1, %v2899_v26, %v5128_v33  ;;  %vm8270_vm0 = vmmov %vm8251_vm14 }
 0x28e   : > { %4488 = vmatprep.mubr.msk.bf16.mxu1 %vm8270_vm0, %v3112_v30  ;;  %vm8272_vm10 = vmmov %vm8271_vm8  ;;  %v5183_v30 = vunpack.i.h.bf16 %v5181_v58 }
 0x28f   : > { %v2965_v1 = vsel %vm8272_vm10, %v2932_v4, %v5133_v10  ;;  %vm8273_vm5 = vmmov %vm8263_vm4 }
 0x290   : > { %v2900_v36 = vsel %vm8273_vm5, %v2867_v19, %v5162_v20  ;;  %vm8274_vm2 = vmmov %vm8263_vm4 }
 0x291   : > { %v2901_v2 = vsel %vm8274_vm2, %v2868_v31, %v5163_v8  ;;  %vm8276_vm15 = vmmov %vm8275_vm7  ;;  %vm8290_vm2 = vcmask 261120  }
 0x292   : > { %v2998_v39 = vsel %vm8276_vm15, %v2965_v1, %v5178_v38  ;;  %vm8277_vm6 = vmmov %vm8268_vm1 }
 0x293   : > { %v2933_v14 = vsel %vm8277_vm6, %v2900_v36, %v5167_v61  ;;  %vm8278_vm11 = vmmov %vm8268_vm1 }
 0x294   : > { %v2934_v18 = vsel %vm8278_vm11, %v2901_v2, %v5168_v12  ;;  %vm8280_vm4 = vmmov %vm8279_vm12 }
 0x295   : > { %v3031_v32 = vsel %vm8280_vm4, %v2998_v39, %v5183_v30  ;;  %vm8281_vm9 = vmmov %vm8271_vm8 }
 0x296   : > { %v2966_v42 = vsel %vm8281_vm9, %v2933_v14, %v5137_v15  ;;  %vm8282_vm13 = vmmov %vm8271_vm8 }
 0x297   : > { %v2967_v43 = vsel %vm8282_vm13, %v2934_v18, %v5138_v16  ;;  %vm8283_vm3 = vmmov %vm8270_vm0  ;;  %vm8286_vm0 = vcmask 228352   ;;  %vm8298_vm13 = vcmask 31744  }
 0x298   : > { %4489 = vmatmul.mubr.msk.bf16.gmra.mrb[40].mxu1 %vm8283_vm3, %v3113_v22  ;;  %vm8284_vm1 = vmmov %vm8275_vm7  ;;  %v3063_v27 = vsel %vm8286_vm0, %v3030_v62, %v5152_v25 }
 0x299   : > { %v2999_v0 = vsel %vm8284_vm1, %v2966_v42, %v5142_v55  ;;  %vm8285_vm14 = vmmov %vm8284_vm1  ;;  %v3096_v44 = vsel %vm8290_vm2, %v3063_v27, %v5187_v21 }
 0x29a   : > { %v3000_v45 = vsel %vm8285_vm14, %v2967_v43, %v5143_v59  ;;  %vm8287_vm8 = vmmov %vm8286_vm0 }
 0x29b   : > { %v3064_v13 = vsel %vm8287_vm8, %v3031_v32, %v5153_v57  ;;  %vm8288_vm10 = vmmov %vm8280_vm4 }
 0x29c   : > { %v3032_v48 = vsel %vm8288_vm10, %v2999_v0, %v5147_v37  ;;  %vm8289_vm5 = vmmov %vm8280_vm4 }
 0x29d   : > { %v3033_v33 = vsel %vm8289_vm5, %v3000_v45, %v5148_v51  ;;  %vm8291_vm7 = vmmov %vm8290_vm2 }
 0x29e   : > { %v3097_v41 = vsel %vm8291_vm7, %v3064_v13, %v5188_v5  ;;  %vm8292_vm15 = vmmov %vm8286_vm0 }
 0x29f   : > { %v3114_v3 = vpack.c.bf16 %v3097_v41, %v3096_v44  ;;  %v3065_v40 = vsel %vm8292_vm15, %v3032_v48, %v5172_v63  ;;  %vm8293_vm6 = vmmov %vm8286_vm0 }
 0x2a0   : > { %v3066_v10 = vsel %vm8293_vm6, %v3033_v33, %v5173_v6  ;;  %vm8294_vm11 = vmmov %vm8290_vm2 }
 0x2a1   : > { %v3098_v60 = vsel %vm8294_vm11, %v3065_v40, %v5192_v29  ;;  %vm8295_vm12 = vmmov %vm8290_vm2 }
 0x2a2   : > { %v3099_v28 = vsel %vm8295_vm12, %v3066_v10, %v5193_v35  ;;  %vm8296_vm4 = vmmov %vm8283_vm3 }
 0x2a3   : > { %4492 = vmatprep.mubr.msk.bf16.mxu1 %vm8296_vm4, %v3114_v3  ;;  %v3115_v17 = vpack.c.bf16 %v3099_v28, %v3098_v60  ;;  %vm8297_vm9 = vmmov %vm8283_vm3 }
 0x2a4   : > { %vm8299_vm3 = vmmov %vm8298_vm13 }
 0x2a5   : > { %4493 = vmatmul.mubr.msk.bf16.gmra.mrb[44].mxu1 %vm8297_vm9, %v3115_v17  ;;  %vm8300_vm1 = vmmov %vm8299_vm3 }
 0x2a6   : > { %vm8301_vm14 = vmmov %vm8300_vm1 }
 0x2a7   : > { %vm8302_vm0 = vmmov %vm8300_vm1 }
 0x2a8   : > { %vm8303_vm8 = vmmov %vm8302_vm0 }
 0x2a9   : > { %vm8304_vm10 = vmmov %vm8302_vm0 }
 0x2aa   : > { %vm8305_vm5 = vmmov %vm8302_vm0 }
 0x2ab   : > { %vm8306_vm2 = vmmov %vm8302_vm0 }
 0x2ac   : > { %vm8307_vm7 = vmmov %vm8302_vm0 }
 0x2ad   : > { %vm8308_vm15 = vmmov %vm8302_vm0 }
 0x2ae   : > { %vm8309_vm6 = vmmov %vm8302_vm0 }
 0x2af   : > { %vm8310_vm11 = vmmov %vm8302_vm0 }
 0x2b0   : > { %vm8311_vm12 = vmmov %vm8302_vm0 }
 0x2b1   : > { %vm8312_vm4 = vmmov %vm8302_vm0 }
 0x2b2   : > { %vm8313_vm9 = vmmov %vm8302_vm0 }
 0x2b9   : > { %v4466_v26 = vpop.f32.mrb[16].mxu1 }
 0x2ba   : > { %v3358_v31 = vmul.f32 %v4466_v26, %v7386_v11  ;;  %v3222_v56 = vpop.f32.mrb[17].mxu1 }
 0x2bb   : > { %v3356_v19 = vmul.f32 %v7386_v11, %v3222_v56  ;;  %v4467_v22 = vpop.f32.mrb[18].mxu1 }
 0x2bc   : > { %v3397_v7 = vadd.f32 %v7391_v34, %v3358_v31  ;;  %v3359_v24 = vmul.f32 %v4467_v22, %v7386_v11  ;;  %v3225_v4 = vpop.f32.mrb[19].mxu1 }
 0x2bd   : > { %v3395_v50 = vadd.f32 %v7391_v34, %v3356_v19  ;;  %v3357_v8 = vmul.f32 %v7386_v11, %v3225_v4 }
 0x2be   : > { %v4319_v20 = vmul.f32 -1.442695, %v3397_v7  ;;  %v3398_v16 = vadd.f32 %v7391_v34, %v3359_v24 }
 0x2bf   : > { %v4317_v15 = vmul.f32 -1.442695, %v3395_v50  ;;  %v3396_v38 = vadd.f32 %v7391_v34, %v3357_v8 }
 0x2c0   : > { %5325 = vpow2.f32 %v4319_v20  ;;  %v4320_v23 = vmul.f32 -1.442695, %v3398_v16 }
 0x2c1   : > { %5327 = vpow2.f32 %v4317_v15  ;;  %v4318_v54 = vmul.f32 -1.442695, %v3396_v38 }
 0x2c2   : > { %5329 = vpow2.f32 %v4320_v23 }
 0x2c3   : > { %5331 = vpow2.f32 %v4318_v54 }
 0x2ca   : > { %v5326_v1 = vpop.eup %5325 }
 0x2cb   : > { %v5328_v59 = vpop.eup %5327  ;;  %v3525_v55 = vadd.f32 1.0, %v5326_v1 }
 0x2cc   : > { %v5330_v49 = vpop.eup %5329  ;;  %v3523_v57 = vadd.f32 1.0, %v5328_v59 }
 0x2cd   : > { %v5332_v25 = vpop.eup %5331  ;;  %5333 = vrcp.f32 %v3525_v55  ;;  %v3526_v58 = vadd.f32 1.0, %v5330_v49 }
 0x2ce   : > { %5335 = vrcp.f32 %v3523_v57  ;;  %v3524_v12 = vadd.f32 1.0, %v5332_v25 }
 0x2cf   : > { %5337 = vrcp.f32 %v3526_v58 }
 0x2d0   : > { %5339 = vrcp.f32 %v3524_v12 }
 0x2d7   : > { %v5334_v61 = vpop.eup %5333 }
 0x2d8   : > { %v5336_v36 = vpop.eup %5335  ;;  %v3621_v46 = vmul.f32 %v5334_v61, %v3397_v7 }
 0x2d9   : > { %v5338_v2 = vpop.eup %5337  ;;  %v3619_v39 = vmul.f32 %v5336_v36, %v3395_v50 }
 0x2da   : > { %v5340_v30 = vpop.eup %5339  ;;  %v3622_v47 = vmul.f32 %v5338_v2, %v3398_v16 }
 0x2db   : > { %v3620_v14 = vmul.f32 %v5340_v30, %v3396_v38 }
 0x2dc   : > { %v3652_v18 = vpack.c.bf16 %v3622_v47, %v3621_v46 }
 0x2dd   : > { %v3651_v62 = vpack.c.bf16 %v3620_v14, %v3619_v39 }
 0x2df   : > { %4498 = vmatprep.mubr.msk.bf16.mxu0 %vm8298_vm13, %v3651_v62  ;;  %vm8314_vm13 = vcmask 130048  }
 0x2e0   : > { %4499 = vmatmul.mubr.msk.bf16.vlgmr.msra.gmra.mrb[16].mxu0 %vm8299_vm3, %v3652_v18  ;;  %vm8315_vm3 = vmmov %vm8314_vm13 }
 0x2f9   : > { %v4470_v32 = vpop.f32.mrb[20].mxu1 }
 0x2fa   : > { %v3362_v42 = vmul.f32 %v4470_v32, %v7386_v11  ;;  %v3238_v43 = vpop.f32.mrb[21].mxu1 }
 0x2fb   : > { %v3360_v52 = vmul.f32 %v7386_v11, %v3238_v43  ;;  %v4471_v51 = vpop.f32.mrb[22].mxu1 }
 0x2fc   : > { %v3401_v37 = vadd.f32 %v7391_v34, %v3362_v42  ;;  %v3363_v53 = vmul.f32 %v4471_v51, %v7386_v11  ;;  %v3241_v6 = vpop.f32.mrb[23].mxu1 }
 0x2fd   : > { %v3399_v63 = vadd.f32 %v7391_v34, %v3360_v52  ;;  %v3361_v5 = vmul.f32 %v7386_v11, %v3241_v6 }
 0x2fe   : > { %v4323_v21 = vmul.f32 -1.442695, %v3401_v37  ;;  %v3402_v0 = vadd.f32 %v7391_v34, %v3363_v53 }
 0x2ff   : > { %v4321_v45 = vmul.f32 -1.442695, %v3399_v63  ;;  %v3400_v27 = vadd.f32 %v7391_v34, %v3361_v5 }
 0x300   : > { %5341 = vpow2.f32 %v4323_v21  ;;  %v4324_v13 = vmul.f32 -1.442695, %v3402_v0 }
 0x301   : > { %5343 = vpow2.f32 %v4321_v45  ;;  %v4322_v48 = vmul.f32 -1.442695, %v3400_v27 }
 0x302   : > { %5345 = vpow2.f32 %v4324_v13 }
 0x303   : > { %5347 = vpow2.f32 %v4322_v48 }
 0x30a   : > { %v5342_v33 = vpop.eup %5341 }
 0x30b   : > { %v5344_v44 = vpop.eup %5343  ;;  %v3529_v41 = vadd.f32 1.0, %v5342_v33 }
 0x30c   : > { %v5346_v9 = vpop.eup %5345  ;;  %v3527_v3 = vadd.f32 1.0, %v5344_v44 }
 0x30d   : > { %v5348_v35 = vpop.eup %5347  ;;  %5349 = vrcp.f32 %v3529_v41  ;;  %v3530_v29 = vadd.f32 1.0, %v5346_v9 }
 0x30e   : > { %5351 = vrcp.f32 %v3527_v3  ;;  %v3528_v40 = vadd.f32 1.0, %v5348_v35 }
 0x30f   : > { %5353 = vrcp.f32 %v3530_v29 }
 0x310   : > { %5355 = vrcp.f32 %v3528_v40 }
 0x317   : > { %v5350_v10 = vpop.eup %5349 }
 0x318   : > { %v5352_v60 = vpop.eup %5351  ;;  %v3625_v26 = vmul.f32 %v5350_v10, %v3401_v37 }
 0x319   : > { %v5354_v28 = vpop.eup %5353  ;;  %v3623_v56 = vmul.f32 %v5352_v60, %v3399_v63 }
 0x31a   : > { %v5356_v17 = vpop.eup %5355  ;;  %v3626_v31 = vmul.f32 %v5354_v28, %v3402_v0 }
 0x31b   : > { %v3624_v19 = vmul.f32 %v5356_v17, %v3400_v27 }
 0x31c   : > { %v3654_v22 = vpack.c.bf16 %v3626_v31, %v3625_v26 }
 0x31d   : > { %v3653_v7 = vpack.c.bf16 %v3624_v19, %v3623_v56 }
 0x31f   : > { %4502 = vmatprep.mubr.msk.bf16.mxu0 %vm8300_vm1, %v3653_v7  ;;  %vm8316_vm1 = vmmov %vm8315_vm3 }
 0x320   : > { %4503 = vmatmul.mubr.msk.bf16.gmra.mrb[20].mxu0 %vm8301_vm14, %v3654_v22  ;;  %vm8317_vm14 = vmmov %vm8316_vm1 }
 0x331   : > { %v4474_v24 = vpop.f32.mrb[24].mxu1 }
 0x332   : > { %v3366_v4 = vmul.f32 %v4474_v24, %v7386_v11  ;;  %v3254_v50 = vpop.f32.mrb[25].mxu1 }
 0x333   : > { %v3364_v8 = vmul.f32 %v7386_v11, %v3254_v50  ;;  %v4475_v20 = vpop.f32.mrb[26].mxu1 }
 0x334   : > { %v7416_v16 = vadd.f32 %v7391_v34, %v3366_v4  ;;  %v3367_v15 = vmul.f32 %v4475_v20, %v7386_v11  ;;  %v3257_v38 = vpop.f32.mrb[27].mxu1 }
 0x335   : > { %v7420_v23 = vadd.f32 %v7391_v34, %v3364_v8  ;;  %v3365_v54 = vmul.f32 %v7386_v11, %v3257_v38 }
 0x336   : > { %v4327_v1 = vmul.f32 -1.442695, %v7416_v16  ;;  %v7425_v59 = vadd.f32 %v7391_v34, %v3367_v15 }
 0x337   : > { %v4325_v55 = vmul.f32 -1.442695, %v7420_v23  ;;  %v7429_v49 = vadd.f32 %v7391_v34, %v3365_v54 }
 0x338   : > { %5357 = vpow2.f32 %v4327_v1  ;;  %v4328_v57 = vmul.f32 -1.442695, %v7425_v59 }
 0x339   : > { %5359 = vpow2.f32 %v4325_v55  ;;  %v4326_v25 = vmul.f32 -1.442695, %v7429_v49 }
 0x33a   : > { %5361 = vpow2.f32 %v4328_v57 }
 0x33b   : > { %5363 = vpow2.f32 %v4326_v25 }
 0x342   : > { %v5358_v36 = vpop.eup %5357 }
 0x343   : > { %v5360_v46 = vpop.eup %5359  ;;  %v3533_v47 = vadd.f32 1.0, %v5358_v36 }
 0x344   : > { %v5362_v62 = vpop.eup %5361  ;;  %v3531_v32 = vadd.f32 1.0, %v5360_v46 }
 0x345   : > { %v5364_v52 = vpop.eup %5363  ;;  %5365 = vrcp.f32 %v3533_v47  ;;  %v3534_v51 = vadd.f32 1.0, %v5362_v62 }
 0x346   : > { %5367 = vrcp.f32 %v3531_v32  ;;  %v3532_v6 = vadd.f32 1.0, %v5364_v52 }
 0x347   : > { %5369 = vrcp.f32 %v3534_v51 }
 0x348   : > { %5371 = vrcp.f32 %v3532_v6 }
 0x34c   : > { %v4478_v58 = vpop.f32.mrb[28].mxu1 }
 0x34d   : > { %v3370_v12 = vmul.f32 %v4478_v58, %v7386_v11  ;;  %v3270_v61 = vpop.f32.mrb[29].mxu1 }
 0x34e   : > { %v3368_v2 = vmul.f32 %v7386_v11, %v3270_v61  ;;  %v4479_v30 = vpop.f32.mrb[30].mxu1 }
 0x34f   : > { %v7436_v39 = vadd.f32 %v7391_v34, %v3370_v12  ;;  %v3371_v14 = vmul.f32 %v4479_v30, %v7386_v11  ;;  %v3273_v18 = vpop.f32.mrb[31].mxu1  ;;  %v5366_v28 = vpop.eup %5365 }
 0x350   : > { %v7440_v42 = vadd.f32 %v7391_v34, %v3368_v2  ;;  %v3369_v43 = vmul.f32 %v7386_v11, %v3273_v18  ;;  %v5368_v26 = vpop.eup %5367  ;;  %v3629_v4 = vmul.f32 %v5366_v28, %v7416_v16 }
 0x351   : > { %v4331_v37 = vmul.f32 -1.442695, %v7436_v39  ;;  %v7445_v53 = vadd.f32 %v7391_v34, %v3371_v14  ;;  %v5370_v19 = vpop.eup %5369  ;;  %v3627_v38 = vmul.f32 %v5368_v26, %v7420_v23 }
 0x352   : > { %v4329_v63 = vmul.f32 -1.442695, %v7440_v42  ;;  %v7449_v5 = vadd.f32 %v7391_v34, %v3369_v43  ;;  %v5372_v24 = vpop.eup %5371  ;;  %v3630_v50 = vmul.f32 %v5370_v19, %v7425_v59 }
 0x353   : > { %v4332_v21 = vmul.f32 -1.442695, %v7445_v53  ;;  %5373 = vpow2.f32 %v4331_v37  ;;  %v3628_v54 = vmul.f32 %v5372_v24, %v7429_v49 }
 0x354   : > { %v4330_v0 = vmul.f32 -1.442695, %v7449_v5  ;;  %v4482_v45 = vpop.f32.mrb[32].mxu1  ;;  %5375 = vpow2.f32 %v4329_v63  ;;  %v3656_v58 = vpack.c.bf16 %v3630_v50, %v3629_v4 }
 0x355   : > { %v3374_v27 = vmul.f32 %v4482_v45, %v7386_v11  ;;  %v3286_v13 = vpop.f32.mrb[33].mxu1  ;;  %5377 = vpow2.f32 %v4332_v21  ;;  %v3655_v61 = vpack.c.bf16 %v3628_v54, %v3627_v38 }
 0x356   : > { %v3372_v48 = vmul.f32 %v7386_v11, %v3286_v13  ;;  %v4483_v33 = vpop.f32.mrb[34].mxu1  ;;  %5379 = vpow2.f32 %v4330_v0 }
 0x357   : > { %v7456_v44 = vadd.f32 %v7391_v34, %v3374_v27  ;;  %v3375_v41 = vmul.f32 %v4483_v33, %v7386_v11  ;;  %v3289_v9 = vpop.f32.mrb[35].mxu1  ;;  %4506 = vmatprep.mubr.msk.bf16.mxu0 %vm8302_vm0, %v3655_v61  ;;  %vm8318_vm0 = vmmov %vm8316_vm1 }
 0x358   : > { %v7460_v3 = vadd.f32 %v7391_v34, %v3372_v48  ;;  %v3373_v35 = vmul.f32 %v7386_v11, %v3289_v9  ;;  %4507 = vmatmul.mubr.msk.bf16.gmra.mrb[24].mxu0 %vm8303_vm8, %v3656_v58  ;;  %vm8319_vm8 = vmmov %vm8318_vm0 }
 0x359   : > { %v4335_v29 = vmul.f32 -1.442695, %v7456_v44  ;;  %v7465_v40 = vadd.f32 %v7391_v34, %v3375_v41 }
 0x35a   : > { %v4333_v10 = vmul.f32 -1.442695, %v7460_v3  ;;  %v7469_v60 = vadd.f32 %v7391_v34, %v3373_v35 }
 0x35b   : > { %5381 = vpow2.f32 %v4335_v29  ;;  %v4336_v17 = vmul.f32 -1.442695, %v7465_v40 }
 0x35c   : > { %5383 = vpow2.f32 %v4333_v10  ;;  %v4334_v31 = vmul.f32 -1.442695, %v7469_v60  ;;  %v4486_v56 = vpop.f32.mrb[36].mxu1 }
 0x35d   : > { %5385 = vpow2.f32 %v4336_v17  ;;  %v3378_v22 = vmul.f32 %v4486_v56, %v7386_v11  ;;  %v3302_v7 = vpop.f32.mrb[37].mxu1  ;;  %v5374_v15 = vpop.eup %5373 }
 0x35e   : > { %5387 = vpow2.f32 %v4334_v31  ;;  %v3376_v8 = vmul.f32 %v7386_v11, %v3302_v7  ;;  %v4487_v20 = vpop.f32.mrb[38].mxu1  ;;  %v5376_v25 = vpop.eup %5375  ;;  %v3537_v16 = vadd.f32 1.0, %v5374_v15 }
 0x35f   : > { %v7480_v1 = vadd.f32 %v7391_v34, %v3378_v22  ;;  %v3379_v55 = vmul.f32 %v4487_v20, %v7386_v11  ;;  %v3305_v57 = vpop.f32.mrb[39].mxu1  ;;  %v5378_v12 = vpop.eup %5377  ;;  %v3535_v36 = vadd.f32 1.0, %v5376_v25 }
 0x360   : > { %v7484_v59 = vadd.f32 %v7391_v34, %v3376_v8  ;;  %v3377_v2 = vmul.f32 %v7386_v11, %v3305_v57  ;;  %v5380_v23 = vpop.eup %5379  ;;  %5389 = vrcp.f32 %v3537_v16  ;;  %v3538_v49 = vadd.f32 1.0, %v5378_v12 }
 0x361   : > { %v4339_v30 = vmul.f32 -1.442695, %v7480_v1  ;;  %v7489_v46 = vadd.f32 %v7391_v34, %v3379_v55  ;;  %5391 = vrcp.f32 %v3535_v36  ;;  %v3536_v47 = vadd.f32 1.0, %v5380_v23 }
 0x362   : > { %v4337_v14 = vmul.f32 -1.442695, %v7484_v59  ;;  %5393 = vrcp.f32 %v3538_v49  ;;  %v7495_v32 = vadd.f32 %v7391_v34, %v3377_v2 }
 0x363   : > { %5395 = vrcp.f32 %v3536_v47  ;;  %v4340_v6 = vmul.f32 -1.442695, %v7489_v46 }
 0x364   : > { %5397 = vpow2.f32 %v4339_v30  ;;  %v4338_v10 = vmul.f32 -1.442695, %v7495_v32 }
 0x365   : > { %v5382_v62 = vpop.eup %5381  ;;  %5399 = vpow2.f32 %v4337_v14 }
 0x366   : > { %v5384_v51 = vpop.eup %5383  ;;  %v3541_v37 = vadd.f32 1.0, %v5382_v62 }
 0x367   : > { %v5386_v0 = vpop.eup %5385  ;;  %v3539_v45 = vadd.f32 1.0, %v5384_v51 }
 0x368   : > { %v5388_v33 = vpop.eup %5387  ;;  %5401 = vrcp.f32 %v3541_v37  ;;  %v3542_v41 = vadd.f32 1.0, %v5386_v0 }
 0x369   : > { %5403 = vrcp.f32 %v3539_v45  ;;  %v3540_v29 = vadd.f32 1.0, %v5388_v33 }
 0x36a   : > { %5405 = vrcp.f32 %v3542_v41  ;;  %v5390_v56 = vpop.eup %5389 }
 0x36b   : > { %v4490_v18 = vpop.f32.mrb[40].mxu1  ;;  %5407 = vrcp.f32 %v3540_v29  ;;  %v5392_v7 = vpop.eup %5391  ;;  %v3633_v20 = vmul.f32 %v5390_v56, %v7436_v39 }
 0x36c   : > { %v3382_v43 = vmul.f32 %v4490_v18, %v7386_v11  ;;  %v3318_v52 = vpop.f32.mrb[41].mxu1  ;;  %5409 = vpow2.f32 %v4340_v6  ;;  %v5394_v8 = vpop.eup %5393  ;;  %v3631_v15 = vmul.f32 %v5392_v7, %v7440_v42 }
 0x36d   : > { %v3380_v63 = vmul.f32 %v7386_v11, %v3318_v52  ;;  %v4491_v21 = vpop.f32.mrb[42].mxu1  ;;  %5411 = vpow2.f32 %v4338_v10  ;;  %v5396_v55 = vpop.eup %5395  ;;  %v3634_v57 = vmul.f32 %v5394_v8, %v7445_v53 }
 0x36e   : > { %v7501_v27 = vadd.f32 %v7391_v34, %v3382_v43  ;;  %v3383_v13 = vmul.f32 %v4491_v21, %v7386_v11  ;;  %v3321_v48 = vpop.f32.mrb[43].mxu1  ;;  %v5398_v12 = vpop.eup %5397  ;;  %v3632_v61 = vmul.f32 %v5396_v55, %v7449_v5 }
 0x36f   : > { %v7505_v9 = vadd.f32 %v7391_v34, %v3380_v63  ;;  %v3381_v35 = vmul.f32 %v7386_v11, %v3321_v48  ;;  %v5400_v36 = vpop.eup %5399  ;;  %v3658_v2 = vpack.c.bf16 %v3634_v57, %v3633_v20  ;;  %v3545_v23 = vadd.f32 1.0, %v5398_v12 }
 0x370   : > { %v7510_v28 = vadd.f32 %v7391_v34, %v3383_v13  ;;  %v4343_v17 = vmul.f32 -1.442695, %v7501_v27  ;;  %v3657_v30 = vpack.c.bf16 %v3632_v61, %v3631_v15  ;;  %v3543_v47 = vadd.f32 1.0, %v5400_v36 }
 0x371   : > { %v7514_v26 = vadd.f32 %v7391_v34, %v3381_v35  ;;  %v4341_v31 = vmul.f32 -1.442695, %v7505_v9 }
 0x372   : > { %v4344_v19 = vmul.f32 -1.442695, %v7510_v28  ;;  %5413 = vpow2.f32 %v4343_v17  ;;  %v5402_v49 = vpop.eup %5401  ;;  %4510 = vmatprep.mubr.msk.bf16.mxu0 %vm8304_vm10, %v3657_v30  ;;  %vm8320_vm10 = vmmov %vm8318_vm0 }
 0x373   : > { %v4342_v24 = vmul.f32 -1.442695, %v7514_v26  ;;  %5415 = vpow2.f32 %v4341_v31  ;;  %v5404_v5 = vpop.eup %5403  ;;  %v3637_v51 = vmul.f32 %v5402_v49, %v7456_v44  ;;  %4511 = vmatmul.mubr.msk.bf16.gmra.mrb[28].mxu0 %vm8305_vm5, %v3658_v2  ;;  %vm8321_vm5 = vmmov %vm8318_vm0 }
 0x374   : > { %5417 = vpow2.f32 %v4344_v19 }
 0x375   : > { %5419 = vpow2.f32 %v4342_v24 }
 0x376   : > { %5421 = vrcp.f32 %v3545_v23 }
 0x377   : > { %5423 = vrcp.f32 %v3543_v47 }
 0x378   : > { %v4494_v22 = vpop.f32.mrb[44].mxu1 }
 0x379   : > { %v3386_v4 = vmul.f32 %v4494_v22, %v7386_v11  ;;  %v3334_v50 = vpop.f32.mrb[45].mxu1 }
 0x37a   : > { %v3384_v38 = vmul.f32 %v7386_v11, %v3334_v50  ;;  %v4495_v54 = vpop.f32.mrb[46].mxu1 }
 0x37b   : > { %v7525_v25 = vadd.f32 %v7391_v34, %v3386_v4  ;;  %v3387_v58 = vmul.f32 %v4495_v54, %v7386_v11  ;;  %v3337_v16 = vpop.f32.mrb[47].mxu1 }
 0x37c   : > { %v7530_v39 = vadd.f32 %v7391_v34, %v3384_v38  ;;  %v3385_v42 = vmul.f32 %v7386_v11, %v3337_v16  ;;  %v5406_v11 = vpop.eup %5405 }
 0x37d   : > { %v4347_v53 = vmul.f32 -1.442695, %v7525_v25  ;;  %v7536_v18 = vadd.f32 %v7391_v34, %v3387_v58  ;;  %v5408_v52 = vpop.eup %5407  ;;  %v3638_v37 = vmul.f32 %v5406_v11, %v7465_v40  ;;  %v3991_v11 = vpop.permute.xlu0 %3990 }
 0x37e   : > { %v4345_v14 = vmul.f32 -1.442695, %v7530_v39  ;;  %v7539_v62 = vadd.f32 %v7391_v34, %v3385_v42  ;;  %v5410_v63 = vpop.eup %5409  ;;  %v3635_v34 = vmul.f32 %v5404_v5, %v7460_v3  ;;  %v3636_v21 = vmul.f32 %v5408_v52, %v7469_v60 }
 0x37f   : > { %v4348_v43 = vmul.f32 -1.442695, %v7536_v18  ;;  %5425 = vpow2.f32 %v4347_v53  ;;  %v5412_v0 = vpop.eup %5411  ;;  %v3660_v45 = vpack.c.bf16 %v3638_v37, %v3637_v51  ;;  %v3546_v13 = vadd.f32 1.0, %v5410_v63 }
 0x380   : > { %v4346_v6 = vmul.f32 -1.442695, %v7539_v62  ;;  %5427 = vpow2.f32 %v4345_v14  ;;  %v5414_v48 = vpop.eup %5413  ;;  %v3659_v33 = vpack.c.bf16 %v3636_v21, %v3635_v34  ;;  %v3544_v44 = vadd.f32 1.0, %v5412_v0 }
 0x381   : > { %5429 = vpow2.f32 %v4348_v43  ;;  %v5416_v40 = vpop.eup %5415  ;;  %v3549_v41 = vadd.f32 1.0, %v5414_v48  ;;  %v7572_v43 = vld [vmem:[%s7725_s8] ss:$0 sm:$0xff]  ;;  %v3995_v21 = vpop.permute.xlu0 %3994 }
 0x382   : > { %5431 = vpow2.f32 %v4346_v6  ;;  %v5418_v35 = vpop.eup %5417  ;;  %v3547_v29 = vadd.f32 1.0, %v5416_v40  ;;  %4514 = vmatprep.mubr.msk.bf16.mxu0 %vm8306_vm2, %v3659_v33  ;;  %vm8322_vm2 = vmmov %vm8318_vm0 }
 0x383   : > { %5433 = vrcp.f32 %v3546_v13  ;;  %v5420_v3 = vpop.eup %5419  ;;  %v3550_v60 = vadd.f32 1.0, %v5418_v35  ;;  %4515 = vmatmul.mubr.msk.bf16.gmra.mrb[32].mxu0 %vm8307_vm7, %v3660_v45  ;;  %vm8323_vm7 = vmmov %vm8318_vm0 }
 0x384   : > { %5435 = vrcp.f32 %v3544_v44  ;;  %v3548_v10 = vadd.f32 1.0, %v5420_v3  ;;  %v5422_v17 = vpop.eup %5421 }
 0x385   : > { %5437 = vrcp.f32 %v3549_v41  ;;  %v5424_v31 = vpop.eup %5423  ;;  %v3641_v38 = vmul.f32 %v5422_v17, %v7480_v1  ;;  %v3999_v17 = vpop.permute.xlu0 %3998 }
 0x386   : > { %5439 = vrcp.f32 %v3547_v29  ;;  %v3639_v57 = vmul.f32 %v5424_v31, %v7484_v59 }
 0x387   : > { %5441 = vrcp.f32 %v3550_v60 }
 0x388   : > { %5443 = vrcp.f32 %v3548_v10 }
 0x389   : > { %v5426_v56 = vpop.eup %5425 }
 0x38a   : > { %v5428_v19 = vpop.eup %5427  ;;  %v3553_v22 = vadd.f32 1.0, %v5426_v56 }
 0x38b   : > { %v5430_v7 = vpop.eup %5429  ;;  %v3551_v24 = vadd.f32 1.0, %v5428_v19 }
 0x38c   : > { %v5432_v4 = vpop.eup %5431  ;;  %5445 = vrcp.f32 %v3553_v22  ;;  %v3554_v50 = vadd.f32 1.0, %v5430_v7 }
 0x38d   : > { %v5434_v8 = vpop.eup %5433  ;;  %5447 = vrcp.f32 %v3551_v24  ;;  %v3552_v20 = vadd.f32 1.0, %v5432_v4 }
 0x38e   : > { %v5436_v15 = vpop.eup %5435  ;;  %v3642_v54 = vmul.f32 %v5434_v8, %v7489_v46  ;;  %5449 = vrcp.f32 %v3554_v50 }
 0x38f   : > { %v5438_v55 = vpop.eup %5437  ;;  %v3640_v58 = vmul.f32 %v5436_v15, %v7495_v32  ;;  %5451 = vrcp.f32 %v3552_v20  ;;  %v4003_v20 = vpop.permute.xlu0 %4002 }
 0x390   : > { %v5440_v16 = vpop.eup %5439  ;;  %v3662_v12 = vpack.c.bf16 %v3642_v54, %v3641_v38  ;;  %v3645_v2 = vmul.f32 %v5438_v55, %v7501_v27 }
 0x391   : > { %v5442_v61 = vpop.eup %5441  ;;  %v3661_v42 = vpack.c.bf16 %v3640_v58, %v3639_v57  ;;  %v3643_v1 = vmul.f32 %v5440_v16, %v7505_v9 }
 0x392   : > { %v5444_v36 = vpop.eup %5443  ;;  %v3646_v23 = vmul.f32 %v5442_v61, %v7510_v28 }
 0x393   : > { %v3644_v46 = vmul.f32 %v5444_v36, %v7514_v26  ;;  %4518 = vmatprep.mubr.msk.bf16.mxu0 %vm8308_vm15, %v3661_v42  ;;  %vm8324_vm15 = vmmov %vm8318_vm0 }
 0x394   : > { %v3664_v53 = vpack.c.bf16 %v3646_v23, %v3645_v2  ;;  %4519 = vmatmul.mubr.msk.bf16.gmra.mrb[36].mxu0 %vm8309_vm6, %v3662_v12  ;;  %vm8325_vm6 = vmmov %vm8318_vm0 }
 0x395   : > { %v3663_v59 = vpack.c.bf16 %v3644_v46, %v3643_v1  ;;  %v4007_v1 = vpop.permute.xlu0 %4006 }
 0x396   : > { %v5446_v32 = vpop.eup %5445 }
 0x397   : > { %v5448_v49 = vpop.eup %5447  ;;  %4522 = vmatprep.mubr.msk.bf16.mxu0 %vm8310_vm11, %v3663_v59  ;;  %v3649_v27 = vmul.f32 %v5446_v32, %v7525_v25  ;;  %v3993_v25 = vpop.permute.xlu1 %3992  ;;  %vm8326_vm11 = vmmov %vm8318_vm0 }
 0x398   : > { %v5450_v30 = vpop.eup %5449  ;;  %v3647_v9 = vmul.f32 %v5448_v49, %v7530_v39  ;;  %v7577_v39 = vld [vmem:[%s7726_s9] ss:$0 sm:$0xff] }
 0x399   : > { %v5452_v47 = vpop.eup %5451  ;;  %v3650_v28 = vmul.f32 %v5450_v30, %v7536_v18 }
 0x39a   : > { %v3648_v26 = vmul.f32 %v5452_v47, %v7539_v62 }
 0x39b   : > { %v3666_v14 = vpack.c.bf16 %v3650_v28, %v3649_v27  ;;  %v3997_v33 = vpop.permute.xlu1 %3996 }
 0x39c   : > { %v3665_v5 = vpack.c.bf16 %v3648_v26, %v3647_v9  ;;  %4523 = vmatmul.mubr.msk.bf16.gmra.mrb[40].mxu0 %vm8311_vm12, %v3664_v53  ;;  %v4011_v53 = vpop.permute.xlu0 %4010  ;;  %vm8327_vm12 = vmmov %vm8318_vm0 }
 0x39e   : > { %4526 = vmatprep.mubr.msk.bf16.mxu0 %vm8312_vm4, %v3665_v5  ;;  %vm8328_vm4 = vmmov %vm8318_vm0 }
 0x39f   : > { %v4001_v31 = vpop.permute.xlu1 %4000 }
 0x3a3   : > { %v4005_v57 = vpop.permute.xlu1 %4004 }
 0x3a4   : > { %4527 = vmatmul.mubr.msk.bf16.gmra.mrb[44].mxu0 %vm8313_vm9, %v3666_v14  ;;  %v4015_v14 = vpop.permute.xlu0 %4014  ;;  %vm8329_vm9 = vmmov %vm8318_vm0 }
 0x3a7   : > { %v4009_v46 = vpop.permute.xlu1 %4008 }
 0x3ab   : > { %v4013_v59 = vpop.permute.xlu1 %4012 }
 0x3b3   : > { %v4500_v18 = vpop.f32.mrb[16].mxu0 }
 0x3b4   : > { %v3889_v62 = vmul.f32 %v4500_v18, %v7572_v43  ;;  %v3753_v52 = vpop.f32.mrb[17].mxu0 }
 0x3b5   : > { %v3887_v51 = vmul.f32 %v7572_v43, %v3753_v52  ;;  %v4501_v37 = vpop.f32.mrb[18].mxu0 }
 0x3b6   : > { %v3928_v6 = vadd.f32 %v7577_v39, %v3889_v62  ;;  %v3890_v63 = vmul.f32 %v4501_v37, %v7572_v43  ;;  %v3756_v34 = vpop.f32.mrb[19].mxu0  ;;  %v4017_v62 = vpop.permute.xlu1 %4016 }
 0x3b7   : > { %v3926_v0 = vadd.f32 %v7577_v39, %v3887_v51  ;;  %v3888_v45 = vmul.f32 %v7572_v43, %v3756_v34 }
 0x3b8   : > { %v4088_v13 = vadd.f32 %v3995_v21, %v3928_v6  ;;  %v3929_v48 = vadd.f32 %v7577_v39, %v3890_v63 }
 0x3b9   : > { %v4086_v44 = vadd.f32 %v3991_v11, %v3926_v0  ;;  %v3927_v40 = vadd.f32 %v7577_v39, %v3888_v45  ;;  %v4019_v0 = vpop.permute.xlu0 %4018 }
 0x3ba   : > { %v4120_v41 = vmax.f32 %v4088_v13, 0.0  ;;  %v4089_v35 = vadd.f32 %v3997_v33, %v3929_v48  ;;  %v4021_v13 = vpop.permute.xlu1 %4020 }
 0x3bb   : > { %v4118_v29 = vmax.f32 %v4086_v44, 0.0  ;;  %v4087_v3 = vadd.f32 %v3993_v25, %v3927_v40 }
 0x3bc   : > { %4152 = vst.msk [vmem:[%s7591_s18 + $0x10] sm:$0xff] %vm8314_vm13, %v4120_v41  ;;  %v4121_v60 = vmax.f32 %v4089_v35, 0.0  ;;  %vm8330_vm13 = vmmov %vm8318_vm0 }
 0x3bd   : > { %4150 = vst.msk [vmem:[%s7591_s18] sm:$0xff] %vm8315_vm3, %v4118_v29  ;;  %v4119_v10 = vmax.f32 %v4087_v3, 0.0  ;;  %v4023_v48 = vpop.permute.xlu0 %4022  ;;  %vm8331_vm3 = vmmov %vm8318_vm0 }
 0x3be   : > { %4153 = vst.msk [vmem:[%s7591_s18 + $0x18] sm:$0xff] %vm8316_vm1, %v4121_v60  ;;  %v4025_v44 = vpop.permute.xlu1 %4024  ;;  %vm8332_vm1 = vmmov %vm8318_vm0 }
 0x3bf   : > { %4151 = vst.msk [vmem:[%s7591_s18 + $0x8] sm:$0xff] %vm8317_vm14, %v4119_v10  ;;  %vm8333_vm14 = vmmov %vm8318_vm0 }
 0x3f3   : > { %v4504_v56 = vpop.f32.mrb[20].mxu0 }
 0x3f4   : > { %v3893_v19 = vmul.f32 %v4504_v56, %v7572_v43  ;;  %v3769_v22 = vpop.f32.mrb[21].mxu0  ;;  %v4027_v56 = vpop.permute.xlu0 %4026 }
 0x3f5   : > { %v3891_v7 = vmul.f32 %v7572_v43, %v3769_v22  ;;  %v4505_v24 = vpop.f32.mrb[22].mxu0 }
 0x3f6   : > { %v3932_v4 = vadd.f32 %v7577_v39, %v3893_v19  ;;  %v3894_v50 = vmul.f32 %v4505_v24, %v7572_v43  ;;  %v3772_v8 = vpop.f32.mrb[23].mxu0 }
 0x3f7   : > { %v3930_v15 = vadd.f32 %v7577_v39, %v3891_v7  ;;  %v3892_v38 = vmul.f32 %v7572_v43, %v3772_v8 }
 0x3f8   : > { %v4092_v54 = vadd.f32 %v4003_v20, %v3932_v4  ;;  %v3933_v55 = vadd.f32 %v7577_v39, %v3894_v50  ;;  %v4029_v4 = vpop.permute.xlu1 %4028 }
 0x3f9   : > { %v4090_v58 = vadd.f32 %v3999_v17, %v3930_v15  ;;  %v3931_v16 = vadd.f32 %v7577_v39, %v3892_v38 }
 0x3fa   : > { %v4124_v12 = vmax.f32 %v4092_v54, 0.0  ;;  %v4093_v61 = vadd.f32 %v4005_v57, %v3933_v55 }
 0x3fb   : > { %v4122_v42 = vmax.f32 %v4090_v58, 0.0  ;;  %v4091_v36 = vadd.f32 %v4001_v31, %v3931_v16 }
 0x3fc   : > { %4156 = vst.msk [vmem:[%s7591_s18 + $0x30] sm:$0xff] %vm8318_vm0, %v4124_v12  ;;  %v4125_v2 = vmax.f32 %v4093_v61, 0.0  ;;  %v4031_v61 = vpop.permute.xlu0 %4030 }
 0x3fd   : > { %4154 = vst.msk [vmem:[%s7591_s18 + $0x20] sm:$0xff] %vm8319_vm8, %v4122_v42  ;;  %v4123_v23 = vmax.f32 %v4091_v36, 0.0  ;;  %vm8334_vm8 = vmmov %vm8318_vm0 }
 0x3fe   : > { %4157 = vst.msk [vmem:[%s7591_s18 + $0x38] sm:$0xff] %vm8320_vm10, %v4125_v2  ;;  %vm8335_vm10 = vmmov %vm8318_vm0 }
 0x3ff   : > { %4155 = vst.msk [vmem:[%s7591_s18 + $0x28] sm:$0xff] %vm8321_vm5, %v4123_v23  ;;  %vm8336_vm5 = vmmov %vm8318_vm0 }
 0x42b   : > { %v4508_v32 = vpop.f32.mrb[24].mxu0 }
 0x42c   : > { %v3897_v49 = vmul.f32 %v4508_v32, %v7572_v43  ;;  %v3785_v30 = vpop.f32.mrb[25].mxu0 }
 0x42d   : > { %v3895_v47 = vmul.f32 %v7572_v43, %v3785_v30  ;;  %v4509_v27 = vpop.f32.mrb[26].mxu0 }
 0x42e   : > { %v3936_v28 = vadd.f32 %v7577_v39, %v3897_v49  ;;  %v3898_v9 = vmul.f32 %v4509_v27, %v7572_v43  ;;  %v3788_v26 = vpop.f32.mrb[27].mxu0 }
 0x42f   : > { %v3934_v5 = vadd.f32 %v7577_v39, %v3895_v47  ;;  %v3896_v11 = vmul.f32 %v7572_v43, %v3788_v26 }
 0x430   : > { %v4096_v25 = vadd.f32 %v4011_v53, %v3936_v28  ;;  %v3937_v18 = vadd.f32 %v7577_v39, %v3898_v9  ;;  %v4035_v9 = vpop.permute.xlu0 %4034 }
 0x431   : > { %v4094_v52 = vadd.f32 %v4007_v1, %v3934_v5  ;;  %v3935_v51 = vadd.f32 %v7577_v39, %v3896_v11 }
 0x432   : > { %v4128_v37 = vmax.f32 %v4096_v25, 0.0  ;;  %v4097_v6 = vadd.f32 %v4013_v59, %v3937_v18 }
 0x433   : > { %v4126_v63 = vmax.f32 %v4094_v52, 0.0  ;;  %v4095_v34 = vadd.f32 %v4009_v46, %v3935_v51  ;;  %v4033_v46 = vpop.permute.xlu1 %4032 }
 0x434   : > { %4160 = vst.msk [vmem:[%s7591_s18 + $0x50] sm:$0xff] %vm8322_vm2, %v4128_v37  ;;  %v4129_v21 = vmax.f32 %v4097_v6, 0.0  ;;  %vm8337_vm2 = vmmov %vm8318_vm0 }
 0x435   : > { %4158 = vst.msk [vmem:[%s7591_s18 + $0x40] sm:$0xff] %vm8323_vm7, %v4126_v63  ;;  %v4127_v45 = vmax.f32 %v4095_v34, 0.0  ;;  %vm8338_vm7 = vmmov %vm8318_vm0 }
 0x436   : > { %4161 = vst.msk [vmem:[%s7591_s18 + $0x58] sm:$0xff] %vm8324_vm15, %v4129_v21  ;;  %vm8339_vm15 = vmmov %vm8318_vm0 }
 0x437   : > { %4159 = vst.msk [vmem:[%s7591_s18 + $0x48] sm:$0xff] %vm8325_vm6, %v4127_v45  ;;  %v4037_v5 = vpop.permute.xlu1 %4036  ;;  %vm8340_vm6 = vmmov %vm8318_vm0 }
 0x43b   : > { %v4041_v34 = vpop.permute.xlu1 %4040 }
 0x446   : > { %v4512_v33 = vpop.f32.mrb[28].mxu0 }
 0x447   : > { %v3901_v40 = vmul.f32 %v4512_v33, %v7572_v43  ;;  %v3801_v41 = vpop.f32.mrb[29].mxu0 }
 0x448   : > { %v3899_v35 = vmul.f32 %v7572_v43, %v3801_v41  ;;  %v4513_v29 = vpop.f32.mrb[30].mxu0 }
 0x449   : > { %v3940_v3 = vadd.f32 %v7577_v39, %v3901_v40  ;;  %v3902_v60 = vmul.f32 %v4513_v29, %v7572_v43  ;;  %v3804_v10 = vpop.f32.mrb[31].mxu0 }
 0x44a   : > { %v3938_v17 = vadd.f32 %v7577_v39, %v3899_v35  ;;  %v3900_v31 = vmul.f32 %v7572_v43, %v3804_v10 }
 0x44b   : > { %v4100_v19 = vadd.f32 %v4019_v0, %v3940_v3  ;;  %v3941_v22 = vadd.f32 %v7577_v39, %v3902_v60 }
 0x44c   : > { %v4098_v7 = vadd.f32 %v4015_v14, %v3938_v17  ;;  %v3939_v24 = vadd.f32 %v7577_v39, %v3900_v31  ;;  %v4045_v31 = vpop.permute.xlu1 %4044 }
 0x44d   : > { %v4132_v50 = vmax.f32 %v4100_v19, 0.0  ;;  %v4101_v8 = vadd.f32 %v4021_v13, %v3941_v22 }
 0x44e   : > { %v4130_v20 = vmax.f32 %v4098_v7, 0.0  ;;  %v4099_v15 = vadd.f32 %v4017_v62, %v3939_v24  ;;  %v4039_v62 = vpop.permute.xlu0 %4038 }
 0x44f   : > { %4164 = vst.msk [vmem:[%s7591_s18 + $0x70] sm:$0xff] %vm8326_vm11, %v4132_v50  ;;  %v4133_v54 = vmax.f32 %v4101_v8, 0.0  ;;  %vm8341_vm11 = vmmov %vm8318_vm0 }
 0x450   : > { %4162 = vst.msk [vmem:[%s7591_s18 + $0x60] sm:$0xff] %vm8327_vm12, %v4130_v20  ;;  %v4131_v58 = vmax.f32 %v4099_v15, 0.0  ;;  %vm8342_vm12 = vmmov %vm8318_vm0 }
 0x451   : > { %4165 = vst.msk [vmem:[%s7591_s18 + $0x78] sm:$0xff] %vm8328_vm4, %v4133_v54  ;;  %vm8343_vm4 = vmmov %vm8318_vm0 }
 0x452   : > { %4163 = vst.msk [vmem:[%s7591_s18 + $0x68] sm:$0xff] %vm8329_vm9, %v4131_v58  ;;  %v4043_v41 = vpop.permute.xlu0 %4042  ;;  %vm8344_vm9 = vmmov %vm8318_vm0 }
 0x456   : > { %v4516_v38 = vpop.f32.mrb[32].mxu0 }
 0x457   : > { %v3905_v55 = vmul.f32 %v4516_v38, %v7572_v43  ;;  %v3817_v57 = vpop.f32.mrb[33].mxu0  ;;  %v4047_v38 = vpop.permute.xlu0 %4046 }
 0x458   : > { %v3903_v16 = vmul.f32 %v7572_v43, %v3817_v57  ;;  %v4517_v12 = vpop.f32.mrb[34].mxu0 }
 0x459   : > { %v3944_v42 = vadd.f32 %v7577_v39, %v3905_v55  ;;  %v3906_v36 = vmul.f32 %v4517_v12, %v7572_v43  ;;  %v3820_v2 = vpop.f32.mrb[35].mxu0 }
 0x45a   : > { %v3942_v23 = vadd.f32 %v7577_v39, %v3903_v16  ;;  %v3904_v1 = vmul.f32 %v7572_v43, %v3820_v2  ;;  %v4049_v16 = vpop.permute.xlu1 %4048 }
 0x45b   : > { %v4104_v53 = vadd.f32 %v4027_v56, %v3944_v42  ;;  %v3945_v59 = vadd.f32 %v7577_v39, %v3906_v36 }
 0x45c   : > { %v4102_v32 = vadd.f32 %v4023_v48, %v3942_v23  ;;  %v3943_v49 = vadd.f32 %v7577_v39, %v3904_v1 }
 0x45d   : > { %v4136_v30 = vmax.f32 %v4104_v53, 0.0  ;;  %v4105_v47 = vadd.f32 %v4029_v4, %v3945_v59 }
 0x45e   : > { %v4134_v27 = vmax.f32 %v4102_v32, 0.0  ;;  %v4103_v28 = vadd.f32 %v4025_v44, %v3943_v49 }
 0x45f   : > { %4168 = vst.msk [vmem:[%s7591_s18 + $0x90] sm:$0xff] %vm8330_vm13, %v4136_v30  ;;  %v4137_v26 = vmax.f32 %v4105_v47, 0.0  ;;  %v4051_v30 = vpop.permute.xlu0 %4050 }
 0x460   : > { %4166 = vst.msk [vmem:[%s7591_s18 + $0x80] sm:$0xff] %vm8331_vm3, %v4134_v27  ;;  %v4135_v14 = vmax.f32 %v4103_v28, 0.0 }
 0x461   : > { %4169 = vst.msk [vmem:[%s7591_s18 + $0x98] sm:$0xff] %vm8332_vm1, %v4137_v26  ;;  %v4053_v26 = vpop.permute.xlu1 %4052 }
 0x462   : > { %4167 = vst.msk [vmem:[%s7591_s18 + $0x88] sm:$0xff] %vm8333_vm14, %v4135_v14 }
 0x467   : > { %v4520_v11 = vpop.f32.mrb[36].mxu0 }
 0x468   : > { %v3909_v25 = vmul.f32 %v4520_v11, %v7572_v43  ;;  %v3833_v18 = vpop.f32.mrb[37].mxu0 }
 0x469   : > { %v3907_v52 = vmul.f32 %v7572_v43, %v3833_v18  ;;  %v4521_v51 = vpop.f32.mrb[38].mxu0 }
 0x46a   : > { %v3948_v37 = vadd.f32 %v7577_v39, %v3909_v25  ;;  %v3910_v6 = vmul.f32 %v4521_v51, %v7572_v43  ;;  %v3836_v63 = vpop.f32.mrb[39].mxu0 }
 0x46b   : > { %v3946_v21 = vadd.f32 %v7577_v39, %v3907_v52  ;;  %v3908_v0 = vmul.f32 %v7572_v43, %v3836_v63 }
 0x46c   : > { %v4108_v45 = vadd.f32 %v4035_v9, %v3948_v37  ;;  %v3949_v13 = vadd.f32 %v7577_v39, %v3910_v6 }
 0x46d   : > { %v4106_v48 = vadd.f32 %v4031_v61, %v3946_v21  ;;  %v3947_v33 = vadd.f32 %v7577_v39, %v3908_v0 }
 0x46e   : > { %v4140_v44 = vmax.f32 %v4108_v45, 0.0  ;;  %v4109_v40 = vadd.f32 %v4037_v5, %v3949_v13 }
 0x46f   : > { %v4138_v35 = vmax.f32 %v4106_v48, 0.0  ;;  %v4107_v29 = vadd.f32 %v4033_v46, %v3947_v33  ;;  %v4524_v3 = vpop.f32.mrb[40].mxu0 }
 0x470   : > { %4172 = vst.msk [vmem:[%s7591_s18 + $0xb0] sm:$0xff] %vm8318_vm0, %v4140_v44  ;;  %v4141_v60 = vmax.f32 %v4109_v40, 0.0  ;;  %v3913_v10 = vmul.f32 %v4524_v3, %v7572_v43  ;;  %v3849_v17 = vpop.f32.mrb[41].mxu0 }
 0x471   : > { %4170 = vst.msk [vmem:[%s7591_s18 + $0xa0] sm:$0xff] %vm8334_vm8, %v4138_v35  ;;  %v4139_v56 = vmax.f32 %v4107_v29, 0.0  ;;  %v3911_v19 = vmul.f32 %v7572_v43, %v3849_v17  ;;  %v4525_v22 = vpop.f32.mrb[42].mxu0 }
 0x472   : > { %4173 = vst.msk [vmem:[%s7591_s18 + $0xb8] sm:$0xff] %vm8335_vm10, %v4141_v60  ;;  %v3952_v7 = vadd.f32 %v7577_v39, %v3913_v10  ;;  %v3914_v24 = vmul.f32 %v4525_v22, %v7572_v43  ;;  %v3852_v4 = vpop.f32.mrb[43].mxu0 }
 0x473   : > { %4171 = vst.msk [vmem:[%s7591_s18 + $0xa8] sm:$0xff] %vm8336_vm5, %v4139_v56  ;;  %v3950_v50 = vadd.f32 %v7577_v39, %v3911_v19  ;;  %v3912_v8 = vmul.f32 %v7572_v43, %v3852_v4 }
 0x474   : > { %v4112_v20 = vadd.f32 %v4043_v41, %v3952_v7  ;;  %v3953_v15 = vadd.f32 %v7577_v39, %v3914_v24 }
 0x475   : > { %v4110_v54 = vadd.f32 %v4039_v62, %v3950_v50  ;;  %v3951_v55 = vadd.f32 %v7577_v39, %v3912_v8 }
 0x476   : > { %v4144_v57 = vmax.f32 %v4112_v20, 0.0  ;;  %v4113_v58 = vadd.f32 %v4045_v31, %v3953_v15 }
 0x477   : > { %v4142_v12 = vmax.f32 %v4110_v54, 0.0  ;;  %v4111_v61 = vadd.f32 %v4041_v34, %v3951_v55  ;;  %v4528_v42 = vpop.f32.mrb[44].mxu0 }
 0x478   : > { %4176 = vst.msk [vmem:[%s7591_s18 + $0xd0] sm:$0xff] %vm8337_vm2, %v4144_v57  ;;  %v4145_v36 = vmax.f32 %v4113_v58, 0.0  ;;  %v3917_v2 = vmul.f32 %v4528_v42, %v7572_v43  ;;  %v3865_v23 = vpop.f32.mrb[45].mxu0 }
 0x479   : > { %4174 = vst.msk [vmem:[%s7591_s18 + $0xc0] sm:$0xff] %vm8338_vm7, %v4142_v12  ;;  %v4143_v1 = vmax.f32 %v4111_v61, 0.0  ;;  %v3915_v46 = vmul.f32 %v7572_v43, %v3865_v23  ;;  %v4529_v53 = vpop.f32.mrb[46].mxu0 }
 0x47a   : > { %4177 = vst.msk [vmem:[%s7591_s18 + $0xd8] sm:$0xff] %vm8339_vm15, %v4145_v36  ;;  %v3956_v59 = vadd.f32 %v7577_v39, %v3917_v2  ;;  %v3918_v32 = vmul.f32 %v4529_v53, %v7572_v43  ;;  %v3868_v49 = vpop.f32.mrb[47].mxu0 }
 0x47b   : > { %4175 = vst.msk [vmem:[%s7591_s18 + $0xc8] sm:$0xff] %vm8340_vm6, %v4143_v1  ;;  %v3954_v47 = vadd.f32 %v7577_v39, %v3915_v46  ;;  %v3916_v27 = vmul.f32 %v7572_v43, %v3868_v49 }
 0x47c   : > { %v4116_v28 = vadd.f32 %v4051_v30, %v3956_v59  ;;  %v3957_v9 = vadd.f32 %v7577_v39, %v3918_v32 }
 0x47d   : > { %v4114_v14 = vadd.f32 %v4047_v38, %v3954_v47  ;;  %v3955_v5 = vadd.f32 %v7577_v39, %v3916_v27 }
 0x47e   : > { %v4148_v11 = vmax.f32 %v4116_v28, 0.0  ;;  %v4117_v25 = vadd.f32 %v4053_v26, %v3957_v9 }
 0x47f   : > { %v4146_v18 = vmax.f32 %v4114_v14, 0.0  ;;  %v4115_v62 = vadd.f32 %v4049_v16, %v3955_v5 }
 0x480   : > { %4180 = vst.msk [vmem:[%s7591_s18 + $0xf0] sm:$0xff] %vm8341_vm11, %v4148_v11  ;;  %v4149_v52 = vmax.f32 %v4117_v25, 0.0 }
 0x481   : > { %4178 = vst.msk [vmem:[%s7591_s18 + $0xe0] sm:$0xff] %vm8342_vm12, %v4146_v18  ;;  %v4147_v51 = vmax.f32 %v4115_v62, 0.0 }
 0x482   : > { %4181 = vst.msk [vmem:[%s7591_s18 + $0xf8] sm:$0xff] %vm8343_vm4, %v4149_v52 }
 0x483   : > { %4179 = vst.msk [vmem:[%s7591_s18 + $0xe8] sm:$0xff] %vm8344_vm9, %v4147_v51 }
 0x484 PF: > { %s20_s13 = sadd.s32 1, %s5472_s13  }
 0x485   : > { %p17_p4 = scmp.ge.s32.totalorder %s20_s13, 4  }
 0x487   :  { %19 = sbr.rel (!%p17_p4) target bundleno = 1 (0x1), region = 90 }

</bundles_post_ra>
